<compile_context>
chip_gen: v5e
topology: v5e:2x2
jax: 0.10.0
libtpu: 0.0.40
codegen_flags: <defaults>
</compile_context>

<pallas_src>
import math

import jax
import jax.numpy as jnp
from jax.experimental import pallas as pl
from jax.experimental.pallas import tpu as pltpu


def _round_up(x, m):
    return ((x + m - 1) // m) * m


# ------------------------------ Pallas kernel ------------------------------ #

def _gemm_bias_relu_kernel(x_ref, w_ref, b_ref, o_ref):
    """One M-tile of relu(x @ W + b).  x/W may be bf16; accumulation is f32."""
    acc = jnp.dot(x_ref[...], w_ref[...], preferred_element_type=jnp.float32)
    acc = acc + b_ref[...]                         # (TM, C_out) + (1, C_out)
    o_ref[...] = jnp.maximum(acc, 0.0).astype(o_ref.dtype)


def conv2d_relu_pallas(x, w, b, *, stride, compute_dtype=jnp.bfloat16,
                       tm_max=512):
    """relu(conv2d_VALID(x, w, stride) + b) via an im2col GEMM Pallas kernel.

    x: (B, H, W, C_in) float32    w: (KH, KW, C_in, C_out)    b: (C_out,)
    returns: (B, H_out, W_out, C_out) float32
    """
    B, H, W, Cin = x.shape
    KH, KW, _, Cout = w.shape
    Ho = (H - KH) // stride + 1
    Wo = (W - KW) // stride + 1

    # --- im2col: static strided slices, feature order (kh, kw, c). ----------
    # TODO(synk): fuse patch extraction into the kernel (implicit-GEMM conv)
    #             to avoid materializing the (M, KH*KW*Cin) patch matrix.
    cols = []
    for kh in range(KH):
        for kw in range(KW):
            cols.append(x[:, kh:kh + stride * (Ho - 1) + 1:stride,
                           kw:kw + stride * (Wo - 1) + 1:stride, :])
    Kdim = KH * KW * Cin
    M = B * Ho * Wo
    patches = jnp.concatenate(cols, axis=-1).reshape(M, Kdim)
    patches = patches.astype(compute_dtype)               # bf16 MXU operands
    wmat = w.reshape(Kdim, Cout).astype(compute_dtype)
    brow = b.reshape(1, Cout).astype(jnp.float32)

    # --- tile M (rows); pad to a multiple of the tile. -----------------------
    TM = min(tm_max, _round_up(M, 16))
    Mpad = _round_up(M, TM)
    if Mpad != M:
        patches = jnp.pad(patches, ((0, Mpad - M), (0, 0)))

    out = pl.pallas_call(
        _gemm_bias_relu_kernel,
        out_shape=jax.ShapeDtypeStruct((Mpad, Cout), jnp.float32),
        grid_spec=pl.GridSpec(
            grid=(Mpad // TM,),
            in_specs=[
                pl.BlockSpec((TM, Kdim), lambda i: (i, 0)),    # activations
                pl.BlockSpec((Kdim, Cout), lambda i: (0, 0)),  # resident W
                pl.BlockSpec((1, Cout), lambda i: (0, 0)),     # resident bias
            ],
            out_specs=pl.BlockSpec((TM, Cout), lambda i: (i, 0)),
        ),
        compiler_params=pltpu.CompilerParams(
            dimension_semantics=("parallel",)),
    )(patches, wmat, brow)

    return out[:M].reshape(B, Ho, Wo, Cout)


# ----------------------------- BigCNN forward ------------------------------ #

def bigcnn_forward(x_nchw, params, compute_dtype=jnp.bfloat16):
    """BigCNN.forward: 4x (conv stride-2, relu), then flatten to (B, C*H*W)."""
    x = jnp.transpose(x_nchw, (0, 2, 3, 1)).astype(jnp.float32)   # NHWC
    for j in range(1, 5):
        x = conv2d_relu_pallas(x, params[f"w{j}"], params[f"b{j}"],
                               stride=2, compute_dtype=compute_dtype)
    # torch's x.view(-1, flat_features) flattens in (C, H, W) order.
    B = x.shape[0]
    return jnp.transpose(x, (0, 3, 1, 2)).reshape(B, -1)


# --------------------------- parameter creation ----------------------------- #

def init_bigcnn_params(key, channels_in):
    """torch Conv2d default init: U(-1/sqrt(fan_in), 1/sqrt(fan_in)).
    Weights stored HWIO: (K, K, C_in, C_out)."""
    cfg = [  # (kernel, C_in, C_out)
        (8, channels_in, 64),
        (4, 64, 64),
        (4, 64, 128),
        (4, 128, 128),
    ]
    params = {}
    for j, (k, cin, cout) in enumerate(cfg, start=1):
        key, kw_, kb_ = jax.random.split(key, 3)
        bound = 1.0 / math.sqrt(cin * k * k)
        params[f"w{j}"] = jax.random.uniform(
            kw_, (k, k, cin, cout), jnp.float32, -bound, bound)
        params[f"b{j}"] = jax.random.uniform(
            kb_, (cout,), jnp.float32, -bound, bound)
    return params


# ---------------------------------- main ------------------------------------ #

if __name__ == "__main__":
    key = jax.random.PRNGKey(0)

    # tmrl BigCNN is built for 64x64 frames with a small channel stack; the
    # conv chain (k8s2, k4s2, k4s2, k4s2) needs >=50 spatial to be valid.
    batch, channels_in, h_in, w_in = 2, 4, 64, 64
    key, kx = jax.random.split(key)
    x = jax.random.normal(kx, (batch, channels_in, h_in, w_in), jnp.float32)
    params = init_bigcnn_params(key, channels_in)

    fwd = jax.jit(bigcnn_forward)
    out = jax.block_until_ready(fwd(x, params))

    # Expected output dims from the module's conv2d_out_dims bookkeeping.
    h, w = h_in, w_in
    for k in (8, 4, 4, 4):
        h, w = (h - k) // 2 + 1, (w - k) // 2 + 1
    flat_features = 128 * h * w
    assert out.shape == (batch, flat_features), out.shape

    # Pure-JAX/XLA reference (same bf16 operand cast, f32 accumulation).
    def ref_layer(xr, wr, br):
        y = jax.lax.conv_general_dilated(
            xr.astype(jnp.bfloat16), wr.astype(jnp.bfloat16),
            window_strides=(2, 2), padding="VALID",
            dimension_numbers=("NHWC", "HWIO", "NHWC"),
            preferred_element_type=jnp.float32)
        return jnp.maximum(y + br.reshape(1, 1, 1, -1), 0.0)

    xr = jnp.transpose(x, (0, 2, 3, 1))
    for j in range(1, 5):
        xr = ref_layer(xr, params[f"w{j}"], params[f"b{j}"])
    ref = jnp.transpose(xr, (0, 3, 1, 2)).reshape(batch, -1)

    assert jnp.allclose(out, ref, atol=1e-2, rtol=1e-2), \
        float(jnp.max(jnp.abs(out - ref)))

    print("KERNEL_OK")
</pallas_src>

<mosaic_0001>
module attributes {stable_mosaic.version = 11 : i64} {
  func.func @_gemm_bias_relu_kernel(%arg0: i32, %arg1: memref<512x256xbf16, #tpu.memory_space<vmem>>, %arg2: memref<256x64xbf16, #tpu.memory_space<vmem>>, %arg3: memref<1x64xf32, #tpu.memory_space<vmem>>, %arg4: memref<512x64xf32, #tpu.memory_space<vmem>>) attributes {dimension_semantics = [#tpu.dimension_semantics<parallel>], iteration_bounds = array<i64: 4>, scalar_prefetch = 0 : i64, scratch_operands = 0 : i64, tpu.core_type = #tpu.core_type<tc>, window_params = [{transform_indices = @transform_0, window_bounds = array<i64: 512, 256>}, {pipeline_mode = #tpu.pipeline_mode<synchronous>, transform_indices = @transform_1, window_bounds = array<i64: 256, 64>}, {pipeline_mode = #tpu.pipeline_mode<synchronous>, transform_indices = @transform_2, window_bounds = array<i64: 1, 64>}, {transform_indices = @transform_3, window_bounds = array<i64: 512, 64>}]} {
    %c0 = arith.constant 0 : index
    %c0_0 = arith.constant 0 : index
    %0 = vector.load %arg1[%c0, %c0_0] : memref<512x256xbf16, #tpu.memory_space<vmem>>, vector<512x256xbf16>
    %c0_1 = arith.constant 0 : index
    %c0_2 = arith.constant 0 : index
    %1 = vector.load %arg2[%c0_1, %c0_2] : memref<256x64xbf16, #tpu.memory_space<vmem>>, vector<256x64xbf16>
    %cst = arith.constant dense<0.000000e+00> : vector<512x64xf32>
    %2 = tpu.matmul %0, %1, %cst {dimension_numbers = #tpu.dot_dimension_numbers<[1], [0], [0], [1], [0, 0, 1, 1], [], []>} : vector<512x256xbf16>, vector<256x64xbf16>, vector<512x64xf32> -> vector<512x64xf32>
    %c0_3 = arith.constant 0 : index
    %c0_4 = arith.constant 0 : index
    %3 = vector.load %arg3[%c0_3, %c0_4] : memref<1x64xf32, #tpu.memory_space<vmem>>, vector<1x64xf32>
    %4 = vector.broadcast %3 : vector<1x64xf32> to vector<512x64xf32>
    %5 = arith.addf %2, %4 : vector<512x64xf32>
    %cst_5 = arith.constant 0.000000e+00 : f32
    %6 = vector.broadcast %cst_5 : f32 to vector<512x64xf32>
    %7 = arith.maximumf %5, %6 : vector<512x64xf32>
    %c0_6 = arith.constant 0 : index
    %c0_7 = arith.constant 0 : index
    %8 = vector.load %arg4[%c0_6, %c0_7] : memref<512x64xf32, #tpu.memory_space<vmem>>, vector<512x64xf32>
    tpu.vector_store %arg4[%c0_6, %c0_7], %7 {strides = array<i32>} : memref<512x64xf32, #tpu.memory_space<vmem>>, vector<512x64xf32>,
    return
  }
  func.func @transform_0(%arg0: i32) -> (i32, i32) {
    %c0_i32 = arith.constant 0 : i32
    %c0_i32_0 = arith.constant 0 : i32
    return %arg0, %c0_i32 : i32, i32
  }
  func.func @transform_1(%arg0: i32) -> (i32, i32) {
    %c0_i32 = arith.constant 0 : i32
    %c0_i32_0 = arith.constant 0 : i32
    %c0_i32_1 = arith.constant 0 : i32
    return %c0_i32, %c0_i32_0 : i32, i32
  }
  func.func @transform_2(%arg0: i32) -> (i32, i32) {
    %c0_i32 = arith.constant 0 : i32
    %c0_i32_0 = arith.constant 0 : i32
    %c0_i32_1 = arith.constant 0 : i32
    return %c0_i32, %c0_i32_0 : i32, i32
  }
  func.func @transform_3(%arg0: i32) -> (i32, i32) {
    %c0_i32 = arith.constant 0 : i32
    %c0_i32_0 = arith.constant 0 : i32
    return %arg0, %c0_i32 : i32, i32
  }
}

module attributes {stable_mosaic.version = 11 : i64} {
  func.func @_gemm_bias_relu_kernel(%arg0: i32, %arg1: memref<352x1024xbf16, #tpu.memory_space<vmem>>, %arg2: memref<1024x64xbf16, #tpu.memory_space<vmem>>, %arg3: memref<1x64xf32, #tpu.memory_space<vmem>>, %arg4: memref<352x64xf32, #tpu.memory_space<vmem>>) attributes {dimension_semantics = [#tpu.dimension_semantics<parallel>], iteration_bounds = array<i64: 1>, scalar_prefetch = 0 : i64, scratch_operands = 0 : i64, tpu.core_type = #tpu.core_type<tc>, window_params = [{transform_indices = @transform_0, window_bounds = array<i64: 352, 1024>}, {pipeline_mode = #tpu.pipeline_mode<synchronous>, transform_indices = @transform_1, window_bounds = array<i64: 1024, 64>}, {pipeline_mode = #tpu.pipeline_mode<synchronous>, transform_indices = @transform_2, window_bounds = array<i64: 1, 64>}, {transform_indices = @transform_3, window_bounds = array<i64: 352, 64>}]} {
    %c0 = arith.constant 0 : index
    %c0_0 = arith.constant 0 : index
    %0 = vector.load %arg1[%c0, %c0_0] : memref<352x1024xbf16, #tpu.memory_space<vmem>>, vector<352x1024xbf16>
    %c0_1 = arith.constant 0 : index
    %c0_2 = arith.constant 0 : index
    %1 = vector.load %arg2[%c0_1, %c0_2] : memref<1024x64xbf16, #tpu.memory_space<vmem>>, vector<1024x64xbf16>
    %cst = arith.constant dense<0.000000e+00> : vector<352x64xf32>
    %2 = tpu.matmul %0, %1, %cst {dimension_numbers = #tpu.dot_dimension_numbers<[1], [0], [0], [1], [0, 0, 1, 1], [], []>} : vector<352x1024xbf16>, vector<1024x64xbf16>, vector<352x64xf32> -> vector<352x64xf32>
    %c0_3 = arith.constant 0 : index
    %c0_4 = arith.constant 0 : index
    %3 = vector.load %arg3[%c0_3, %c0_4] : memref<1x64xf32, #tpu.memory_space<vmem>>, vector<1x64xf32>
    %4 = vector.broadcast %3 : vector<1x64xf32> to vector<352x64xf32>
    %5 = arith.addf %2, %4 : vector<352x64xf32>
    %cst_5 = arith.constant 0.000000e+00 : f32
    %6 = vector.broadcast %cst_5 : f32 to vector<352x64xf32>
    %7 = arith.maximumf %5, %6 : vector<352x64xf32>
    %c0_6 = arith.constant 0 : index
    %c0_7 = arith.constant 0 : index
    %8 = vector.load %arg4[%c0_6, %c0_7] : memref<352x64xf32, #tpu.memory_space<vmem>>, vector<352x64xf32>
    tpu.vector_store %arg4[%c0_6, %c0_7], %7 {strides = array<i32>} : memref<352x64xf32, #tpu.memory_space<vmem>>, vector<352x64xf32>,
    return
  }
  func.func @transform_0(%arg0: i32) -> (i32, i32) {
    %c0_i32 = arith.constant 0 : i32
    %c0_i32_0 = arith.constant 0 : i32
    return %arg0, %c0_i32 : i32, i32
  }
  func.func @transform_1(%arg0: i32) -> (i32, i32) {
    %c0_i32 = arith.constant 0 : i32
    %c0_i32_0 = arith.constant 0 : i32
    %c0_i32_1 = arith.constant 0 : i32
    return %c0_i32, %c0_i32_0 : i32, i32
  }
  func.func @transform_2(%arg0: i32) -> (i32, i32) {
    %c0_i32 = arith.constant 0 : i32
    %c0_i32_0 = arith.constant 0 : i32
    %c0_i32_1 = arith.constant 0 : i32
    return %c0_i32, %c0_i32_0 : i32, i32
  }
  func.func @transform_3(%arg0: i32) -> (i32, i32) {
    %c0_i32 = arith.constant 0 : i32
    %c0_i32_0 = arith.constant 0 : i32
    return %arg0, %c0_i32 : i32, i32
  }
}

module attributes {stable_mosaic.version = 11 : i64} {
  func.func @_gemm_bias_relu_kernel(%arg0: i32, %arg1: memref<64x1024xbf16, #tpu.memory_space<vmem>>, %arg2: memref<1024x128xbf16, #tpu.memory_space<vmem>>, %arg3: memref<1x128xf32, #tpu.memory_space<vmem>>, %arg4: memref<64x128xf32, #tpu.memory_space<vmem>>) attributes {dimension_semantics = [#tpu.dimension_semantics<parallel>], iteration_bounds = array<i64: 1>, scalar_prefetch = 0 : i64, scratch_operands = 0 : i64, tpu.core_type = #tpu.core_type<tc>, window_params = [{transform_indices = @transform_0, window_bounds = array<i64: 64, 1024>}, {pipeline_mode = #tpu.pipeline_mode<synchronous>, transform_indices = @transform_1, window_bounds = array<i64: 1024, 128>}, {pipeline_mode = #tpu.pipeline_mode<synchronous>, transform_indices = @transform_2, window_bounds = array<i64: 1, 128>}, {transform_indices = @transform_3, window_bounds = array<i64: 64, 128>}]} {
    %c0 = arith.constant 0 : index
    %c0_0 = arith.constant 0 : index
    %0 = vector.load %arg1[%c0, %c0_0] : memref<64x1024xbf16, #tpu.memory_space<vmem>>, vector<64x1024xbf16>
    %c0_1 = arith.constant 0 : index
    %c0_2 = arith.constant 0 : index
    %1 = vector.load %arg2[%c0_1, %c0_2] : memref<1024x128xbf16, #tpu.memory_space<vmem>>, vector<1024x128xbf16>
    %cst = arith.constant dense<0.000000e+00> : vector<64x128xf32>
    %2 = tpu.matmul %0, %1, %cst {dimension_numbers = #tpu.dot_dimension_numbers<[1], [0], [0], [1], [0, 0, 1, 1], [], []>} : vector<64x1024xbf16>, vector<1024x128xbf16>, vector<64x128xf32> -> vector<64x128xf32>
    %c0_3 = arith.constant 0 : index
    %c0_4 = arith.constant 0 : index
    %3 = vector.load %arg3[%c0_3, %c0_4] : memref<1x128xf32, #tpu.memory_space<vmem>>, vector<1x128xf32>
    %4 = vector.broadcast %3 : vector<1x128xf32> to vector<64x128xf32>
    %5 = arith.addf %2, %4 : vector<64x128xf32>
    %cst_5 = arith.constant 0.000000e+00 : f32
    %6 = vector.broadcast %cst_5 : f32 to vector<64x128xf32>
    %7 = arith.maximumf %5, %6 : vector<64x128xf32>
    %c0_6 = arith.constant 0 : index
    %c0_7 = arith.constant 0 : index
    %8 = vector.load %arg4[%c0_6, %c0_7] : memref<64x128xf32, #tpu.memory_space<vmem>>, vector<64x128xf32>
    tpu.vector_store %arg4[%c0_6, %c0_7], %7 {strides = array<i32>} : memref<64x128xf32, #tpu.memory_space<vmem>>, vector<64x128xf32>,
    return
  }
  func.func @transform_0(%arg0: i32) -> (i32, i32) {
    %c0_i32 = arith.constant 0 : i32
    %c0_i32_0 = arith.constant 0 : i32
    return %arg0, %c0_i32 : i32, i32
  }
  func.func @transform_1(%arg0: i32) -> (i32, i32) {
    %c0_i32 = arith.constant 0 : i32
    %c0_i32_0 = arith.constant 0 : i32
    %c0_i32_1 = arith.constant 0 : i32
    return %c0_i32, %c0_i32_0 : i32, i32
  }
  func.func @transform_2(%arg0: i32) -> (i32, i32) {
    %c0_i32 = arith.constant 0 : i32
    %c0_i32_0 = arith.constant 0 : i32
    %c0_i32_1 = arith.constant 0 : i32
    return %c0_i32, %c0_i32_0 : i32, i32
  }
  func.func @transform_3(%arg0: i32) -> (i32, i32) {
    %c0_i32 = arith.constant 0 : i32
    %c0_i32_0 = arith.constant 0 : i32
    return %arg0, %c0_i32 : i32, i32
  }
}

module attributes {stable_mosaic.version = 11 : i64} {
  func.func @_gemm_bias_relu_kernel(%arg0: i32, %arg1: memref<16x2048xbf16, #tpu.memory_space<vmem>>, %arg2: memref<2048x128xbf16, #tpu.memory_space<vmem>>, %arg3: memref<1x128xf32, #tpu.memory_space<vmem>>, %arg4: memref<16x128xf32, #tpu.memory_space<vmem>>) attributes {dimension_semantics = [#tpu.dimension_semantics<parallel>], iteration_bounds = array<i64: 1>, scalar_prefetch = 0 : i64, scratch_operands = 0 : i64, tpu.core_type = #tpu.core_type<tc>, window_params = [{transform_indices = @transform_0, window_bounds = array<i64: 16, 2048>}, {pipeline_mode = #tpu.pipeline_mode<synchronous>, transform_indices = @transform_1, window_bounds = array<i64: 2048, 128>}, {pipeline_mode = #tpu.pipeline_mode<synchronous>, transform_indices = @transform_2, window_bounds = array<i64: 1, 128>}, {transform_indices = @transform_3, window_bounds = array<i64: 16, 128>}]} {
    %c0 = arith.constant 0 : index
    %c0_0 = arith.constant 0 : index
    %0 = vector.load %arg1[%c0, %c0_0] : memref<16x2048xbf16, #tpu.memory_space<vmem>>, vector<16x2048xbf16>
    %c0_1 = arith.constant 0 : index
    %c0_2 = arith.constant 0 : index
    %1 = vector.load %arg2[%c0_1, %c0_2] : memref<2048x128xbf16, #tpu.memory_space<vmem>>, vector<2048x128xbf16>
    %cst = arith.constant dense<0.000000e+00> : vector<16x128xf32>
    %2 = tpu.matmul %0, %1, %cst {dimension_numbers = #tpu.dot_dimension_numbers<[1], [0], [0], [1], [0, 0, 1, 1], [], []>} : vector<16x2048xbf16>, vector<2048x128xbf16>, vector<16x128xf32> -> vector<16x128xf32>
    %c0_3 = arith.constant 0 : index
    %c0_4 = arith.constant 0 : index
    %3 = vector.load %arg3[%c0_3, %c0_4] : memref<1x128xf32, #tpu.memory_space<vmem>>, vector<1x128xf32>
    %4 = vector.broadcast %3 : vector<1x128xf32> to vector<16x128xf32>
    %5 = arith.addf %2, %4 : vector<16x128xf32>
    %cst_5 = arith.constant 0.000000e+00 : f32
    %6 = vector.broadcast %cst_5 : f32 to vector<16x128xf32>
    %7 = arith.maximumf %5, %6 : vector<16x128xf32>
    %c0_6 = arith.constant 0 : index
    %c0_7 = arith.constant 0 : index
    %8 = vector.load %arg4[%c0_6, %c0_7] : memref<16x128xf32, #tpu.memory_space<vmem>>, vector<16x128xf32>
    tpu.vector_store %arg4[%c0_6, %c0_7], %7 {strides = array<i32>} : memref<16x128xf32, #tpu.memory_space<vmem>>, vector<16x128xf32>,
    return
  }
  func.func @transform_0(%arg0: i32) -> (i32, i32) {
    %c0_i32 = arith.constant 0 : i32
    %c0_i32_0 = arith.constant 0 : i32
    return %arg0, %c0_i32 : i32, i32
  }
  func.func @transform_1(%arg0: i32) -> (i32, i32) {
    %c0_i32 = arith.constant 0 : i32
    %c0_i32_0 = arith.constant 0 : i32
    %c0_i32_1 = arith.constant 0 : i32
    return %c0_i32, %c0_i32_0 : i32, i32
  }
  func.func @transform_2(%arg0: i32) -> (i32, i32) {
    %c0_i32 = arith.constant 0 : i32
    %c0_i32_0 = arith.constant 0 : i32
    %c0_i32_1 = arith.constant 0 : i32
    return %c0_i32, %c0_i32_0 : i32, i32
  }
  func.func @transform_3(%arg0: i32) -> (i32, i32) {
    %c0_i32 = arith.constant 0 : i32
    %c0_i32_0 = arith.constant 0 : i32
    return %arg0, %c0_i32 : i32, i32
  }
}

</mosaic_0001>

<bundles_post_ra>
// kernel: bigcnn_forward.4
= control target key start
LH: loop header
LB: loop body
LE: loop exit
PB: predicated region body
PF: predicated region fallthrough
CT: control target
= control target key end

     0   :  { %s1682_s12 = smov 0   ;;  %s2083_s0 = inlined_call_operand.vmem [shape: bf16[2048,256], index: 0, kind: input, shape index: {}]   ;;  %s2084_s1 = inlined_call_operand.vmem [shape: bf16[256,64], index: 1, kind: input, shape index: {}]   ;;  %s2085_s2 = inlined_call_operand.vmem [shape: f32[1,64], index: 2, kind: input, shape index: {}]   ;;  %s2086_s3 = inlined_call_operand.vmem [shape: f32[2048,64], index: 3, kind: output, shape index: {}]  }
   0x1 LB: > { %s1216_s13 = sadd.s32 4294967295, %s1660_s12   ;;  %p1220_p0 = scmp.ge.s32.totalorder %s1660_s12, 1  ;;  %s1660_s12 = sphi %s1682_s12, %s13_s12  }
   0x2   : > { %p139_p1 = scmp.lt.s32.totalorder %s1660_s12, 5 }
   0x4   : > { %p140_p2 = pnand %p1220_p0, %p139_p1 }
   0x5   : > { %s1221_s26 = sshll.u32 (!%p140_p2), %s1216_s13, 6 }
   0x6   : > { %143 = sbr.rel (%p140_p2) target bundleno = 430 (0x1ae), region = 32  ;;  %p165_p3 = scmp.lt.s32.totalorder (!%p140_p2), %s1221_s26, 255 }
   0xb   : > { %v1620_v0 = vld [vmem:[%s2084_s1 + $0x38] sm:$0xff]  ;;  %v1619_v2 = vld [vmem:[%s2084_s1 + $0x30] sm:$0xff]  ;;  %v1618_v4 = vld [vmem:[%s2084_s1 + $0x28] sm:$0xff]  ;;  %s2088_s26 = smov (!%p165_p3, %s1221_s26), 255  ;;  %vm1095_vm0 = vcmask 523264  }
   0xc   : > { %v1628_v1 = vld [vmem:[%s2084_s1 + $0x78] sm:$0xff]  ;;  %693 = vmatpush.bf16.msra.mxu0 %v1620_v0  ;;  %1629 = vmatpush.bf16.msra.mxu2 %v1620_v0  ;;  %v1627_v3 = vld [vmem:[%s2084_s1 + $0x70] sm:$0xff]  ;;  %v1626_v5 = vld [vmem:[%s2084_s1 + $0x68] sm:$0xff]  ;;  %s1548_s13 = sshll.u32 %s2088_s26, 3 }
   0xd   : > { %862 = vmatpush.bf16.msra.mxu1 %v1628_v1  ;;  %1637 = vmatpush.bf16.msra.mxu3 %v1628_v1  ;;  %v1617_v6 = vld [vmem:[%s2084_s1 + $0x20] sm:$0xff]  ;;  %v1616_v8 = vld [vmem:[%s2084_s1 + $0x18] sm:$0xff]  ;;  %v1615_v10 = vld [vmem:[%s2084_s1 + $0x10] sm:$0xff]  ;;  %s1737_s18 = scalar_lea.vmem %s2083_s0, %s1548_s13  ;;  %s1831_s30 = scalar_lea.vmem %s2086_s3, %s1548_s13 }
   0xe   : > { %v1625_v7 = vld [vmem:[%s2084_s1 + $0x60] sm:$0xff]  ;;  %v1624_v9 = vld [vmem:[%s2084_s1 + $0x58] sm:$0xff]  ;;  %v1623_v11 = vld [vmem:[%s2084_s1 + $0x50] sm:$0xff] }
   0xf   : > { %v1614_v12 = vld [vmem:[%s2084_s1 + $0x8] sm:$0xff]  ;;  %v1613_v14 = vld [vmem:[%s2084_s1] sm:$0xff]  ;;  %v1236_v28 = vld [vmem:[%s1737_s18 + $0x10] sm:$0xf] }
  0x10   : > { %694 = vmatpush.bf16.msra.mxu0 %v1619_v2  ;;  %1630 = vmatpush.bf16.msra.mxu2 %v1619_v2  ;;  %v1622_v13 = vld [vmem:[%s2084_s1 + $0x48] sm:$0xff]  ;;  %v1621_v15 = vld [vmem:[%s2084_s1 + $0x40] sm:$0xff]  ;;  %v1552_v29 = vld [vmem:[%s1737_s18 + $0x14] sm:$0xf0] }
  0x11   : > { %863 = vmatpush.bf16.msra.mxu1 %v1627_v3  ;;  %1638 = vmatpush.bf16.msra.mxu3 %v1627_v3  ;;  %v1228_v16 = vld [vmem:[%s1737_s18] sm:$0xf]  ;;  %v1550_v17 = vld [vmem:[%s1737_s18 + $0x4] sm:$0xf0]  ;;  %v1549_v20 = vld [vmem:[%s1737_s18 + $0x4] sm:$0xf]  ;;  %v1237_v36 = vor.u32 %v1552_v29, %v1236_v28 }
  0x12   : > { %v1356_v18 = vld [vmem:[%s1737_s18 + $0x100] sm:$0xf]  ;;  %v1582_v19 = vld [vmem:[%s1737_s18 + $0x104] sm:$0xf0]  ;;  %v1230_v21 = vld [vmem:[%s1737_s18 + $0x8] sm:$0xf0]  ;;  %v1229_v24 = vor.u32 %v1550_v17, %v1228_v16 }
  0x13   : > { %v1581_v22 = vld [vmem:[%s1737_s18 + $0x104] sm:$0xf]  ;;  %v1358_v23 = vld [vmem:[%s1737_s18 + $0x108] sm:$0xf0]  ;;  %v1357_v25 = vor.u32 %v1582_v19, %v1356_v18  ;;  %v1233_v26 = vor.u32 %v1549_v20, %v1230_v21  ;;  %v1364_v30 = vld [vmem:[%s1737_s18 + $0x110] sm:$0xf] }
  0x14   : > { %695 = vmatpush.bf16.msra.mxu0 %v1618_v4  ;;  %1631 = vmatpush.bf16.msra.mxu2 %v1618_v4  ;;  %v1361_v27 = vor.u32 %v1581_v22, %v1358_v23  ;;  %v1584_v31 = vld [vmem:[%s1737_s18 + $0x114] sm:$0xf0]  ;;  %v1551_v32 = vld [vmem:[%s1737_s18 + $0x14] sm:$0xf]  ;;  %v1238_v33 = vld [vmem:[%s1737_s18 + $0x18] sm:$0xf0] }
  0x15   : > { %864 = vmatpush.bf16.msra.mxu1 %v1626_v5  ;;  %1639 = vmatpush.bf16.msra.mxu3 %v1626_v5  ;;  %v1583_v34 = vld [vmem:[%s1737_s18 + $0x114] sm:$0xf]  ;;  %v1366_v35 = vld [vmem:[%s1737_s18 + $0x118] sm:$0xf0]  ;;  %v1365_v37 = vor.u32 %v1584_v31, %v1364_v30  ;;  %v1241_v38 = vor.u32 %v1551_v32, %v1238_v33  ;;  %v1244_v40 = vld [vmem:[%s1737_s18 + $0x20] sm:$0xf] }
  0x16   : > { %v1369_v39 = vor.u32 %v1583_v34, %v1366_v35  ;;  %v1554_v41 = vld [vmem:[%s1737_s18 + $0x24] sm:$0xf0]  ;;  %v1372_v42 = vld [vmem:[%s1737_s18 + $0x120] sm:$0xf]  ;;  %v1553_v44 = vld [vmem:[%s1737_s18 + $0x24] sm:$0xf] }
  0x17   : > { %v1586_v43 = vld [vmem:[%s1737_s18 + $0x124] sm:$0xf0]  ;;  %v1246_v45 = vld [vmem:[%s1737_s18 + $0x28] sm:$0xf0]  ;;  %v1585_v46 = vld [vmem:[%s1737_s18 + $0x124] sm:$0xf]  ;;  %v1245_v48 = vor.u32 %v1554_v41, %v1244_v40 }
  0x18   : > { %696 = vmatpush.bf16.msra.mxu0 %v1617_v6  ;;  %1632 = vmatpush.bf16.msra.mxu2 %v1617_v6  ;;  %v1374_v47 = vld [vmem:[%s1737_s18 + $0x128] sm:$0xf0]  ;;  %v1373_v49 = vor.u32 %v1586_v43, %v1372_v42  ;;  %v1249_v50 = vor.u32 %v1553_v44, %v1246_v45  ;;  %v1252_v52 = vld [vmem:[%s1737_s18 + $0x30] sm:$0xf]  ;;  %v1556_v53 = vld [vmem:[%s1737_s18 + $0x34] sm:$0xf0] }
  0x19   : > { %865 = vmatpush.bf16.msra.mxu1 %v1625_v7  ;;  %1640 = vmatpush.bf16.msra.mxu3 %v1625_v7  ;;  %v1377_v51 = vor.u32 %v1585_v46, %v1374_v47  ;;  %v1380_v54 = vld [vmem:[%s1737_s18 + $0x130] sm:$0xf]  ;;  %v1588_v55 = vld [vmem:[%s1737_s18 + $0x134] sm:$0xf0]  ;;  %v1555_v56 = vld [vmem:[%s1737_s18 + $0x34] sm:$0xf]  ;;  %v1253_v60 = vor.u32 %v1556_v53, %v1252_v52 }
  0x1a   : > { %v1254_v57 = vld [vmem:[%s1737_s18 + $0x38] sm:$0xf0]  ;;  %v1587_v58 = vld [vmem:[%s1737_s18 + $0x134] sm:$0xf]  ;;  %v1381_v61 = vor.u32 %v1588_v55, %v1380_v54  ;;  %v1260_v0 = vld [vmem:[%s1737_s18 + $0x40] sm:$0xf] }
  0x1b   : > { %v1382_v59 = vld [vmem:[%s1737_s18 + $0x138] sm:$0xf0]  ;;  %v1257_v62 = vor.u32 %v1555_v56, %v1254_v57  ;;  %v1558_v1 = vld [vmem:[%s1737_s18 + $0x44] sm:$0xf0]  ;;  %v1388_v2 = vld [vmem:[%s1737_s18 + $0x140] sm:$0xf] }
  0x1c   : > { %697 = vmatpush.bf16.msra.mxu0 %v1616_v8  ;;  %1633 = vmatpush.bf16.msra.mxu2 %v1616_v8  ;;  %v1385_v63 = vor.u32 %v1587_v58, %v1382_v59  ;;  %v1590_v3 = vld [vmem:[%s1737_s18 + $0x144] sm:$0xf0]  ;;  %v1557_v4 = vld [vmem:[%s1737_s18 + $0x44] sm:$0xf]  ;;  %v1262_v5 = vld [vmem:[%s1737_s18 + $0x48] sm:$0xf0]  ;;  %v1261_v8 = vor.u32 %v1558_v1, %v1260_v0 }
  0x1d   : > { %866 = vmatpush.bf16.msra.mxu1 %v1624_v9  ;;  %1641 = vmatpush.bf16.msra.mxu3 %v1624_v9  ;;  %v1589_v6 = vld [vmem:[%s1737_s18 + $0x144] sm:$0xf]  ;;  %v1390_v7 = vld [vmem:[%s1737_s18 + $0x148] sm:$0xf0]  ;;  %v1389_v9 = vor.u32 %v1590_v3, %v1388_v2  ;;  %v1559_v16 = vld [vmem:[%s1737_s18 + $0x54] sm:$0xf] }
  0x1e   : > { %v1270_v17 = vld [vmem:[%s1737_s18 + $0x58] sm:$0xf0]  ;;  %v1591_v18 = vld [vmem:[%s1737_s18 + $0x154] sm:$0xf]  ;;  %v1561_v28 = vld [vmem:[%s1737_s18 + $0x64] sm:$0xf] }
  0x1f   : > { %v1398_v19 = vld [vmem:[%s1737_s18 + $0x158] sm:$0xf0]  ;;  %v1273_v22 = vor.u32 %v1559_v16, %v1270_v17  ;;  %v1278_v29 = vld [vmem:[%s1737_s18 + $0x68] sm:$0xf0]  ;;  %v1593_v30 = vld [vmem:[%s1737_s18 + $0x164] sm:$0xf] }
  0x20   : > { %698 = vmatpush.bf16.msra.mxu0 %v1615_v10  ;;  %1634 = vmatpush.bf16.msra.mxu2 %v1615_v10  ;;  %v1265_v10 = vor.u32 %v1557_v4, %v1262_v5  ;;  %v1401_v23 = vor.u32 %v1591_v18, %v1398_v19  ;;  %v1406_v31 = vld [vmem:[%s1737_s18 + $0x168] sm:$0xf0]  ;;  %v1281_v34 = vor.u32 %v1561_v28, %v1278_v29  ;;  %v1563_v40 = vld [vmem:[%s1737_s18 + $0x74] sm:$0xf]  ;;  %v1286_v41 = vld [vmem:[%s1737_s18 + $0x78] sm:$0xf0] }
  0x21   : > { %867 = vmatpush.bf16.msra.mxu1 %v1623_v11  ;;  %1642 = vmatpush.bf16.msra.mxu3 %v1623_v11  ;;  %v1393_v11 = vor.u32 %v1589_v6, %v1390_v7  ;;  %v1409_v35 = vor.u32 %v1593_v30, %v1406_v31  ;;  %v1595_v42 = vld [vmem:[%s1737_s18 + $0x174] sm:$0xf]  ;;  %v1414_v43 = vld [vmem:[%s1737_s18 + $0x178] sm:$0xf0]  ;;  %v1289_v46 = vor.u32 %v1563_v40, %v1286_v41  ;;  %v1598_v52 = vld [vmem:[%s1737_s18 + $0x184] sm:$0xf0] }
  0x22   : > { %v1417_v47 = vor.u32 %v1595_v42, %v1414_v43  ;;  %v1565_v53 = vld [vmem:[%s1737_s18 + $0x84] sm:$0xf]  ;;  %v1294_v54 = vld [vmem:[%s1737_s18 + $0x88] sm:$0xf0]  ;;  %v1302_v16 = vld [vmem:[%s1737_s18 + $0x98] sm:$0xf0] }
  0x23   : > { %v1597_v55 = vld [vmem:[%s1737_s18 + $0x184] sm:$0xf]  ;;  %v1422_v56 = vld [vmem:[%s1737_s18 + $0x188] sm:$0xf0]  ;;  %v1599_v18 = vld [vmem:[%s1737_s18 + $0x194] sm:$0xf] }
  0x24   : > { %699 = vmatpush.bf16.msra.mxu0 %v1614_v12  ;;  %1635 = vmatpush.bf16.msra.mxu2 %v1614_v12  ;;  %v1268_v12 = vld [vmem:[%s1737_s18 + $0x50] sm:$0xf]  ;;  %v1430_v19 = vld [vmem:[%s1737_s18 + $0x198] sm:$0xf0]  ;;  %v1308_v41 = vld [vmem:[%s1737_s18 + $0xa0] sm:$0xf] }
  0x25   : > { %868 = vmatpush.bf16.msra.mxu1 %v1622_v13  ;;  %1643 = vmatpush.bf16.msra.mxu3 %v1622_v13  ;;  %v1560_v13 = vld [vmem:[%s1737_s18 + $0x54] sm:$0xf0] }
  0x26   : > { %v1269_v20 = vor.u32 %v1560_v13, %v1268_v12  ;;  %v1568_v12 = vld [vmem:[%s1737_s18 + $0x94] sm:$0xf0]  ;;  %v1428_v13 = vld [vmem:[%s1737_s18 + $0x190] sm:$0xf] }
  0x28   : > { %700 = vmatpush.bf16.msra.mxu0 %v1613_v14  ;;  %1636 = vmatpush.bf16.msra.mxu2 %v1613_v14  ;;  %v1396_v14 = vld [vmem:[%s1737_s18 + $0x150] sm:$0xf] }
  0x29   : > { %869 = vmatpush.bf16.msra.mxu1 %v1621_v15  ;;  %1644 = vmatpush.bf16.msra.mxu3 %v1621_v15  ;;  %v1592_v15 = vld [vmem:[%s1737_s18 + $0x154] sm:$0xf0] }
  0x2a   : > { %v1397_v21 = vor.u32 %v1592_v15, %v1396_v14  ;;  %v1600_v14 = vld [vmem:[%s1737_s18 + $0x194] sm:$0xf0]  ;;  %v1567_v15 = vld [vmem:[%s1737_s18 + $0x94] sm:$0xf] }
  0x2b   : > { %701 = vmatmul.bf16.vlgmr.msra.gmra.mxu0 %v1229_v24  ;;  %781 = vmatmul.bf16.vlgmr.msra.gmra.mxu2 %v1357_v25  ;;  %v1276_v24 = vld [vmem:[%s1737_s18 + $0x60] sm:$0xf]  ;;  %v1562_v25 = vld [vmem:[%s1737_s18 + $0x64] sm:$0xf0] }
  0x2c   : > { %870 = vmatmul.bf16.vlgmr.msra.gmra.mxu1 %v1233_v26  ;;  %950 = vmatmul.bf16.vlgmr.msra.gmra.mxu3 %v1361_v27  ;;  %v1404_v26 = vld [vmem:[%s1737_s18 + $0x160] sm:$0xf]  ;;  %v1594_v27 = vld [vmem:[%s1737_s18 + $0x164] sm:$0xf0]  ;;  %v1277_v32 = vor.u32 %v1562_v25, %v1276_v24  ;;  %v1429_v24 = vor.u32 %v1600_v14, %v1428_v13  ;;  %v1572_v13 = vld [vmem:[%s1737_s18 + $0xb4] sm:$0xf0] }
  0x2d   : > { %v1405_v33 = vor.u32 %v1594_v27, %v1404_v26  ;;  %v1305_v26 = vor.u32 %v1567_v15, %v1302_v16  ;;  %v1433_v27 = vor.u32 %v1599_v18, %v1430_v19  ;;  %v1444_v14 = vld [vmem:[%s1737_s18 + $0x1b0] sm:$0xf]  ;;  %v1604_v15 = vld [vmem:[%s1737_s18 + $0x1b4] sm:$0xf0]  ;;  %v1571_v16 = vld [vmem:[%s1737_s18 + $0xb4] sm:$0xf] }
  0x2e   : > { %v1603_v19 = vld [vmem:[%s1737_s18 + $0x1b4] sm:$0xf] }
  0x3b   : > { %706 = vmatmul.bf16.gmra.mxu0 %v1237_v36  ;;  %786 = vmatmul.bf16.gmra.mxu2 %v1365_v37  ;;  %v1284_v36 = vld [vmem:[%s1737_s18 + $0x70] sm:$0xf]  ;;  %v1564_v37 = vld [vmem:[%s1737_s18 + $0x74] sm:$0xf0] }
  0x3c   : > { %875 = vmatmul.bf16.gmra.mxu1 %v1241_v38  ;;  %955 = vmatmul.bf16.gmra.mxu3 %v1369_v39  ;;  %v1412_v38 = vld [vmem:[%s1737_s18 + $0x170] sm:$0xf]  ;;  %v1596_v39 = vld [vmem:[%s1737_s18 + $0x174] sm:$0xf0]  ;;  %v1285_v44 = vor.u32 %v1564_v37, %v1284_v36 }
  0x3d   : > { %v1413_v45 = vor.u32 %v1596_v39, %v1412_v38 }
  0x4b   : > { %711 = vmatmul.bf16.gmra.mxu0 %v1245_v48  ;;  %791 = vmatmul.bf16.gmra.mxu2 %v1373_v49  ;;  %v1815_v48 = vld [vmem:[%s2085_s2] ss:$0 sm:$0xff] }
  0x4c   : > { %880 = vmatmul.bf16.gmra.mxu1 %v1249_v50  ;;  %960 = vmatmul.bf16.gmra.mxu3 %v1377_v51  ;;  %v1292_v49 = vld [vmem:[%s1737_s18 + $0x80] sm:$0xf]  ;;  %v1566_v50 = vld [vmem:[%s1737_s18 + $0x84] sm:$0xf0] }
  0x4d   : > { %v1420_v51 = vld [vmem:[%s1737_s18 + $0x180] sm:$0xf]  ;;  %v1293_v57 = vor.u32 %v1566_v50, %v1292_v49  ;;  %v1310_v49 = vld [vmem:[%s1737_s18 + $0xa8] sm:$0xf0] }
  0x4e   : > { %v1421_v58 = vor.u32 %v1598_v52, %v1420_v51  ;;  %v1601_v51 = vld [vmem:[%s1737_s18 + $0x1a4] sm:$0xf]  ;;  %v1438_v52 = vld [vmem:[%s1737_s18 + $0x1a8] sm:$0xf0] }
  0x5b   : > { %716 = vmatmul.bf16.gmra.mxu0 %v1253_v60  ;;  %796 = vmatmul.bf16.gmra.mxu2 %v1381_v61  ;;  %v1297_v60 = vor.u32 %v1565_v53, %v1294_v54  ;;  %v1425_v61 = vor.u32 %v1597_v55, %v1422_v56 }
  0x5c   : > { %885 = vmatmul.bf16.gmra.mxu1 %v1257_v62  ;;  %965 = vmatmul.bf16.gmra.mxu3 %v1385_v63 }
  0x6b   : > { %721 = vmatmul.bf16.gmra.mxu0 %v1261_v8  ;;  %801 = vmatmul.bf16.gmra.mxu2 %v1389_v9  ;;  %v1300_v9 = vld [vmem:[%s1737_s18 + $0x90] sm:$0xf] }
  0x6c   : > { %890 = vmatmul.bf16.gmra.mxu1 %v1265_v10  ;;  %970 = vmatmul.bf16.gmra.mxu3 %v1393_v11 }
  0x7b   : > { %726 = vmatmul.bf16.gmra.mxu0 %v1269_v20  ;;  %806 = vmatmul.bf16.gmra.mxu2 %v1397_v21 }
  0x7c   : > { %895 = vmatmul.bf16.gmra.mxu1 %v1273_v22  ;;  %975 = vmatmul.bf16.gmra.mxu3 %v1401_v23  ;;  %v1301_v23 = vor.u32 %v1568_v12, %v1300_v9 }
  0x8b   : > { %731 = vmatmul.bf16.gmra.mxu0 %v1277_v32  ;;  %811 = vmatmul.bf16.gmra.mxu2 %v1405_v33 }
  0x8c   : > { %900 = vmatmul.bf16.gmra.mxu1 %v1281_v34  ;;  %980 = vmatmul.bf16.gmra.mxu3 %v1409_v35 }
  0x9b   : > { %736 = vmatmul.bf16.gmra.mxu0 %v1285_v44  ;;  %816 = vmatmul.bf16.gmra.mxu2 %v1413_v45  ;;  %v1570_v44 = vld [vmem:[%s1737_s18 + $0xa4] sm:$0xf0]  ;;  %v1436_v45 = vld [vmem:[%s1737_s18 + $0x1a0] sm:$0xf] }
  0x9c   : > { %905 = vmatmul.bf16.gmra.mxu1 %v1289_v46  ;;  %985 = vmatmul.bf16.gmra.mxu3 %v1417_v47  ;;  %v1602_v46 = vld [vmem:[%s1737_s18 + $0x1a4] sm:$0xf0]  ;;  %v1569_v47 = vld [vmem:[%s1737_s18 + $0xa4] sm:$0xf]  ;;  %v1309_v56 = vor.u32 %v1570_v44, %v1308_v41 }
  0xa8   : > { %v702_v59 = vpop.f32.mrf.mxu0 }
  0xa9   : > { %v703_v62 = vadd.f32 %v1815_v48, %v702_v59  ;;  %v871_v63 = vpop.f32.mrf.mxu1  ;;  %v1313_v59 = vor.u32 %v1569_v47, %v1310_v49  ;;  %v1606_v47 = vld [vmem:[%s1737_s18 + $0x1c4] sm:$0xf0]  ;;  %v1573_v49 = vld [vmem:[%s1737_s18 + $0xc4] sm:$0xf] }
  0xab   : > { %v872_v0 = vadd.f32 %v871_v63, %v703_v62  ;;  %741 = vmatmul.bf16.gmra.mxu0 %v1293_v57  ;;  %821 = vmatmul.bf16.gmra.mxu2 %v1421_v58  ;;  %v1437_v57 = vor.u32 %v1602_v46, %v1436_v45  ;;  %v1574_v45 = vld [vmem:[%s1737_s18 + $0xc4] sm:$0xf0]  ;;  %v1452_v46 = vld [vmem:[%s1737_s18 + $0x1c0] sm:$0xf] }
  0xac   : > { %910 = vmatmul.bf16.gmra.mxu1 %v1297_v60  ;;  %990 = vmatmul.bf16.gmra.mxu3 %v1425_v61  ;;  %v1441_v60 = vor.u32 %v1601_v51, %v1438_v52  ;;  %v1605_v52 = vld [vmem:[%s1737_s18 + $0x1c4] sm:$0xf] }
  0xad   : > { %v1031_v1 = vmax.f32 %v872_v0, 0.0 }
  0xae   : > { %v782_v2 = vpop.f32.mrf.mxu2 }
  0xaf   : > { %1096 = vst.msk [vmem:[%s1831_s30] sm:$0xff] %vm1095_vm0, %v1031_v1  ;;  %v783_v3 = vadd.f32 %v1815_v48, %v782_v2  ;;  %v951_v4 = vpop.f32.mrf.mxu3 }
  0xb0   : > { %v704_v5 = vpop.f32.mrf.mxu0 }
  0xb1   : > { %v952_v6 = vadd.f32 %v951_v4, %v783_v3  ;;  %v705_v7 = vadd.f32 %v1815_v48, %v704_v5  ;;  %v873_v8 = vpop.f32.mrf.mxu1 }
  0xb3   : > { %v1063_v10 = vmax.f32 %v952_v6, 0.0  ;;  %v874_v11 = vadd.f32 %v873_v8, %v705_v7 }
  0xb5   : > { %1128 = vst.msk [vmem:[%s1831_s30 + $0x100] sm:$0xff] %vm1095_vm0, %v1063_v10  ;;  %v1032_v17 = vmax.f32 %v874_v11, 0.0  ;;  %v1316_v10 = vld [vmem:[%s1737_s18 + $0xb0] sm:$0xf] }
  0xb6   : > { %v784_v20 = vpop.f32.mrf.mxu2 }
  0xb7   : > { %1097 = vst.msk [vmem:[%s1831_s30 + $0x8] sm:$0xff] %vm1095_vm0, %v1032_v17  ;;  %v785_v21 = vadd.f32 %v1815_v48, %v784_v20  ;;  %v953_v22 = vpop.f32.mrf.mxu3  ;;  %v1318_v17 = vld [vmem:[%s1737_s18 + $0xb8] sm:$0xf0] }
  0xb8   : > { %v707_v25 = vpop.f32.mrf.mxu0  ;;  %v1446_v20 = vld [vmem:[%s1737_s18 + $0x1b8] sm:$0xf0] }
  0xb9   : > { %v954_v28 = vadd.f32 %v953_v22, %v785_v21  ;;  %v708_v29 = vadd.f32 %v1815_v48, %v707_v25  ;;  %v876_v30 = vpop.f32.mrf.mxu1  ;;  %v1445_v25 = vor.u32 %v1604_v15, %v1444_v14  ;;  %v1576_v14 = vld [vmem:[%s1737_s18 + $0xd4] sm:$0xf0]  ;;  %v1460_v15 = vld [vmem:[%s1737_s18 + $0x1d0] sm:$0xf] }
  0xbb   : > { %v1064_v31 = vmax.f32 %v954_v28, 0.0  ;;  %v877_v32 = vadd.f32 %v876_v30, %v708_v29  ;;  %746 = vmatmul.bf16.gmra.mxu0 %v1301_v23  ;;  %826 = vmatmul.bf16.gmra.mxu2 %v1429_v24  ;;  %v1317_v24 = vor.u32 %v1572_v13, %v1316_v10  ;;  %v1449_v28 = vor.u32 %v1603_v19, %v1446_v20  ;;  %v1607_v20 = vld [vmem:[%s1737_s18 + $0x1d4] sm:$0xf] }
  0xbc   : > { %915 = vmatmul.bf16.gmra.mxu1 %v1305_v26  ;;  %995 = vmatmul.bf16.gmra.mxu3 %v1433_v27  ;;  %v1321_v27 = vor.u32 %v1571_v16, %v1318_v17  ;;  %v1608_v16 = vld [vmem:[%s1737_s18 + $0x1d4] sm:$0xf0]  ;;  %v1575_v17 = vld [vmem:[%s1737_s18 + $0xd4] sm:$0xf] }
  0xbd   : > { %1129 = vst.msk [vmem:[%s1831_s30 + $0x108] sm:$0xff] %vm1095_vm0, %v1064_v31  ;;  %v1033_v33 = vmax.f32 %v877_v32, 0.0 }
  0xbe   : > { %v787_v34 = vpop.f32.mrf.mxu2 }
  0xbf   : > { %1098 = vst.msk [vmem:[%s1831_s30 + $0x10] sm:$0xff] %vm1095_vm0, %v1033_v33  ;;  %v788_v35 = vadd.f32 %v1815_v48, %v787_v34  ;;  %v956_v36 = vpop.f32.mrf.mxu3 }
  0xc0   : > { %v709_v37 = vpop.f32.mrf.mxu0 }
  0xc1   : > { %v957_v38 = vadd.f32 %v956_v36, %v788_v35  ;;  %v710_v39 = vadd.f32 %v1815_v48, %v709_v37  ;;  %v878_v40 = vpop.f32.mrf.mxu1 }
  0xc3   : > { %v1065_v42 = vmax.f32 %v957_v38, 0.0  ;;  %v879_v43 = vadd.f32 %v878_v40, %v710_v39 }
  0xc5   : > { %1130 = vst.msk [vmem:[%s1831_s30 + $0x110] sm:$0xff] %vm1095_vm0, %v1065_v42  ;;  %v1034_v50 = vmax.f32 %v879_v43, 0.0  ;;  %v1324_v42 = vld [vmem:[%s1737_s18 + $0xc0] sm:$0xf] }
  0xc6   : > { %v789_v53 = vpop.f32.mrf.mxu2 }
  0xc7   : > { %1099 = vst.msk [vmem:[%s1831_s30 + $0x18] sm:$0xff] %vm1095_vm0, %v1034_v50  ;;  %v790_v54 = vadd.f32 %v1815_v48, %v789_v53  ;;  %v958_v55 = vpop.f32.mrf.mxu3  ;;  %v1326_v50 = vld [vmem:[%s1737_s18 + $0xc8] sm:$0xf0] }
  0xc8   : > { %v712_v58 = vpop.f32.mrf.mxu0  ;;  %v1454_v53 = vld [vmem:[%s1737_s18 + $0x1c8] sm:$0xf0] }
  0xc9   : > { %v959_v61 = vadd.f32 %v958_v55, %v790_v54  ;;  %v713_v62 = vadd.f32 %v1815_v48, %v712_v58  ;;  %v881_v63 = vpop.f32.mrf.mxu1  ;;  %v1453_v58 = vor.u32 %v1606_v47, %v1452_v46  ;;  %v1578_v46 = vld [vmem:[%s1737_s18 + $0xe4] sm:$0xf0]  ;;  %v1468_v47 = vld [vmem:[%s1737_s18 + $0x1e0] sm:$0xf] }
  0xcb   : > { %v1066_v0 = vmax.f32 %v959_v61, 0.0  ;;  %v882_v1 = vadd.f32 %v881_v63, %v713_v62  ;;  %751 = vmatmul.bf16.gmra.mxu0 %v1309_v56  ;;  %831 = vmatmul.bf16.gmra.mxu2 %v1437_v57  ;;  %v1325_v57 = vor.u32 %v1574_v45, %v1324_v42  ;;  %v1457_v61 = vor.u32 %v1605_v52, %v1454_v53  ;;  %v1609_v53 = vld [vmem:[%s1737_s18 + $0x1e4] sm:$0xf] }
  0xcc   : > { %920 = vmatmul.bf16.gmra.mxu1 %v1313_v59  ;;  %1000 = vmatmul.bf16.gmra.mxu3 %v1441_v60  ;;  %v1329_v60 = vor.u32 %v1573_v49, %v1326_v50  ;;  %v1610_v49 = vld [vmem:[%s1737_s18 + $0x1e4] sm:$0xf0]  ;;  %v1577_v50 = vld [vmem:[%s1737_s18 + $0xe4] sm:$0xf] }
  0xcd   : > { %1131 = vst.msk [vmem:[%s1831_s30 + $0x118] sm:$0xff] %vm1095_vm0, %v1066_v0  ;;  %v1035_v2 = vmax.f32 %v882_v1, 0.0 }
  0xce   : > { %v792_v3 = vpop.f32.mrf.mxu2 }
  0xcf   : > { %1100 = vst.msk [vmem:[%s1831_s30 + $0x20] sm:$0xff] %vm1095_vm0, %v1035_v2  ;;  %v793_v4 = vadd.f32 %v1815_v48, %v792_v3  ;;  %v961_v5 = vpop.f32.mrf.mxu3 }
  0xd0   : > { %v714_v6 = vpop.f32.mrf.mxu0 }
  0xd1   : > { %v962_v7 = vadd.f32 %v961_v5, %v793_v4  ;;  %v715_v8 = vadd.f32 %v1815_v48, %v714_v6  ;;  %v883_v9 = vpop.f32.mrf.mxu1 }
  0xd3   : > { %v1067_v11 = vmax.f32 %v962_v7, 0.0  ;;  %v884_v12 = vadd.f32 %v883_v9, %v715_v8 }
  0xd5   : > { %1132 = vst.msk [vmem:[%s1831_s30 + $0x120] sm:$0xff] %vm1095_vm0, %v1067_v11  ;;  %v1036_v18 = vmax.f32 %v884_v12, 0.0  ;;  %v1332_v11 = vld [vmem:[%s1737_s18 + $0xd0] sm:$0xf] }
  0xd6   : > { %v794_v21 = vpop.f32.mrf.mxu2 }
  0xd7   : > { %1101 = vst.msk [vmem:[%s1831_s30 + $0x28] sm:$0xff] %vm1095_vm0, %v1036_v18  ;;  %v795_v22 = vadd.f32 %v1815_v48, %v794_v21  ;;  %v963_v23 = vpop.f32.mrf.mxu3  ;;  %v1334_v18 = vld [vmem:[%s1737_s18 + $0xd8] sm:$0xf0] }
  0xd8   : > { %v717_v26 = vpop.f32.mrf.mxu0  ;;  %v1462_v21 = vld [vmem:[%s1737_s18 + $0x1d8] sm:$0xf0] }
  0xd9   : > { %v964_v29 = vadd.f32 %v963_v23, %v795_v22  ;;  %v718_v30 = vadd.f32 %v1815_v48, %v717_v26  ;;  %v886_v31 = vpop.f32.mrf.mxu1  ;;  %v1461_v26 = vor.u32 %v1608_v16, %v1460_v15  ;;  %v1580_v15 = vld [vmem:[%s1737_s18 + $0xf4] sm:$0xf0]  ;;  %v1476_v16 = vld [vmem:[%s1737_s18 + $0x1f0] sm:$0xf] }
  0xdb   : > { %v1068_v32 = vmax.f32 %v964_v29, 0.0  ;;  %v887_v33 = vadd.f32 %v886_v31, %v718_v30  ;;  %756 = vmatmul.bf16.gmra.mxu0 %v1317_v24  ;;  %836 = vmatmul.bf16.gmra.mxu2 %v1445_v25  ;;  %v1333_v25 = vor.u32 %v1576_v14, %v1332_v11  ;;  %v1465_v29 = vor.u32 %v1607_v20, %v1462_v21  ;;  %v1611_v21 = vld [vmem:[%s1737_s18 + $0x1f4] sm:$0xf] }
  0xdc   : > { %925 = vmatmul.bf16.gmra.mxu1 %v1321_v27  ;;  %1005 = vmatmul.bf16.gmra.mxu3 %v1449_v28  ;;  %v1337_v28 = vor.u32 %v1575_v17, %v1334_v18  ;;  %v1612_v17 = vld [vmem:[%s1737_s18 + $0x1f4] sm:$0xf0]  ;;  %v1579_v18 = vld [vmem:[%s1737_s18 + $0xf4] sm:$0xf] }
  0xdd   : > { %1133 = vst.msk [vmem:[%s1831_s30 + $0x128] sm:$0xff] %vm1095_vm0, %v1068_v32  ;;  %v1037_v34 = vmax.f32 %v887_v33, 0.0 }
  0xde   : > { %v797_v35 = vpop.f32.mrf.mxu2 }
  0xdf   : > { %1102 = vst.msk [vmem:[%s1831_s30 + $0x30] sm:$0xff] %vm1095_vm0, %v1037_v34  ;;  %v798_v36 = vadd.f32 %v1815_v48, %v797_v35  ;;  %v966_v37 = vpop.f32.mrf.mxu3 }
  0xe0   : > { %v719_v38 = vpop.f32.mrf.mxu0 }
  0xe1   : > { %v967_v39 = vadd.f32 %v966_v37, %v798_v36  ;;  %v720_v40 = vadd.f32 %v1815_v48, %v719_v38  ;;  %v888_v41 = vpop.f32.mrf.mxu1 }
  0xe3   : > { %v1069_v43 = vmax.f32 %v967_v39, 0.0  ;;  %v889_v44 = vadd.f32 %v888_v41, %v720_v40 }
  0xe5   : > { %1134 = vst.msk [vmem:[%s1831_s30 + $0x130] sm:$0xff] %vm1095_vm0, %v1069_v43  ;;  %v1038_v51 = vmax.f32 %v889_v44, 0.0  ;;  %v1340_v43 = vld [vmem:[%s1737_s18 + $0xe0] sm:$0xf] }
  0xe6   : > { %v799_v54 = vpop.f32.mrf.mxu2 }
  0xe7   : > { %1103 = vst.msk [vmem:[%s1831_s30 + $0x38] sm:$0xff] %vm1095_vm0, %v1038_v51  ;;  %v800_v55 = vadd.f32 %v1815_v48, %v799_v54  ;;  %v968_v56 = vpop.f32.mrf.mxu3  ;;  %v1342_v51 = vld [vmem:[%s1737_s18 + $0xe8] sm:$0xf0] }
  0xe8   : > { %v722_v59 = vpop.f32.mrf.mxu0  ;;  %v1470_v54 = vld [vmem:[%s1737_s18 + $0x1e8] sm:$0xf0] }
  0xe9   : > { %v969_v62 = vadd.f32 %v968_v56, %v800_v55  ;;  %v723_v63 = vadd.f32 %v1815_v48, %v722_v59  ;;  %v891_v0 = vpop.f32.mrf.mxu1  ;;  %v1469_v59 = vor.u32 %v1610_v49, %v1468_v47 }
  0xeb   : > { %v1070_v1 = vmax.f32 %v969_v62, 0.0  ;;  %v892_v2 = vadd.f32 %v891_v0, %v723_v63  ;;  %761 = vmatmul.bf16.gmra.mxu0 %v1325_v57  ;;  %841 = vmatmul.bf16.gmra.mxu2 %v1453_v58  ;;  %v1341_v58 = vor.u32 %v1578_v46, %v1340_v43  ;;  %v1473_v62 = vor.u32 %v1609_v53, %v1470_v54 }
  0xec   : > { %930 = vmatmul.bf16.gmra.mxu1 %v1329_v60  ;;  %1010 = vmatmul.bf16.gmra.mxu3 %v1457_v61  ;;  %v1345_v61 = vor.u32 %v1577_v50, %v1342_v51 }
  0xed   : > { %1135 = vst.msk [vmem:[%s1831_s30 + $0x138] sm:$0xff] %vm1095_vm0, %v1070_v1  ;;  %v1039_v3 = vmax.f32 %v892_v2, 0.0 }
  0xee   : > { %v802_v4 = vpop.f32.mrf.mxu2 }
  0xef   : > { %1104 = vst.msk [vmem:[%s1831_s30 + $0x40] sm:$0xff] %vm1095_vm0, %v1039_v3  ;;  %v803_v5 = vadd.f32 %v1815_v48, %v802_v4  ;;  %v971_v6 = vpop.f32.mrf.mxu3 }
  0xf0   : > { %v724_v7 = vpop.f32.mrf.mxu0 }
  0xf1   : > { %v972_v8 = vadd.f32 %v971_v6, %v803_v5  ;;  %v725_v9 = vadd.f32 %v1815_v48, %v724_v7  ;;  %v893_v10 = vpop.f32.mrf.mxu1 }
  0xf3   : > { %v1071_v12 = vmax.f32 %v972_v8, 0.0  ;;  %v894_v13 = vadd.f32 %v893_v10, %v725_v9 }
  0xf5   : > { %1136 = vst.msk [vmem:[%s1831_s30 + $0x140] sm:$0xff] %vm1095_vm0, %v1071_v12  ;;  %v1040_v19 = vmax.f32 %v894_v13, 0.0  ;;  %v1348_v12 = vld [vmem:[%s1737_s18 + $0xf0] sm:$0xf] }
  0xf6   : > { %v804_v22 = vpop.f32.mrf.mxu2 }
  0xf7   : > { %1105 = vst.msk [vmem:[%s1831_s30 + $0x48] sm:$0xff] %vm1095_vm0, %v1040_v19  ;;  %v805_v23 = vadd.f32 %v1815_v48, %v804_v22  ;;  %v973_v24 = vpop.f32.mrf.mxu3  ;;  %v1350_v19 = vld [vmem:[%s1737_s18 + $0xf8] sm:$0xf0] }
  0xf8   : > { %v727_v27 = vpop.f32.mrf.mxu0  ;;  %v1478_v22 = vld [vmem:[%s1737_s18 + $0x1f8] sm:$0xf0] }
  0xf9   : > { %v974_v30 = vadd.f32 %v973_v24, %v805_v23  ;;  %v728_v31 = vadd.f32 %v1815_v48, %v727_v27  ;;  %v896_v32 = vpop.f32.mrf.mxu1  ;;  %v1477_v27 = vor.u32 %v1612_v17, %v1476_v16 }
  0xfb   : > { %v1072_v33 = vmax.f32 %v974_v30, 0.0  ;;  %v897_v34 = vadd.f32 %v896_v32, %v728_v31  ;;  %766 = vmatmul.bf16.gmra.mxu0 %v1333_v25  ;;  %846 = vmatmul.bf16.gmra.mxu2 %v1461_v26  ;;  %v1349_v26 = vor.u32 %v1580_v15, %v1348_v12  ;;  %v1481_v30 = vor.u32 %v1611_v21, %v1478_v22 }
  0xfc   : > { %935 = vmatmul.bf16.gmra.mxu1 %v1337_v28  ;;  %1015 = vmatmul.bf16.gmra.mxu3 %v1465_v29  ;;  %v1353_v29 = vor.u32 %v1579_v18, %v1350_v19 }
  0xfd   : > { %1137 = vst.msk [vmem:[%s1831_s30 + $0x148] sm:$0xff] %vm1095_vm0, %v1072_v33  ;;  %v1041_v35 = vmax.f32 %v897_v34, 0.0 }
  0xfe   : > { %v807_v36 = vpop.f32.mrf.mxu2 }
  0xff   : > { %1106 = vst.msk [vmem:[%s1831_s30 + $0x50] sm:$0xff] %vm1095_vm0, %v1041_v35  ;;  %v808_v37 = vadd.f32 %v1815_v48, %v807_v36  ;;  %v976_v38 = vpop.f32.mrf.mxu3 }
 0x100   : > { %v729_v39 = vpop.f32.mrf.mxu0 }
 0x101   : > { %v977_v40 = vadd.f32 %v976_v38, %v808_v37  ;;  %v730_v41 = vadd.f32 %v1815_v48, %v729_v39  ;;  %v898_v42 = vpop.f32.mrf.mxu1 }
 0x103   : > { %v1073_v44 = vmax.f32 %v977_v40, 0.0  ;;  %v899_v45 = vadd.f32 %v898_v42, %v730_v41 }
 0x105   : > { %1138 = vst.msk [vmem:[%s1831_s30 + $0x150] sm:$0xff] %vm1095_vm0, %v1073_v44  ;;  %v1042_v52 = vmax.f32 %v899_v45, 0.0 }
 0x106   : > { %v809_v55 = vpop.f32.mrf.mxu2 }
 0x107   : > { %1107 = vst.msk [vmem:[%s1831_s30 + $0x58] sm:$0xff] %vm1095_vm0, %v1042_v52  ;;  %v810_v56 = vadd.f32 %v1815_v48, %v809_v55  ;;  %v978_v57 = vpop.f32.mrf.mxu3 }
 0x108   : > { %v732_v60 = vpop.f32.mrf.mxu0 }
 0x109   : > { %v979_v63 = vadd.f32 %v978_v57, %v810_v56  ;;  %v733_v0 = vadd.f32 %v1815_v48, %v732_v60  ;;  %v901_v1 = vpop.f32.mrf.mxu1 }
 0x10b   : > { %v1074_v2 = vmax.f32 %v979_v63, 0.0  ;;  %v902_v3 = vadd.f32 %v901_v1, %v733_v0  ;;  %771 = vmatmul.bf16.gmra.mxu0 %v1341_v58  ;;  %851 = vmatmul.bf16.gmra.mxu2 %v1469_v59 }
 0x10c   : > { %940 = vmatmul.bf16.gmra.mxu1 %v1345_v61  ;;  %1020 = vmatmul.bf16.gmra.mxu3 %v1473_v62 }
 0x10d   : > { %1139 = vst.msk [vmem:[%s1831_s30 + $0x158] sm:$0xff] %vm1095_vm0, %v1074_v2  ;;  %v1043_v4 = vmax.f32 %v902_v3, 0.0 }
 0x10e   : > { %v812_v5 = vpop.f32.mrf.mxu2 }
 0x10f   : > { %1108 = vst.msk [vmem:[%s1831_s30 + $0x60] sm:$0xff] %vm1095_vm0, %v1043_v4  ;;  %v813_v6 = vadd.f32 %v1815_v48, %v812_v5  ;;  %v981_v7 = vpop.f32.mrf.mxu3 }
 0x110   : > { %v734_v8 = vpop.f32.mrf.mxu0 }
 0x111   : > { %v982_v9 = vadd.f32 %v981_v7, %v813_v6  ;;  %v735_v10 = vadd.f32 %v1815_v48, %v734_v8  ;;  %v903_v11 = vpop.f32.mrf.mxu1 }
 0x113   : > { %v1075_v13 = vmax.f32 %v982_v9, 0.0  ;;  %v904_v14 = vadd.f32 %v903_v11, %v735_v10 }
 0x115   : > { %1140 = vst.msk [vmem:[%s1831_s30 + $0x160] sm:$0xff] %vm1095_vm0, %v1075_v13  ;;  %v1044_v20 = vmax.f32 %v904_v14, 0.0 }
 0x116   : > { %v814_v23 = vpop.f32.mrf.mxu2 }
 0x117   : > { %1109 = vst.msk [vmem:[%s1831_s30 + $0x68] sm:$0xff] %vm1095_vm0, %v1044_v20  ;;  %v815_v24 = vadd.f32 %v1815_v48, %v814_v23  ;;  %v983_v25 = vpop.f32.mrf.mxu3 }
 0x118   : > { %v737_v28 = vpop.f32.mrf.mxu0 }
 0x119   : > { %v984_v31 = vadd.f32 %v983_v25, %v815_v24  ;;  %v738_v32 = vadd.f32 %v1815_v48, %v737_v28  ;;  %v906_v33 = vpop.f32.mrf.mxu1 }
 0x11b   : > { %v1076_v34 = vmax.f32 %v984_v31, 0.0  ;;  %v907_v35 = vadd.f32 %v906_v33, %v738_v32  ;;  %776 = vmatmul.bf16.gmra.mxu0 %v1349_v26  ;;  %856 = vmatmul.bf16.gmra.mxu2 %v1477_v27 }
 0x11c   : > { %945 = vmatmul.bf16.gmra.mxu1 %v1353_v29  ;;  %1025 = vmatmul.bf16.gmra.mxu3 %v1481_v30 }
 0x11d   : > { %1141 = vst.msk [vmem:[%s1831_s30 + $0x168] sm:$0xff] %vm1095_vm0, %v1076_v34  ;;  %v1045_v36 = vmax.f32 %v907_v35, 0.0 }
 0x11e   : > { %v817_v37 = vpop.f32.mrf.mxu2 }
 0x11f   : > { %1110 = vst.msk [vmem:[%s1831_s30 + $0x70] sm:$0xff] %vm1095_vm0, %v1045_v36  ;;  %v818_v38 = vadd.f32 %v1815_v48, %v817_v37  ;;  %v986_v39 = vpop.f32.mrf.mxu3 }
 0x120   : > { %v739_v40 = vpop.f32.mrf.mxu0 }
 0x121   : > { %v987_v41 = vadd.f32 %v986_v39, %v818_v38  ;;  %v740_v42 = vadd.f32 %v1815_v48, %v739_v40  ;;  %v908_v43 = vpop.f32.mrf.mxu1 }
 0x123   : > { %v1077_v44 = vmax.f32 %v987_v41, 0.0  ;;  %v909_v45 = vadd.f32 %v908_v43, %v740_v42 }
 0x125   : > { %1142 = vst.msk [vmem:[%s1831_s30 + $0x170] sm:$0xff] %vm1095_vm0, %v1077_v44  ;;  %v1046_v46 = vmax.f32 %v909_v45, 0.0 }
 0x126   : > { %v819_v47 = vpop.f32.mrf.mxu2 }
 0x127   : > { %1111 = vst.msk [vmem:[%s1831_s30 + $0x78] sm:$0xff] %vm1095_vm0, %v1046_v46  ;;  %v820_v49 = vadd.f32 %v1815_v48, %v819_v47  ;;  %v988_v50 = vpop.f32.mrf.mxu3 }
 0x128   : > { %v742_v51 = vpop.f32.mrf.mxu0 }
 0x129   : > { %v989_v52 = vadd.f32 %v988_v50, %v820_v49  ;;  %v743_v53 = vadd.f32 %v1815_v48, %v742_v51  ;;  %v911_v54 = vpop.f32.mrf.mxu1 }
 0x12b   : > { %v1078_v55 = vmax.f32 %v989_v52, 0.0  ;;  %v912_v56 = vadd.f32 %v911_v54, %v743_v53 }
 0x12d   : > { %1143 = vst.msk [vmem:[%s1831_s30 + $0x178] sm:$0xff] %vm1095_vm0, %v1078_v55  ;;  %v1047_v57 = vmax.f32 %v912_v56, 0.0 }
 0x12e   : > { %v822_v58 = vpop.f32.mrf.mxu2 }
 0x12f   : > { %1112 = vst.msk [vmem:[%s1831_s30 + $0x80] sm:$0xff] %vm1095_vm0, %v1047_v57  ;;  %v823_v59 = vadd.f32 %v1815_v48, %v822_v58  ;;  %v991_v60 = vpop.f32.mrf.mxu3 }
 0x130   : > { %v744_v61 = vpop.f32.mrf.mxu0 }
 0x131   : > { %v992_v62 = vadd.f32 %v991_v60, %v823_v59  ;;  %v745_v63 = vadd.f32 %v1815_v48, %v744_v61  ;;  %v913_v0 = vpop.f32.mrf.mxu1 }
 0x133   : > { %v1079_v1 = vmax.f32 %v992_v62, 0.0  ;;  %v914_v2 = vadd.f32 %v913_v0, %v745_v63 }
 0x135   : > { %1144 = vst.msk [vmem:[%s1831_s30 + $0x180] sm:$0xff] %vm1095_vm0, %v1079_v1  ;;  %v1048_v3 = vmax.f32 %v914_v2, 0.0 }
 0x136   : > { %v824_v4 = vpop.f32.mrf.mxu2 }
 0x137   : > { %1113 = vst.msk [vmem:[%s1831_s30 + $0x88] sm:$0xff] %vm1095_vm0, %v1048_v3  ;;  %v825_v5 = vadd.f32 %v1815_v48, %v824_v4  ;;  %v993_v6 = vpop.f32.mrf.mxu3 }
 0x138   : > { %v747_v7 = vpop.f32.mrf.mxu0 }
 0x139   : > { %v994_v8 = vadd.f32 %v993_v6, %v825_v5  ;;  %v748_v9 = vadd.f32 %v1815_v48, %v747_v7  ;;  %v916_v10 = vpop.f32.mrf.mxu1 }
 0x13b   : > { %v1080_v11 = vmax.f32 %v994_v8, 0.0  ;;  %v917_v12 = vadd.f32 %v916_v10, %v748_v9 }
 0x13d   : > { %1145 = vst.msk [vmem:[%s1831_s30 + $0x188] sm:$0xff] %vm1095_vm0, %v1080_v11  ;;  %v1049_v13 = vmax.f32 %v917_v12, 0.0 }
 0x13e   : > { %v827_v14 = vpop.f32.mrf.mxu2 }
 0x13f   : > { %1114 = vst.msk [vmem:[%s1831_s30 + $0x90] sm:$0xff] %vm1095_vm0, %v1049_v13  ;;  %v828_v15 = vadd.f32 %v1815_v48, %v827_v14  ;;  %v996_v16 = vpop.f32.mrf.mxu3 }
 0x140   : > { %v749_v17 = vpop.f32.mrf.mxu0 }
 0x141   : > { %v997_v18 = vadd.f32 %v996_v16, %v828_v15  ;;  %v750_v19 = vadd.f32 %v1815_v48, %v749_v17  ;;  %v918_v20 = vpop.f32.mrf.mxu1 }
 0x143   : > { %v1081_v21 = vmax.f32 %v997_v18, 0.0  ;;  %v919_v22 = vadd.f32 %v918_v20, %v750_v19 }
 0x145   : > { %1146 = vst.msk [vmem:[%s1831_s30 + $0x190] sm:$0xff] %vm1095_vm0, %v1081_v21  ;;  %v1050_v23 = vmax.f32 %v919_v22, 0.0 }
 0x146   : > { %v829_v24 = vpop.f32.mrf.mxu2 }
 0x147   : > { %1115 = vst.msk [vmem:[%s1831_s30 + $0x98] sm:$0xff] %vm1095_vm0, %v1050_v23  ;;  %v830_v25 = vadd.f32 %v1815_v48, %v829_v24  ;;  %v998_v26 = vpop.f32.mrf.mxu3 }
 0x148   : > { %v752_v27 = vpop.f32.mrf.mxu0 }
 0x149   : > { %v999_v28 = vadd.f32 %v998_v26, %v830_v25  ;;  %v753_v29 = vadd.f32 %v1815_v48, %v752_v27  ;;  %v921_v30 = vpop.f32.mrf.mxu1 }
 0x14b   : > { %v1082_v31 = vmax.f32 %v999_v28, 0.0  ;;  %v922_v32 = vadd.f32 %v921_v30, %v753_v29 }
 0x14d   : > { %1147 = vst.msk [vmem:[%s1831_s30 + $0x198] sm:$0xff] %vm1095_vm0, %v1082_v31  ;;  %v1051_v33 = vmax.f32 %v922_v32, 0.0 }
 0x14e   : > { %v832_v34 = vpop.f32.mrf.mxu2 }
 0x14f   : > { %1116 = vst.msk [vmem:[%s1831_s30 + $0xa0] sm:$0xff] %vm1095_vm0, %v1051_v33  ;;  %v833_v35 = vadd.f32 %v1815_v48, %v832_v34  ;;  %v1001_v36 = vpop.f32.mrf.mxu3 }
 0x150   : > { %v754_v37 = vpop.f32.mrf.mxu0 }
 0x151   : > { %v1002_v38 = vadd.f32 %v1001_v36, %v833_v35  ;;  %v755_v39 = vadd.f32 %v1815_v48, %v754_v37  ;;  %v923_v40 = vpop.f32.mrf.mxu1 }
 0x153   : > { %v1083_v41 = vmax.f32 %v1002_v38, 0.0  ;;  %v924_v42 = vadd.f32 %v923_v40, %v755_v39 }
 0x155   : > { %1148 = vst.msk [vmem:[%s1831_s30 + $0x1a0] sm:$0xff] %vm1095_vm0, %v1083_v41  ;;  %v1052_v43 = vmax.f32 %v924_v42, 0.0 }
 0x156   : > { %v834_v44 = vpop.f32.mrf.mxu2 }
 0x157   : > { %1117 = vst.msk [vmem:[%s1831_s30 + $0xa8] sm:$0xff] %vm1095_vm0, %v1052_v43  ;;  %v835_v45 = vadd.f32 %v1815_v48, %v834_v44  ;;  %v1003_v46 = vpop.f32.mrf.mxu3 }
 0x158   : > { %v757_v47 = vpop.f32.mrf.mxu0 }
 0x159   : > { %v1004_v49 = vadd.f32 %v1003_v46, %v835_v45  ;;  %v758_v50 = vadd.f32 %v1815_v48, %v757_v47  ;;  %v926_v51 = vpop.f32.mrf.mxu1 }
 0x15b   : > { %v1084_v52 = vmax.f32 %v1004_v49, 0.0  ;;  %v927_v53 = vadd.f32 %v926_v51, %v758_v50 }
 0x15d   : > { %1149 = vst.msk [vmem:[%s1831_s30 + $0x1a8] sm:$0xff] %vm1095_vm0, %v1084_v52  ;;  %v1053_v54 = vmax.f32 %v927_v53, 0.0 }
 0x15e   : > { %v837_v55 = vpop.f32.mrf.mxu2 }
 0x15f   : > { %1118 = vst.msk [vmem:[%s1831_s30 + $0xb0] sm:$0xff] %vm1095_vm0, %v1053_v54  ;;  %v838_v56 = vadd.f32 %v1815_v48, %v837_v55  ;;  %v1006_v57 = vpop.f32.mrf.mxu3 }
 0x160   : > { %v759_v58 = vpop.f32.mrf.mxu0 }
 0x161   : > { %v1007_v59 = vadd.f32 %v1006_v57, %v838_v56  ;;  %v760_v60 = vadd.f32 %v1815_v48, %v759_v58  ;;  %v928_v61 = vpop.f32.mrf.mxu1 }
 0x163   : > { %v1085_v62 = vmax.f32 %v1007_v59, 0.0  ;;  %v929_v63 = vadd.f32 %v928_v61, %v760_v60 }
 0x165   : > { %1150 = vst.msk [vmem:[%s1831_s30 + $0x1b0] sm:$0xff] %vm1095_vm0, %v1085_v62  ;;  %v1054_v0 = vmax.f32 %v929_v63, 0.0 }
 0x166   : > { %v839_v1 = vpop.f32.mrf.mxu2 }
 0x167   : > { %1119 = vst.msk [vmem:[%s1831_s30 + $0xb8] sm:$0xff] %vm1095_vm0, %v1054_v0  ;;  %v840_v2 = vadd.f32 %v1815_v48, %v839_v1  ;;  %v1008_v3 = vpop.f32.mrf.mxu3 }
 0x168   : > { %v762_v4 = vpop.f32.mrf.mxu0 }
 0x169   : > { %v1009_v5 = vadd.f32 %v1008_v3, %v840_v2  ;;  %v763_v6 = vadd.f32 %v1815_v48, %v762_v4  ;;  %v931_v7 = vpop.f32.mrf.mxu1 }
 0x16b   : > { %v1086_v8 = vmax.f32 %v1009_v5, 0.0  ;;  %v932_v9 = vadd.f32 %v931_v7, %v763_v6 }
 0x16d   : > { %1151 = vst.msk [vmem:[%s1831_s30 + $0x1b8] sm:$0xff] %vm1095_vm0, %v1086_v8  ;;  %v1055_v10 = vmax.f32 %v932_v9, 0.0 }
 0x16e   : > { %v842_v11 = vpop.f32.mrf.mxu2 }
 0x16f   : > { %1120 = vst.msk [vmem:[%s1831_s30 + $0xc0] sm:$0xff] %vm1095_vm0, %v1055_v10  ;;  %v843_v12 = vadd.f32 %v1815_v48, %v842_v11  ;;  %v1011_v13 = vpop.f32.mrf.mxu3 }
 0x170   : > { %v764_v14 = vpop.f32.mrf.mxu0 }
 0x171   : > { %v1012_v15 = vadd.f32 %v1011_v13, %v843_v12  ;;  %v765_v16 = vadd.f32 %v1815_v48, %v764_v14  ;;  %v933_v17 = vpop.f32.mrf.mxu1 }
 0x173   : > { %v1087_v18 = vmax.f32 %v1012_v15, 0.0  ;;  %v934_v19 = vadd.f32 %v933_v17, %v765_v16 }
 0x175   : > { %1152 = vst.msk [vmem:[%s1831_s30 + $0x1c0] sm:$0xff] %vm1095_vm0, %v1087_v18  ;;  %v1056_v20 = vmax.f32 %v934_v19, 0.0 }
 0x176   : > { %v844_v21 = vpop.f32.mrf.mxu2 }
 0x177   : > { %1121 = vst.msk [vmem:[%s1831_s30 + $0xc8] sm:$0xff] %vm1095_vm0, %v1056_v20  ;;  %v845_v22 = vadd.f32 %v1815_v48, %v844_v21  ;;  %v1013_v23 = vpop.f32.mrf.mxu3 }
 0x178   : > { %v767_v24 = vpop.f32.mrf.mxu0 }
 0x179   : > { %v1014_v25 = vadd.f32 %v1013_v23, %v845_v22  ;;  %v768_v26 = vadd.f32 %v1815_v48, %v767_v24  ;;  %v936_v27 = vpop.f32.mrf.mxu1 }
 0x17b   : > { %v1088_v28 = vmax.f32 %v1014_v25, 0.0  ;;  %v937_v29 = vadd.f32 %v936_v27, %v768_v26 }
 0x17d   : > { %1153 = vst.msk [vmem:[%s1831_s30 + $0x1c8] sm:$0xff] %vm1095_vm0, %v1088_v28  ;;  %v1057_v30 = vmax.f32 %v937_v29, 0.0 }
 0x17e   : > { %v847_v31 = vpop.f32.mrf.mxu2 }
 0x17f   : > { %1122 = vst.msk [vmem:[%s1831_s30 + $0xd0] sm:$0xff] %vm1095_vm0, %v1057_v30  ;;  %v848_v32 = vadd.f32 %v1815_v48, %v847_v31  ;;  %v1016_v33 = vpop.f32.mrf.mxu3 }
 0x180   : > { %v769_v34 = vpop.f32.mrf.mxu0 }
 0x181   : > { %v1017_v35 = vadd.f32 %v1016_v33, %v848_v32  ;;  %v770_v36 = vadd.f32 %v1815_v48, %v769_v34  ;;  %v938_v37 = vpop.f32.mrf.mxu1 }
 0x183   : > { %v1089_v38 = vmax.f32 %v1017_v35, 0.0  ;;  %v939_v39 = vadd.f32 %v938_v37, %v770_v36 }
 0x185   : > { %1154 = vst.msk [vmem:[%s1831_s30 + $0x1d0] sm:$0xff] %vm1095_vm0, %v1089_v38  ;;  %v1058_v40 = vmax.f32 %v939_v39, 0.0 }
 0x186   : > { %v849_v41 = vpop.f32.mrf.mxu2 }
 0x187   : > { %1123 = vst.msk [vmem:[%s1831_s30 + $0xd8] sm:$0xff] %vm1095_vm0, %v1058_v40  ;;  %v850_v42 = vadd.f32 %v1815_v48, %v849_v41  ;;  %v1018_v43 = vpop.f32.mrf.mxu3 }
 0x188   : > { %v772_v44 = vpop.f32.mrf.mxu0 }
 0x189   : > { %v1019_v45 = vadd.f32 %v1018_v43, %v850_v42  ;;  %v773_v46 = vadd.f32 %v1815_v48, %v772_v44  ;;  %v941_v47 = vpop.f32.mrf.mxu1 }
 0x18b   : > { %v1090_v49 = vmax.f32 %v1019_v45, 0.0  ;;  %v942_v50 = vadd.f32 %v941_v47, %v773_v46 }
 0x18d   : > { %1155 = vst.msk [vmem:[%s1831_s30 + $0x1d8] sm:$0xff] %vm1095_vm0, %v1090_v49  ;;  %v1059_v51 = vmax.f32 %v942_v50, 0.0 }
 0x18e   : > { %v852_v52 = vpop.f32.mrf.mxu2 }
 0x18f   : > { %1124 = vst.msk [vmem:[%s1831_s30 + $0xe0] sm:$0xff] %vm1095_vm0, %v1059_v51  ;;  %v853_v53 = vadd.f32 %v1815_v48, %v852_v52  ;;  %v1021_v54 = vpop.f32.mrf.mxu3 }
 0x190   : > { %v774_v55 = vpop.f32.mrf.mxu0 }
 0x191   : > { %v1022_v56 = vadd.f32 %v1021_v54, %v853_v53  ;;  %v775_v57 = vadd.f32 %v1815_v48, %v774_v55  ;;  %v943_v58 = vpop.f32.mrf.mxu1 }
 0x193   : > { %v1091_v59 = vmax.f32 %v1022_v56, 0.0  ;;  %v944_v60 = vadd.f32 %v943_v58, %v775_v57 }
 0x195   : > { %1156 = vst.msk [vmem:[%s1831_s30 + $0x1e0] sm:$0xff] %vm1095_vm0, %v1091_v59  ;;  %v1060_v61 = vmax.f32 %v944_v60, 0.0 }
 0x196   : > { %v854_v62 = vpop.f32.mrf.mxu2 }
 0x197   : > { %1125 = vst.msk [vmem:[%s1831_s30 + $0xe8] sm:$0xff] %vm1095_vm0, %v1060_v61  ;;  %v855_v63 = vadd.f32 %v1815_v48, %v854_v62  ;;  %v1023_v0 = vpop.f32.mrf.mxu3 }
 0x198   : > { %v777_v1 = vpop.f32.mrf.mxu0 }
 0x199   : > { %v1024_v2 = vadd.f32 %v1023_v0, %v855_v63  ;;  %v778_v3 = vadd.f32 %v1815_v48, %v777_v1  ;;  %v946_v4 = vpop.f32.mrf.mxu1 }
 0x19b   : > { %v1092_v5 = vmax.f32 %v1024_v2, 0.0  ;;  %v947_v6 = vadd.f32 %v946_v4, %v778_v3 }
 0x19d   : > { %1157 = vst.msk [vmem:[%s1831_s30 + $0x1e8] sm:$0xff] %vm1095_vm0, %v1092_v5  ;;  %v1061_v7 = vmax.f32 %v947_v6, 0.0 }
 0x19e   : > { %v857_v8 = vpop.f32.mrf.mxu2 }
 0x19f   : > { %1126 = vst.msk [vmem:[%s1831_s30 + $0xf0] sm:$0xff] %vm1095_vm0, %v1061_v7  ;;  %v858_v9 = vadd.f32 %v1815_v48, %v857_v8  ;;  %v1026_v10 = vpop.f32.mrf.mxu3 }
 0x1a0   : > { %v779_v11 = vpop.f32.mrf.mxu0 }
 0x1a1   : > { %v1027_v12 = vadd.f32 %v1026_v10, %v858_v9  ;;  %v780_v13 = vadd.f32 %v1815_v48, %v779_v11  ;;  %v948_v14 = vpop.f32.mrf.mxu1 }
 0x1a3   : > { %v1093_v15 = vmax.f32 %v1027_v12, 0.0  ;;  %v949_v16 = vadd.f32 %v948_v14, %v780_v13 }
 0x1a5   : > { %1158 = vst.msk [vmem:[%s1831_s30 + $0x1f0] sm:$0xff] %vm1095_vm0, %v1093_v15  ;;  %v1062_v17 = vmax.f32 %v949_v16, 0.0 }
 0x1a6   : > { %v859_v18 = vpop.f32.mrf.mxu2 }
 0x1a7   : > { %1127 = vst.msk [vmem:[%s1831_s30 + $0xf8] sm:$0xff] %vm1095_vm0, %v1062_v17  ;;  %v860_v19 = vadd.f32 %v1815_v48, %v859_v18  ;;  %v1028_v20 = vpop.f32.mrf.mxu3 }
 0x1a9   : > { %v1029_v21 = vadd.f32 %v1028_v20, %v860_v19 }
 0x1ab   : > { %v1094_v22 = vmax.f32 %v1029_v21, 0.0 }
 0x1ad   : > { %1159 = vst.msk [vmem:[%s1831_s30 + $0x1f8] sm:$0xff] %vm1095_vm0, %v1094_v22 }
 0x1ae PF: > { %s13_s12 = sadd.s32 1, %s1660_s12  }
 0x1af   : > { %p10_p4 = scmp.ge.s32.totalorder %s13_s12, 6  }
 0x1b1   :  { %12 = sbr.rel (!%p10_p4) target bundleno = 1 (0x1), region = 62 }

// kernel: bigcnn_forward.5
= control target key start
LH: loop header
LB: loop body
LE: loop exit
PB: predicated region body
PF: predicated region fallthrough
CT: control target
= control target key end

     0   :  { %vm2582_vm0 = vcmask 523264   ;;  %s5463_s1 = inlined_call_operand.vmem [shape: bf16[1024,64], index: 1, kind: input, shape index: {}]   ;;  %s5464_s2 = inlined_call_operand.vmem [shape: f32[1,64], index: 2, kind: input, shape index: {}]   ;;  %s5465_s0 = inlined_call_operand.vmem [shape: bf16[352,1024], index: 0, kind: input, shape index: {}]   ;;  %s5466_s3 = inlined_call_operand.vmem [shape: f32[352,64], index: 3, kind: output, shape index: {}]  }
   0x1   :  { %v3774_v0 = vld [vmem:[%s5463_s1 + $0x38] sm:$0xff]  ;;  %v3773_v4 = vld [vmem:[%s5463_s1 + $0x30] sm:$0xff]  ;;  %v3772_v8 = vld [vmem:[%s5463_s1 + $0x28] sm:$0xff] }
   0x2   :  { %v3782_v1 = vld [vmem:[%s5463_s1 + $0x78] sm:$0xff]  ;;  %1586 = vmatpush.bf16.msra.mxu0 %v3774_v0  ;;  %v3781_v5 = vld [vmem:[%s5463_s1 + $0x70] sm:$0xff]  ;;  %v3780_v9 = vld [vmem:[%s5463_s1 + $0x68] sm:$0xff] }
   0x3   :  { %v3790_v2 = vld [vmem:[%s5463_s1 + $0xb8] sm:$0xff]  ;;  %1705 = vmatpush.bf16.msra.mxu1 %v3782_v1  ;;  %v3789_v6 = vld [vmem:[%s5463_s1 + $0xb0] sm:$0xff]  ;;  %v3788_v10 = vld [vmem:[%s5463_s1 + $0xa8] sm:$0xff] }
   0x4   :  { %v3798_v3 = vld [vmem:[%s5463_s1 + $0xf8] sm:$0xff]  ;;  %1824 = vmatpush.bf16.msra.mxu2 %v3790_v2  ;;  %v3797_v7 = vld [vmem:[%s5463_s1 + $0xf0] sm:$0xff]  ;;  %v3796_v11 = vld [vmem:[%s5463_s1 + $0xe8] sm:$0xff] }
   0x5   :  { %1943 = vmatpush.bf16.msra.mxu3 %v3798_v3  ;;  %v3771_v12 = vld [vmem:[%s5463_s1 + $0x20] sm:$0xff]  ;;  %v3770_v16 = vld [vmem:[%s5463_s1 + $0x18] sm:$0xff]  ;;  %v3769_v20 = vld [vmem:[%s5463_s1 + $0x10] sm:$0xff] }
   0x6   :  { %1587 = vmatpush.bf16.msra.mxu0 %v3773_v4  ;;  %v3779_v13 = vld [vmem:[%s5463_s1 + $0x60] sm:$0xff]  ;;  %v3778_v17 = vld [vmem:[%s5463_s1 + $0x58] sm:$0xff]  ;;  %v3777_v21 = vld [vmem:[%s5463_s1 + $0x50] sm:$0xff] }
   0x7   :  { %1706 = vmatpush.bf16.msra.mxu1 %v3781_v5  ;;  %v3787_v14 = vld [vmem:[%s5463_s1 + $0xa0] sm:$0xff]  ;;  %v3786_v18 = vld [vmem:[%s5463_s1 + $0x98] sm:$0xff]  ;;  %v3785_v22 = vld [vmem:[%s5463_s1 + $0x90] sm:$0xff] }
   0x8   :  { %1825 = vmatpush.bf16.msra.mxu2 %v3789_v6  ;;  %v3795_v15 = vld [vmem:[%s5463_s1 + $0xe0] sm:$0xff]  ;;  %v3794_v19 = vld [vmem:[%s5463_s1 + $0xd8] sm:$0xff]  ;;  %v3793_v23 = vld [vmem:[%s5463_s1 + $0xd0] sm:$0xff] }
   0x9   :  { %1944 = vmatpush.bf16.msra.mxu3 %v3797_v7  ;;  %v3768_v24 = vld [vmem:[%s5463_s1 + $0x8] sm:$0xff]  ;;  %v3767_v28 = vld [vmem:[%s5463_s1] sm:$0xff]  ;;  %v3822_v40 = vld [vmem:[%s5463_s1 + $0x1b8] sm:$0xff] }
   0xa   :  { %1588 = vmatpush.bf16.msra.mxu0 %v3772_v8  ;;  %v3776_v25 = vld [vmem:[%s5463_s1 + $0x48] sm:$0xff]  ;;  %v3775_v29 = vld [vmem:[%s5463_s1 + $0x40] sm:$0xff]  ;;  %v3806_v41 = vld [vmem:[%s5463_s1 + $0x138] sm:$0xff] }
   0xb   :  { %1707 = vmatpush.bf16.msra.mxu1 %v3780_v9  ;;  %v3784_v26 = vld [vmem:[%s5463_s1 + $0x88] sm:$0xff]  ;;  %v3783_v30 = vld [vmem:[%s5463_s1 + $0x80] sm:$0xff]  ;;  %v3830_v46 = vld [vmem:[%s5463_s1 + $0x1f8] sm:$0xff] }
   0xc   :  { %1826 = vmatpush.bf16.msra.mxu2 %v3788_v10  ;;  %v3792_v27 = vld [vmem:[%s5463_s1 + $0xc8] sm:$0xff]  ;;  %v3791_v31 = vld [vmem:[%s5463_s1 + $0xc0] sm:$0xff]  ;;  %v3814_v47 = vld [vmem:[%s5463_s1 + $0x178] sm:$0xff] }
   0xd   :  { %1945 = vmatpush.bf16.msra.mxu3 %v3796_v11  ;;  %v2633_v32 = vld [vmem:[%s5465_s0] sm:$0xf]  ;;  %v3591_v34 = vld [vmem:[%s5465_s0 + $0x4] sm:$0xf]  ;;  %v2641_v36 = vld [vmem:[%s5465_s0 + $0x8] sm:$0xf] }
   0xe   :  { %1589 = vmatpush.bf16.msra.mxu0 %v3771_v12  ;;  %v3595_v33 = vld [vmem:[%s5465_s0 + $0x1c] sm:$0xf0]  ;;  %v2635_v35 = vld [vmem:[%s5465_s0 + $0x20] sm:$0xf0]  ;;  %v3596_v37 = vld [vmem:[%s5465_s0 + $0x24] sm:$0xf0] }
   0xf   :  { %1708 = vmatpush.bf16.msra.mxu1 %v3779_v13  ;;  %v3592_v38 = vld [vmem:[%s5465_s0 + $0xc] sm:$0xf]  ;;  %v2634_v42 = vor.u32 %v3595_v33, %v2633_v32  ;;  %v2638_v43 = vor.u32 %v3591_v34, %v2635_v35  ;;  %v2642_v44 = vor.u32 %v3596_v37, %v2641_v36  ;;  %v3821_v48 = vld [vmem:[%s5463_s1 + $0x1b0] sm:$0xff]  ;;  %v2665_v51 = vld [vmem:[%s5465_s0 + $0x40] sm:$0xf] }
  0x10   :  { %1827 = vmatpush.bf16.msra.mxu2 %v3787_v14  ;;  %v2643_v39 = vld [vmem:[%s5465_s0 + $0x28] sm:$0xf0]  ;;  %v3805_v49 = vld [vmem:[%s5463_s1 + $0x130] sm:$0xff]  ;;  %v3603_v52 = vld [vmem:[%s5465_s0 + $0x5c] sm:$0xf0] }
  0x11   :  { %1946 = vmatpush.bf16.msra.mxu3 %v3795_v15  ;;  %v2646_v45 = vor.u32 %v3592_v38, %v2643_v39  ;;  %v3829_v50 = vld [vmem:[%s5463_s1 + $0x1f0] sm:$0xff]  ;;  %v3599_v53 = vld [vmem:[%s5465_s0 + $0x44] sm:$0xf]  ;;  %v2673_v55 = vld [vmem:[%s5465_s0 + $0x48] sm:$0xf]  ;;  %v2666_v59 = vor.u32 %v3603_v52, %v2665_v51 }
  0x12   :  { %1590 = vmatpush.bf16.msra.mxu0 %v3770_v16  ;;  %v2667_v54 = vld [vmem:[%s5465_s0 + $0x60] sm:$0xf0]  ;;  %v3604_v56 = vld [vmem:[%s5465_s0 + $0x64] sm:$0xf0]  ;;  %v3600_v57 = vld [vmem:[%s5465_s0 + $0x4c] sm:$0xf] }
  0x13   :  { %1709 = vmatpush.bf16.msra.mxu1 %v3778_v17  ;;  %v2675_v58 = vld [vmem:[%s5465_s0 + $0x68] sm:$0xf0]  ;;  %v2670_v60 = vor.u32 %v3599_v53, %v2667_v54  ;;  %v2674_v61 = vor.u32 %v3604_v56, %v2673_v55  ;;  %v3813_v63 = vld [vmem:[%s5463_s1 + $0x170] sm:$0xff]  ;;  %v2697_v0 = vld [vmem:[%s5465_s0 + $0x80] sm:$0xf] }
  0x14   :  { %1828 = vmatpush.bf16.msra.mxu2 %v3786_v18  ;;  %v2678_v62 = vor.u32 %v3600_v57, %v2675_v58  ;;  %v3611_v1 = vld [vmem:[%s5465_s0 + $0x9c] sm:$0xf0]  ;;  %v3607_v2 = vld [vmem:[%s5465_s0 + $0x84] sm:$0xf]  ;;  %v2705_v4 = vld [vmem:[%s5465_s0 + $0x88] sm:$0xf] }
  0x15   :  { %1947 = vmatpush.bf16.msra.mxu3 %v3794_v19  ;;  %v2699_v3 = vld [vmem:[%s5465_s0 + $0xa0] sm:$0xf0]  ;;  %v3612_v5 = vld [vmem:[%s5465_s0 + $0xa4] sm:$0xf0]  ;;  %v3608_v6 = vld [vmem:[%s5465_s0 + $0x8c] sm:$0xf]  ;;  %v2698_v8 = vor.u32 %v3611_v1, %v2697_v0 }
  0x16   :  { %1591 = vmatpush.bf16.msra.mxu0 %v3769_v20  ;;  %v2707_v7 = vld [vmem:[%s5465_s0 + $0xa8] sm:$0xf0]  ;;  %v2702_v9 = vor.u32 %v3607_v2, %v2699_v3  ;;  %v2706_v10 = vor.u32 %v3612_v5, %v2705_v4  ;;  %v2729_v12 = vld [vmem:[%s5465_s0 + $0xc0] sm:$0xf]  ;;  %v3615_v14 = vld [vmem:[%s5465_s0 + $0xc4] sm:$0xf] }
  0x17   :  { %1710 = vmatpush.bf16.msra.mxu1 %v3777_v21  ;;  %v2710_v11 = vor.u32 %v3608_v6, %v2707_v7  ;;  %v3619_v13 = vld [vmem:[%s5465_s0 + $0xdc] sm:$0xf0]  ;;  %v2731_v15 = vld [vmem:[%s5465_s0 + $0xe0] sm:$0xf0]  ;;  %v2737_v16 = vld [vmem:[%s5465_s0 + $0xc8] sm:$0xf] }
  0x18   :  { %1829 = vmatpush.bf16.msra.mxu2 %v3785_v22  ;;  %v3620_v17 = vld [vmem:[%s5465_s0 + $0xe4] sm:$0xf0]  ;;  %v3616_v18 = vld [vmem:[%s5465_s0 + $0xcc] sm:$0xf]  ;;  %v2730_v20 = vor.u32 %v3619_v13, %v2729_v12  ;;  %v2734_v21 = vor.u32 %v3615_v14, %v2731_v15  ;;  %v2825_v52 = vld [vmem:[%s5465_s0 + $0x180] sm:$0xf] }
  0x19   :  { %1948 = vmatpush.bf16.msra.mxu3 %v3793_v23  ;;  %v2739_v19 = vld [vmem:[%s5465_s0 + $0xe8] sm:$0xf0]  ;;  %v2738_v22 = vor.u32 %v3620_v17, %v2737_v16  ;;  %v2769_v32 = vld [vmem:[%s5465_s0 + $0x108] sm:$0xf]  ;;  %v3643_v53 = vld [vmem:[%s5465_s0 + $0x19c] sm:$0xf0] }
  0x1a   :  { %1592 = vmatpush.bf16.msra.mxu0 %v3768_v24  ;;  %v2742_v23 = vor.u32 %v3616_v18, %v2739_v19  ;;  %v3820_v24 = vld [vmem:[%s5463_s1 + $0x1a8] sm:$0xff]  ;;  %v3639_v54 = vld [vmem:[%s5465_s0 + $0x184] sm:$0xf]  ;;  %v2857_v0 = vld [vmem:[%s5465_s0 + $0x1c0] sm:$0xf] }
  0x1b   :  { %1711 = vmatpush.bf16.msra.mxu1 %v3776_v25  ;;  %v3804_v25 = vld [vmem:[%s5463_s1 + $0x128] sm:$0xff]  ;;  %v2827_v55 = vld [vmem:[%s5465_s0 + $0x1a0] sm:$0xf0]  ;;  %v3651_v1 = vld [vmem:[%s5465_s0 + $0x1dc] sm:$0xf0] }
  0x1c   :  { %1830 = vmatpush.bf16.msra.mxu2 %v3784_v26  ;;  %v3828_v26 = vld [vmem:[%s5463_s1 + $0x1e8] sm:$0xff]  ;;  %v3819_v2 = vld [vmem:[%s5463_s1 + $0x1a0] sm:$0xff]  ;;  %v2858_v12 = vor.u32 %v3651_v1, %v2857_v0 }
  0x1d   :  { %1949 = vmatpush.bf16.msra.mxu3 %v3792_v27  ;;  %v3812_v27 = vld [vmem:[%s5463_s1 + $0x168] sm:$0xff]  ;;  %v3803_v3 = vld [vmem:[%s5463_s1 + $0x120] sm:$0xff] }
  0x1e   :  { %1593 = vmatpush.bf16.msra.mxu0 %v3767_v28  ;;  %v2761_v28 = vld [vmem:[%s5465_s0 + $0x100] sm:$0xf]  ;;  %v3628_v33 = vld [vmem:[%s5465_s0 + $0x124] sm:$0xf0]  ;;  %v3624_v34 = vld [vmem:[%s5465_s0 + $0x10c] sm:$0xf] }
  0x1f   :  { %1712 = vmatpush.bf16.msra.mxu1 %v3775_v29  ;;  %v3627_v29 = vld [vmem:[%s5465_s0 + $0x11c] sm:$0xf0]  ;;  %v2771_v35 = vld [vmem:[%s5465_s0 + $0x128] sm:$0xf0]  ;;  %v2770_v38 = vor.u32 %v3628_v33, %v2769_v32  ;;  %v2833_v56 = vld [vmem:[%s5465_s0 + $0x188] sm:$0xf] }
  0x20   :  { %1831 = vmatpush.bf16.msra.mxu2 %v3783_v30  ;;  %v3623_v30 = vld [vmem:[%s5465_s0 + $0x104] sm:$0xf]  ;;  %v2762_v36 = vor.u32 %v3627_v29, %v2761_v28  ;;  %v2774_v39 = vor.u32 %v3624_v34, %v2771_v35  ;;  %v3644_v57 = vld [vmem:[%s5465_s0 + $0x1a4] sm:$0xf0]  ;;  %v3640_v58 = vld [vmem:[%s5465_s0 + $0x18c] sm:$0xf] }
  0x21   :  { %1950 = vmatpush.bf16.msra.mxu3 %v3791_v31  ;;  %1594 = vmatmul.bf16.vlgmr.msra.gmra.mxu0 %v2634_v42  ;;  %v2763_v31 = vld [vmem:[%s5465_s0 + $0x120] sm:$0xf0]  ;;  %v4192_v16 = vld [vmem:[%s5464_s2] ss:$0 sm:$0xff] }
  0x22   :  { %2062 = vmatpush.bf16.msrb.mxu0 %v3806_v41  ;;  %1713 = vmatmul.bf16.vlgmr.msra.gmra.mxu1 %v2638_v43  ;;  %v2766_v37 = vor.u32 %v3623_v30, %v2763_v31  ;;  %v3635_v41 = vld [vmem:[%s5465_s0 + $0x15c] sm:$0xf0]  ;;  %v3631_v42 = vld [vmem:[%s5465_s0 + $0x144] sm:$0xf] }
  0x23   :  { %1832 = vmatmul.bf16.vlgmr.msra.gmra.mxu2 %v2642_v44  ;;  %2181 = vmatpush.bf16.msrb.mxu1 %v3814_v47  ;;  %v2795_v43 = vld [vmem:[%s5465_s0 + $0x160] sm:$0xf0]  ;;  %v2801_v44 = vld [vmem:[%s5465_s0 + $0x148] sm:$0xf]  ;;  %v2803_v47 = vld [vmem:[%s5465_s0 + $0x168] sm:$0xf0] }
  0x24   :  { %2300 = vmatpush.bf16.msrb.mxu2 %v3822_v40  ;;  %1951 = vmatmul.bf16.vlgmr.msra.gmra.mxu3 %v2646_v45  ;;  %v2793_v40 = vld [vmem:[%s5465_s0 + $0x140] sm:$0xf]  ;;  %v3636_v45 = vld [vmem:[%s5465_s0 + $0x164] sm:$0xf0]  ;;  %v3647_v6 = vld [vmem:[%s5465_s0 + $0x1c4] sm:$0xf] }
  0x25   :  { %2419 = vmatpush.bf16.msrb.mxu3 %v3830_v46  ;;  %v3632_v46 = vld [vmem:[%s5465_s0 + $0x14c] sm:$0xf]  ;;  %v3827_v4 = vld [vmem:[%s5463_s1 + $0x1e0] sm:$0xff] }
  0x26   :  { %2063 = vmatpush.bf16.msrb.mxu0 %v3805_v49  ;;  %v2798_v49 = vor.u32 %v3631_v42, %v2795_v43  ;;  %v2806_v51 = vor.u32 %v3632_v46, %v2803_v47  ;;  %v3811_v5 = vld [vmem:[%s5463_s1 + $0x160] sm:$0xff]  ;;  %v3668_v46 = vld [vmem:[%s5465_s0 + $0x264] sm:$0xf0]  ;;  %v3664_v47 = vld [vmem:[%s5465_s0 + $0x24c] sm:$0xf] }
  0x27   :  { %2182 = vmatpush.bf16.msrb.mxu1 %v3813_v63  ;;  %v2859_v7 = vld [vmem:[%s5465_s0 + $0x1e0] sm:$0xf0]  ;;  %v2889_v17 = vld [vmem:[%s5465_s0 + $0x200] sm:$0xf] }
  0x28   :  { %2301 = vmatpush.bf16.msrb.mxu2 %v3821_v48  ;;  %v2794_v48 = vor.u32 %v3635_v41, %v2793_v40  ;;  %v2862_v13 = vor.u32 %v3647_v6, %v2859_v7  ;;  %v3659_v18 = vld [vmem:[%s5465_s0 + $0x21c] sm:$0xf0]  ;;  %v3655_v19 = vld [vmem:[%s5465_s0 + $0x204] sm:$0xf]  ;;  %v3810_v7 = vld [vmem:[%s5463_s1 + $0x158] sm:$0xff] }
  0x29   :  { %2420 = vmatpush.bf16.msrb.mxu3 %v3829_v50  ;;  %v2802_v50 = vor.u32 %v3636_v45, %v2801_v44  ;;  %v2921_v41 = vld [vmem:[%s5465_s0 + $0x240] sm:$0xf]  ;;  %v3663_v43 = vld [vmem:[%s5465_s0 + $0x244] sm:$0xf]  ;;  %v2929_v45 = vld [vmem:[%s5465_s0 + $0x248] sm:$0xf] }
  0x2a   :  { %2064 = vmatpush.bf16.msrb.mxu0 %v3804_v25  ;;  %v2890_v25 = vor.u32 %v3659_v18, %v2889_v17  ;;  %v3667_v42 = vld [vmem:[%s5465_s0 + $0x25c] sm:$0xf0]  ;;  %v2923_v44 = vld [vmem:[%s5465_s0 + $0x260] sm:$0xf0]  ;;  %v2963_v17 = vld [vmem:[%s5465_s0 + $0x2a8] sm:$0xf0] }
  0x2b   :  { %2183 = vmatpush.bf16.msrb.mxu1 %v3812_v27 }
  0x2c   :  { %2302 = vmatpush.bf16.msrb.mxu2 %v3820_v24  ;;  %v2899_v24 = vld [vmem:[%s5465_s0 + $0x228] sm:$0xf0] }
  0x2d   :  { %2421 = vmatpush.bf16.msrb.mxu3 %v3828_v26 }
  0x2e   :  { %2065 = vmatpush.bf16.msrb.mxu0 %v3803_v3 }
  0x2f   :  { %2184 = vmatpush.bf16.msrb.mxu1 %v3811_v5 }
  0x30   :  { %2303 = vmatpush.bf16.msrb.mxu2 %v3819_v2 }
  0x31   :  { %1599 = vmatmul.bf16.gmra.mxu0 %v2666_v59  ;;  %v2835_v59 = vld [vmem:[%s5465_s0 + $0x1a8] sm:$0xf0]  ;;  %2422 = vmatpush.bf16.msrb.mxu3 %v3827_v4 }
  0x32   :  { %1718 = vmatmul.bf16.gmra.mxu1 %v2670_v60  ;;  %v2826_v60 = vor.u32 %v3643_v53, %v2825_v52  ;;  %v2838_v63 = vor.u32 %v3640_v58, %v2835_v59  ;;  %v2926_v52 = vor.u32 %v3663_v43, %v2923_v44  ;;  %v2993_v43 = vld [vmem:[%s5465_s0 + $0x2c8] sm:$0xf] }
  0x33   :  { %1837 = vmatmul.bf16.gmra.mxu2 %v2674_v61  ;;  %v2830_v61 = vor.u32 %v3639_v54, %v2827_v55  ;;  %2185 = vmatpush.bf16.msrb.mxu1 %v3810_v7  ;;  %v3684_v44 = vld [vmem:[%s5465_s0 + $0x2e4] sm:$0xf0]  ;;  %v3687_v7 = vld [vmem:[%s5465_s0 + $0x304] sm:$0xf] }
  0x34   :  { %1956 = vmatmul.bf16.gmra.mxu3 %v2678_v62  ;;  %v2834_v62 = vor.u32 %v3644_v57, %v2833_v56  ;;  %v2930_v56 = vor.u32 %v3668_v46, %v2929_v45  ;;  %v3680_v45 = vld [vmem:[%s5465_s0 + $0x2cc] sm:$0xf] }
  0x35   :  { %v2995_v46 = vld [vmem:[%s5465_s0 + $0x2e8] sm:$0xf0] }
  0x41   :  { %1604 = vmatmul.bf16.gmra.mxu0 %v2698_v8  ;;  %v2865_v8 = vld [vmem:[%s5465_s0 + $0x1c8] sm:$0xf] }
  0x42   :  { %1723 = vmatmul.bf16.gmra.mxu1 %v2702_v9  ;;  %v3652_v9 = vld [vmem:[%s5465_s0 + $0x1e4] sm:$0xf0] }
  0x43   :  { %1842 = vmatmul.bf16.gmra.mxu2 %v2706_v10  ;;  %v3648_v10 = vld [vmem:[%s5465_s0 + $0x1cc] sm:$0xf]  ;;  %v2866_v14 = vor.u32 %v3652_v9, %v2865_v8  ;;  %v2953_v9 = vld [vmem:[%s5465_s0 + $0x280] sm:$0xf] }
  0x44   :  { %1961 = vmatmul.bf16.gmra.mxu3 %v2710_v11  ;;  %v2867_v11 = vld [vmem:[%s5465_s0 + $0x1e8] sm:$0xf0] }
  0x45   :  { %v2870_v15 = vor.u32 %v3648_v10, %v2867_v11  ;;  %v3675_v10 = vld [vmem:[%s5465_s0 + $0x29c] sm:$0xf0]  ;;  %v3671_v11 = vld [vmem:[%s5465_s0 + $0x284] sm:$0xf] }
  0x51   :  { %1609 = vmatmul.bf16.gmra.mxu0 %v2730_v20  ;;  %v2891_v20 = vld [vmem:[%s5465_s0 + $0x220] sm:$0xf0] }
  0x52   :  { %1728 = vmatmul.bf16.gmra.mxu1 %v2734_v21  ;;  %v2897_v21 = vld [vmem:[%s5465_s0 + $0x208] sm:$0xf]  ;;  %v2894_v26 = vor.u32 %v3655_v19, %v2891_v20  ;;  %v2954_v20 = vor.u32 %v3675_v10, %v2953_v9 }
  0x53   :  { %1847 = vmatmul.bf16.gmra.mxu2 %v2738_v22  ;;  %v3660_v22 = vld [vmem:[%s5465_s0 + $0x224] sm:$0xf0] }
  0x54   :  { %1966 = vmatmul.bf16.gmra.mxu3 %v2742_v23  ;;  %v3656_v23 = vld [vmem:[%s5465_s0 + $0x20c] sm:$0xf]  ;;  %v2898_v29 = vor.u32 %v3660_v22, %v2897_v21  ;;  %v3025_v9 = vld [vmem:[%s5465_s0 + $0x308] sm:$0xf] }
  0x55   :  { %v2902_v30 = vor.u32 %v3656_v23, %v2899_v24  ;;  %v3692_v10 = vld [vmem:[%s5465_s0 + $0x324] sm:$0xf0] }
  0x61   :  { %1614 = vmatmul.bf16.gmra.mxu0 %v2762_v36 }
  0x62   :  { %1733 = vmatmul.bf16.gmra.mxu1 %v2766_v37 }
  0x63   :  { %1852 = vmatmul.bf16.gmra.mxu2 %v2770_v38 }
  0x64   :  { %1971 = vmatmul.bf16.gmra.mxu3 %v2774_v39 }
  0x71   :  { %1619 = vmatmul.bf16.gmra.mxu0 %v2794_v48  ;;  %v2931_v48 = vld [vmem:[%s5465_s0 + $0x268] sm:$0xf0] }
  0x72   :  { %1738 = vmatmul.bf16.gmra.mxu1 %v2798_v49  ;;  %v2934_v57 = vor.u32 %v3664_v47, %v2931_v48 }
  0x73   :  { %1857 = vmatmul.bf16.gmra.mxu2 %v2802_v50 }
  0x74   :  { %1976 = vmatmul.bf16.gmra.mxu3 %v2806_v51  ;;  %v2922_v51 = vor.u32 %v3667_v42, %v2921_v41  ;;  %v3679_v41 = vld [vmem:[%s5465_s0 + $0x2c4] sm:$0xf] }
  0x75   :  { %v2987_v42 = vld [vmem:[%s5465_s0 + $0x2e0] sm:$0xf0] }
  0x81   :  { %1624 = vmatmul.bf16.gmra.mxu0 %v2826_v60 }
  0x82   :  { %1743 = vmatmul.bf16.gmra.mxu1 %v2830_v61  ;;  %v3818_v61 = vld [vmem:[%s5463_s1 + $0x198] sm:$0xff] }
  0x83   :  { %1862 = vmatmul.bf16.gmra.mxu2 %v2834_v62  ;;  %v3802_v62 = vld [vmem:[%s5463_s1 + $0x118] sm:$0xff] }
  0x84   :  { %1981 = vmatmul.bf16.gmra.mxu3 %v2838_v63  ;;  %v3826_v63 = vld [vmem:[%s5463_s1 + $0x1d8] sm:$0xff]  ;;  %2304 = vmatpush.bf16.msrb.mxu2 %v3818_v61 }
  0x85   :  { %2066 = vmatpush.bf16.msrb.mxu0 %v3802_v62  ;;  %2423 = vmatpush.bf16.msrb.mxu3 %v3826_v63 }
  0x91   :  { %1629 = vmatmul.bf16.gmra.mxu0 %v2858_v12  ;;  %v2955_v12 = vld [vmem:[%s5465_s0 + $0x2a0] sm:$0xf0] }
  0x92   :  { %1748 = vmatmul.bf16.gmra.mxu1 %v2862_v13  ;;  %v2961_v13 = vld [vmem:[%s5465_s0 + $0x288] sm:$0xf]  ;;  %v2958_v21 = vor.u32 %v3671_v11, %v2955_v12  ;;  %v3688_v11 = vld [vmem:[%s5465_s0 + $0x30c] sm:$0xf] }
  0x93   :  { %1867 = vmatmul.bf16.gmra.mxu2 %v2866_v14  ;;  %v3676_v14 = vld [vmem:[%s5465_s0 + $0x2a4] sm:$0xf0]  ;;  %v3027_v12 = vld [vmem:[%s5465_s0 + $0x328] sm:$0xf0] }
  0x94   :  { %1986 = vmatmul.bf16.gmra.mxu3 %v2870_v15  ;;  %v3672_v15 = vld [vmem:[%s5465_s0 + $0x28c] sm:$0xf] }
  0x9e   :  { %v1595_v27 = vpop.f32.mrf.mxu0 }
  0x9f   :  { %v1714_v28 = vpop.f32.mrf.mxu1  ;;  %v1596_v31 = vadd.f32 %v4192_v16, %v1595_v27 }
  0xa1   :  { %v1715_v32 = vadd.f32 %v1714_v28, %v1596_v31  ;;  %1634 = vmatmul.bf16.gmra.mxu0 %v2890_v25  ;;  %v2962_v25 = vor.u32 %v3676_v14, %v2961_v13 }
  0xa2   :  { %1753 = vmatmul.bf16.gmra.mxu1 %v2894_v26  ;;  %v2966_v26 = vor.u32 %v3672_v15, %v2963_v17 }
  0xa3   :  { %1872 = vmatmul.bf16.gmra.mxu2 %v2898_v29 }
  0xa4   :  { %1991 = vmatmul.bf16.gmra.mxu3 %v2902_v30 }
  0xa6   :  { %v1833_v33 = vpop.f32.mrf.mxu2  ;;  %v1597_v36 = vpop.f32.mrf.mxu0 }
  0xa7   :  { %v1952_v34 = vpop.f32.mrf.mxu3  ;;  %v1834_v35 = vadd.f32 %v1833_v33, %v1715_v32  ;;  %v1716_v37 = vpop.f32.mrf.mxu1  ;;  %v1598_v38 = vadd.f32 %v4192_v16, %v1597_v36 }
  0xa9   :  { %v4220_v39 = vadd.f32 %v1952_v34, %v1834_v35  ;;  %v1717_v40 = vadd.f32 %v1716_v37, %v1598_v38  ;;  %v2985_v38 = vld [vmem:[%s5465_s0 + $0x2c0] sm:$0xf] }
  0xae   :  { %v1835_v49 = vpop.f32.mrf.mxu2  ;;  %v1600_v54 = vpop.f32.mrf.mxu0 }
  0xaf   :  { %v1954_v50 = vpop.f32.mrf.mxu3  ;;  %v1836_v53 = vadd.f32 %v1835_v49, %v1717_v40  ;;  %v1719_v55 = vpop.f32.mrf.mxu1  ;;  %v1601_v58 = vadd.f32 %v4192_v16, %v1600_v54  ;;  %v3683_v40 = vld [vmem:[%s5465_s0 + $0x2dc] sm:$0xf0]  ;;  %v2994_v54 = vor.u32 %v3684_v44, %v2993_v43  ;;  %v3695_v43 = vld [vmem:[%s5465_s0 + $0x344] sm:$0xf] }
  0xb0   :  { %v2986_v49 = vor.u32 %v3683_v40, %v2985_v38  ;;  %v3051_v44 = vld [vmem:[%s5465_s0 + $0x360] sm:$0xf0] }
  0xb1   :  { %v4247_v59 = vadd.f32 %v1954_v50, %v1836_v53  ;;  %v1720_v60 = vadd.f32 %v1719_v55, %v1601_v58  ;;  %1639 = vmatmul.bf16.gmra.mxu0 %v2922_v51  ;;  %v2990_v50 = vor.u32 %v3679_v41, %v2987_v42  ;;  %v2998_v55 = vor.u32 %v3680_v45, %v2995_v46  ;;  %v3049_v41 = vld [vmem:[%s5465_s0 + $0x340] sm:$0xf]  ;;  %v3057_v45 = vld [vmem:[%s5465_s0 + $0x348] sm:$0xf] }
  0xb2   :  { %1758 = vmatmul.bf16.gmra.mxu1 %v2926_v52  ;;  %v3699_v42 = vld [vmem:[%s5465_s0 + $0x35c] sm:$0xf0]  ;;  %v3700_v46 = vld [vmem:[%s5465_s0 + $0x364] sm:$0xf0] }
  0xb3   :  { %1877 = vmatmul.bf16.gmra.mxu2 %v2930_v56 }
  0xb4   :  { %1996 = vmatmul.bf16.gmra.mxu3 %v2934_v57 }
  0xb6   :  { %v1838_v0 = vpop.f32.mrf.mxu2  ;;  %v1602_v3 = vpop.f32.mrf.mxu0 }
  0xb7   :  { %v1957_v1 = vpop.f32.mrf.mxu3  ;;  %v1839_v2 = vadd.f32 %v1838_v0, %v1720_v60  ;;  %v1721_v4 = vpop.f32.mrf.mxu1  ;;  %v1603_v5 = vadd.f32 %v4192_v16, %v1602_v3 }
  0xb9   :  { %v4259_v6 = vadd.f32 %v1957_v1, %v1839_v2  ;;  %v1722_v8 = vadd.f32 %v1721_v4, %v1603_v5  ;;  %v3017_v4 = vld [vmem:[%s5465_s0 + $0x300] sm:$0xf] }
  0xba   :  { %v3691_v5 = vld [vmem:[%s5465_s0 + $0x31c] sm:$0xf0] }
  0xbb   :  { %v3018_v15 = vor.u32 %v3691_v5, %v3017_v4 }
  0xbe   :  { %v1840_v18 = vpop.f32.mrf.mxu2  ;;  %v1605_v23 = vpop.f32.mrf.mxu0 }
  0xbf   :  { %v1959_v19 = vpop.f32.mrf.mxu3  ;;  %v1841_v22 = vadd.f32 %v1840_v18, %v1722_v8  ;;  %v1724_v24 = vpop.f32.mrf.mxu1  ;;  %v1606_v27 = vadd.f32 %v4192_v16, %v1605_v23  ;;  %v3019_v8 = vld [vmem:[%s5465_s0 + $0x320] sm:$0xf0] }
  0xc0   :  { %v3022_v17 = vor.u32 %v3687_v7, %v3019_v8 }
  0xc1   :  { %v4289_v28 = vadd.f32 %v1959_v19, %v1841_v22  ;;  %v1725_v29 = vadd.f32 %v1724_v24, %v1606_v27  ;;  %1644 = vmatmul.bf16.gmra.mxu0 %v2954_v20  ;;  %v3030_v22 = vor.u32 %v3688_v11, %v3027_v12  ;;  %v3801_v27 = vld [vmem:[%s5463_s1 + $0x110] sm:$0xff]  ;;  %v3703_v11 = vld [vmem:[%s5465_s0 + $0x384] sm:$0xf] }
  0xc2   :  { %1763 = vmatmul.bf16.gmra.mxu1 %v2958_v21  ;;  %v3026_v21 = vor.u32 %v3692_v10, %v3025_v9  ;;  %2067 = vmatpush.bf16.msrb.mxu0 %v3801_v27  ;;  %v3081_v9 = vld [vmem:[%s5465_s0 + $0x380] sm:$0xf]  ;;  %v3083_v12 = vld [vmem:[%s5465_s0 + $0x3a0] sm:$0xf0] }
  0xc3   :  { %1882 = vmatmul.bf16.gmra.mxu2 %v2962_v25  ;;  %v3817_v25 = vld [vmem:[%s5463_s1 + $0x190] sm:$0xff]  ;;  %v3707_v10 = vld [vmem:[%s5465_s0 + $0x39c] sm:$0xf0] }
  0xc4   :  { %2001 = vmatmul.bf16.gmra.mxu3 %v2966_v26  ;;  %2305 = vmatpush.bf16.msrb.mxu2 %v3817_v25 }
  0xc6   :  { %v1843_v30 = vpop.f32.mrf.mxu2  ;;  %v1607_v33 = vpop.f32.mrf.mxu0 }
  0xc7   :  { %v1962_v31 = vpop.f32.mrf.mxu3  ;;  %v1844_v32 = vadd.f32 %v1843_v30, %v1725_v29  ;;  %v1726_v34 = vpop.f32.mrf.mxu1  ;;  %v1608_v35 = vadd.f32 %v4192_v16, %v1607_v33  ;;  %v3825_v29 = vld [vmem:[%s5463_s1 + $0x1d0] sm:$0xff] }
  0xc8   :  { %v3809_v30 = vld [vmem:[%s5463_s1 + $0x150] sm:$0xff]  ;;  %2424 = vmatpush.bf16.msrb.mxu3 %v3825_v29 }
  0xc9   :  { %v4292_v36 = vadd.f32 %v1962_v31, %v1844_v32  ;;  %v1727_v37 = vadd.f32 %v1726_v34, %v1608_v35  ;;  %2186 = vmatpush.bf16.msrb.mxu1 %v3809_v30 }
  0xce   :  { %v1845_v47 = vpop.f32.mrf.mxu2  ;;  %v1610_v52 = vpop.f32.mrf.mxu0 }
  0xcf   :  { %v1964_v48 = vpop.f32.mrf.mxu3  ;;  %v1846_v51 = vadd.f32 %v1845_v47, %v1727_v37  ;;  %v1729_v53 = vpop.f32.mrf.mxu1  ;;  %v1611_v56 = vadd.f32 %v4192_v16, %v1610_v52  ;;  %v3696_v47 = vld [vmem:[%s5465_s0 + $0x34c] sm:$0xf]  ;;  %v3054_v52 = vor.u32 %v3695_v43, %v3051_v44  ;;  %v3715_v43 = vld [vmem:[%s5465_s0 + $0x3dc] sm:$0xf0] }
  0xd1   :  { %v4319_v57 = vadd.f32 %v1964_v48, %v1846_v51  ;;  %v1730_v58 = vadd.f32 %v1729_v53, %v1611_v56  ;;  %1649 = vmatmul.bf16.gmra.mxu0 %v2986_v49  ;;  %v3059_v48 = vld [vmem:[%s5465_s0 + $0x368] sm:$0xf0]  ;;  %v3050_v51 = vor.u32 %v3699_v42, %v3049_v41  ;;  %v3058_v56 = vor.u32 %v3700_v46, %v3057_v45  ;;  %v3113_v42 = vld [vmem:[%s5465_s0 + $0x3c0] sm:$0xf] }
  0xd2   :  { %1768 = vmatmul.bf16.gmra.mxu1 %v2990_v50  ;;  %v3816_v45 = vld [vmem:[%s5463_s1 + $0x188] sm:$0xff] }
  0xd3   :  { %1887 = vmatmul.bf16.gmra.mxu2 %v2994_v54  ;;  %v3800_v46 = vld [vmem:[%s5463_s1 + $0x108] sm:$0xff] }
  0xd4   :  { %2006 = vmatmul.bf16.gmra.mxu3 %v2998_v55  ;;  %2306 = vmatpush.bf16.msrb.mxu2 %v3816_v45 }
  0xd5   :  { %2068 = vmatpush.bf16.msrb.mxu0 %v3800_v46 }
  0xd6   :  { %v1848_v60 = vpop.f32.mrf.mxu2  ;;  %v1612_v63 = vpop.f32.mrf.mxu0 }
  0xd7   :  { %v1967_v61 = vpop.f32.mrf.mxu3  ;;  %v1849_v62 = vadd.f32 %v1848_v60, %v1730_v58  ;;  %v1731_v0 = vpop.f32.mrf.mxu1  ;;  %v1613_v1 = vadd.f32 %v4192_v16, %v1612_v63  ;;  %v3062_v58 = vor.u32 %v3696_v47, %v3059_v48  ;;  %v3824_v47 = vld [vmem:[%s5463_s1 + $0x1c8] sm:$0xff]  ;;  %v3711_v48 = vld [vmem:[%s5465_s0 + $0x3c4] sm:$0xf] }
  0xd8   :  { %2425 = vmatpush.bf16.msrb.mxu3 %v3824_v47 }
  0xd9   :  { %v4322_v2 = vadd.f32 %v1967_v61, %v1849_v62  ;;  %v1732_v3 = vadd.f32 %v1731_v0, %v1613_v1 }
  0xde   :  { %v1850_v13 = vpop.f32.mrf.mxu2  ;;  %v1615_v19 = vpop.f32.mrf.mxu0 }
  0xdf   :  { %v1969_v14 = vpop.f32.mrf.mxu3  ;;  %v1851_v18 = vadd.f32 %v1850_v13, %v1732_v3  ;;  %v1734_v20 = vpop.f32.mrf.mxu1  ;;  %v1616_v23 = vadd.f32 %v4192_v16, %v1615_v19  ;;  %v3089_v13 = vld [vmem:[%s5465_s0 + $0x388] sm:$0xf] }
  0xe1   :  { %v4349_v24 = vadd.f32 %v1969_v14, %v1851_v18  ;;  %v1735_v26 = vadd.f32 %v1734_v20, %v1616_v23  ;;  %1654 = vmatmul.bf16.gmra.mxu0 %v3018_v15  ;;  %v3708_v14 = vld [vmem:[%s5465_s0 + $0x3a4] sm:$0xf0]  ;;  %v3704_v15 = vld [vmem:[%s5465_s0 + $0x38c] sm:$0xf]  ;;  %v3082_v20 = vor.u32 %v3707_v10, %v3081_v9 }
  0xe2   :  { %1773 = vmatmul.bf16.gmra.mxu1 %v3022_v17  ;;  %v3091_v17 = vld [vmem:[%s5465_s0 + $0x3a8] sm:$0xf0] }
  0xe3   :  { %1892 = vmatmul.bf16.gmra.mxu2 %v3026_v21  ;;  %v3086_v21 = vor.u32 %v3703_v11, %v3083_v12  ;;  %v3094_v27 = vor.u32 %v3704_v15, %v3091_v17 }
  0xe4   :  { %2011 = vmatmul.bf16.gmra.mxu3 %v3030_v22 }
  0xe6   :  { %v1853_v31 = vpop.f32.mrf.mxu2  ;;  %v1617_v34 = vpop.f32.mrf.mxu0 }
  0xe7   :  { %v1972_v32 = vpop.f32.mrf.mxu3  ;;  %v1854_v33 = vadd.f32 %v1853_v31, %v1735_v26  ;;  %v1736_v35 = vpop.f32.mrf.mxu1  ;;  %v1618_v37 = vadd.f32 %v4192_v16, %v1617_v34  ;;  %v3090_v26 = vor.u32 %v3708_v14, %v3089_v13 }
  0xe9   :  { %v4364_v38 = vadd.f32 %v1972_v32, %v1854_v33  ;;  %v1737_v40 = vadd.f32 %v1736_v35, %v1618_v37 }
  0xee   :  { %v1855_v49 = vpop.f32.mrf.mxu2  ;;  %v1620_v54 = vpop.f32.mrf.mxu0 }
  0xef   :  { %v1974_v50 = vpop.f32.mrf.mxu3  ;;  %v1856_v53 = vadd.f32 %v1855_v49, %v1737_v40  ;;  %v1739_v55 = vpop.f32.mrf.mxu1  ;;  %v1621_v60 = vadd.f32 %v4192_v16, %v1620_v54  ;;  %v3115_v49 = vld [vmem:[%s5465_s0 + $0x3e0] sm:$0xf0] }
  0xf1   :  { %v4391_v61 = vadd.f32 %v1974_v50, %v1856_v53  ;;  %v1740_v62 = vadd.f32 %v1739_v55, %v1621_v60  ;;  %1659 = vmatmul.bf16.gmra.mxu0 %v3050_v51  ;;  %v3121_v50 = vld [vmem:[%s5465_s0 + $0x3c8] sm:$0xf]  ;;  %v3123_v53 = vld [vmem:[%s5465_s0 + $0x3e8] sm:$0xf0] }
  0xf2   :  { %1778 = vmatmul.bf16.gmra.mxu1 %v3054_v52  ;;  %v3716_v51 = vld [vmem:[%s5465_s0 + $0x3e4] sm:$0xf0]  ;;  %v3712_v52 = vld [vmem:[%s5465_s0 + $0x3cc] sm:$0xf] }
  0xf3   :  { %1897 = vmatmul.bf16.gmra.mxu2 %v3058_v56  ;;  %v3114_v56 = vor.u32 %v3715_v43, %v3113_v42 }
  0xf4   :  { %2016 = vmatmul.bf16.gmra.mxu3 %v3062_v58  ;;  %v3118_v58 = vor.u32 %v3711_v48, %v3115_v49 }
  0xf6   :  { %v1858_v63 = vpop.f32.mrf.mxu2  ;;  %v1622_v3 = vpop.f32.mrf.mxu0 }
  0xf7   :  { %v1977_v0 = vpop.f32.mrf.mxu3  ;;  %v1859_v1 = vadd.f32 %v1858_v63, %v1740_v62  ;;  %v1741_v4 = vpop.f32.mrf.mxu1  ;;  %v1623_v5 = vadd.f32 %v4192_v16, %v1622_v3 }
  0xf9   :  { %v4394_v7 = vadd.f32 %v1977_v0, %v1859_v1  ;;  %v1742_v8 = vadd.f32 %v1741_v4, %v1623_v5  ;;  %v3122_v0 = vor.u32 %v3716_v51, %v3121_v50  ;;  %v3126_v1 = vor.u32 %v3712_v52, %v3123_v53  ;;  %v3808_v5 = vld [vmem:[%s5463_s1 + $0x148] sm:$0xff]  ;;  %v3177_v53 = vld [vmem:[%s5465_s0 + $0x440] sm:$0xf] }
  0xfa   :  { %2187 = vmatpush.bf16.msrb.mxu1 %v3808_v5 }
  0xfe   :  { %v1860_v18 = vpop.f32.mrf.mxu2  ;;  %v1625_v23 = vpop.f32.mrf.mxu0 }
  0xff   :  { %v1979_v19 = vpop.f32.mrf.mxu3  ;;  %v1861_v22 = vadd.f32 %v1860_v18, %v1742_v8  ;;  %v1744_v25 = vpop.f32.mrf.mxu1  ;;  %v1626_v29 = vadd.f32 %v4192_v16, %v1625_v23  ;;  %v3145_v18 = vld [vmem:[%s5465_s0 + $0x400] sm:$0xf]  ;;  %v3724_v23 = vld [vmem:[%s5465_s0 + $0x424] sm:$0xf0] }
 0x101   :  { %v4421_v30 = vadd.f32 %v1979_v19, %v1861_v22  ;;  %v1745_v31 = vadd.f32 %v1744_v25, %v1626_v29  ;;  %1664 = vmatmul.bf16.gmra.mxu0 %v3082_v20  ;;  %v3723_v19 = vld [vmem:[%s5465_s0 + $0x41c] sm:$0xf0]  ;;  %v3719_v20 = vld [vmem:[%s5465_s0 + $0x404] sm:$0xf]  ;;  %v3153_v22 = vld [vmem:[%s5465_s0 + $0x408] sm:$0xf] }
 0x102   :  { %1783 = vmatmul.bf16.gmra.mxu1 %v3086_v21  ;;  %v3147_v21 = vld [vmem:[%s5465_s0 + $0x420] sm:$0xf0]  ;;  %v3720_v25 = vld [vmem:[%s5465_s0 + $0x40c] sm:$0xf] }
 0x103   :  { %1902 = vmatmul.bf16.gmra.mxu2 %v3090_v26  ;;  %v3155_v26 = vld [vmem:[%s5465_s0 + $0x428] sm:$0xf0] }
 0x104   :  { %2021 = vmatmul.bf16.gmra.mxu3 %v3094_v27 }
 0x106   :  { %v1863_v32 = vpop.f32.mrf.mxu2  ;;  %v1627_v35 = vpop.f32.mrf.mxu0 }
 0x107   :  { %v1982_v33 = vpop.f32.mrf.mxu3  ;;  %v1864_v34 = vadd.f32 %v1863_v32, %v1745_v31  ;;  %v1746_v37 = vpop.f32.mrf.mxu1  ;;  %v1628_v40 = vadd.f32 %v4192_v16, %v1627_v35  ;;  %v3146_v31 = vor.u32 %v3723_v19, %v3145_v18  ;;  %v3150_v32 = vor.u32 %v3719_v20, %v3147_v21 }
 0x109   :  { %v4424_v41 = vadd.f32 %v1982_v33, %v1864_v34  ;;  %v1747_v44 = vadd.f32 %v1746_v37, %v1628_v40  ;;  %v3154_v37 = vor.u32 %v3724_v23, %v3153_v22  ;;  %v3158_v40 = vor.u32 %v3720_v25, %v3155_v26  ;;  %v3209_v26 = vld [vmem:[%s5465_s0 + $0x480] sm:$0xf] }
 0x10e   :  { %v1865_v54 = vpop.f32.mrf.mxu2  ;;  %v1630_v62 = vpop.f32.mrf.mxu0 }
 0x10f   :  { %v1984_v55 = vpop.f32.mrf.mxu3  ;;  %v1866_v60 = vadd.f32 %v1865_v54, %v1747_v44  ;;  %v1749_v63 = vpop.f32.mrf.mxu1  ;;  %v1631_v3 = vadd.f32 %v4192_v16, %v1630_v62  ;;  %v3731_v54 = vld [vmem:[%s5465_s0 + $0x45c] sm:$0xf0]  ;;  %v3728_v62 = vld [vmem:[%s5465_s0 + $0x44c] sm:$0xf] }
 0x111   :  { %v4460_v4 = vadd.f32 %v1984_v55, %v1866_v60  ;;  %v1750_v8 = vadd.f32 %v1749_v63, %v1631_v3  ;;  %1669 = vmatmul.bf16.gmra.mxu0 %v3114_v56  ;;  %v3727_v55 = vld [vmem:[%s5465_s0 + $0x444] sm:$0xf]  ;;  %v3732_v60 = vld [vmem:[%s5465_s0 + $0x464] sm:$0xf0]  ;;  %v3187_v63 = vld [vmem:[%s5465_s0 + $0x468] sm:$0xf0]  ;;  %v3178_v3 = vor.u32 %v3731_v54, %v3177_v53 }
 0x112   :  { %1788 = vmatmul.bf16.gmra.mxu1 %v3118_v58  ;;  %v3179_v56 = vld [vmem:[%s5465_s0 + $0x460] sm:$0xf0]  ;;  %v3185_v58 = vld [vmem:[%s5465_s0 + $0x448] sm:$0xf] }
 0x113   :  { %1907 = vmatmul.bf16.gmra.mxu2 %v3122_v0  ;;  %v3182_v5 = vor.u32 %v3727_v55, %v3179_v56 }
 0x114   :  { %2026 = vmatmul.bf16.gmra.mxu3 %v3126_v1 }
 0x116   :  { %v1868_v9 = vpop.f32.mrf.mxu2  ;;  %v1632_v12 = vpop.f32.mrf.mxu0 }
 0x117   :  { %v1987_v10 = vpop.f32.mrf.mxu3  ;;  %v1869_v11 = vadd.f32 %v1868_v9, %v1750_v8  ;;  %v1751_v13 = vpop.f32.mrf.mxu1  ;;  %v1633_v14 = vadd.f32 %v4192_v16, %v1632_v12  ;;  %v3190_v12 = vor.u32 %v3728_v62, %v3187_v63 }
 0x119   :  { %v4466_v15 = vadd.f32 %v1987_v10, %v1869_v11  ;;  %v1752_v17 = vadd.f32 %v1751_v13, %v1633_v14  ;;  %v3186_v11 = vor.u32 %v3732_v60, %v3185_v58 }
 0x11e   :  { %v1870_v27 = vpop.f32.mrf.mxu2  ;;  %v1635_v34 = vpop.f32.mrf.mxu0 }
 0x11f   :  { %v1989_v29 = vpop.f32.mrf.mxu3  ;;  %v1871_v33 = vadd.f32 %v1870_v27, %v1752_v17  ;;  %v1754_v35 = vpop.f32.mrf.mxu1  ;;  %v1636_v42 = vadd.f32 %v4192_v16, %v1635_v34  ;;  %v3739_v27 = vld [vmem:[%s5465_s0 + $0x49c] sm:$0xf0] }
 0x120   :  { %v3807_v34 = vld [vmem:[%s5463_s1 + $0x140] sm:$0xff] }
 0x121   :  { %v4493_v43 = vadd.f32 %v1989_v29, %v1871_v33  ;;  %v1755_v44 = vadd.f32 %v1754_v35, %v1636_v42  ;;  %1674 = vmatmul.bf16.gmra.mxu0 %v3146_v31  ;;  %v3815_v29 = vld [vmem:[%s5463_s1 + $0x180] sm:$0xff]  ;;  %v3740_v42 = vld [vmem:[%s5465_s0 + $0x4a4] sm:$0xf0]  ;;  %2188 = vmatpush.bf16.msrb.mxu1 %v3807_v34 }
 0x122   :  { %1793 = vmatmul.bf16.gmra.mxu1 %v3150_v32  ;;  %v3799_v32 = vld [vmem:[%s5463_s1 + $0x100] sm:$0xff]  ;;  %2307 = vmatpush.bf16.msrb.mxu2 %v3815_v29 }
 0x123   :  { %1912 = vmatmul.bf16.gmra.mxu2 %v3154_v37  ;;  %v3823_v33 = vld [vmem:[%s5463_s1 + $0x1c0] sm:$0xff]  ;;  %2069 = vmatpush.bf16.msrb.mxu0 %v3799_v32 }
 0x124   :  { %2031 = vmatmul.bf16.gmra.mxu3 %v3158_v40  ;;  %v3735_v35 = vld [vmem:[%s5465_s0 + $0x484] sm:$0xf]  ;;  %v3217_v40 = vld [vmem:[%s5465_s0 + $0x488] sm:$0xf] }
 0x125   :  { %v3211_v37 = vld [vmem:[%s5465_s0 + $0x4a0] sm:$0xf0]  ;;  %2426 = vmatpush.bf16.msrb.mxu3 %v3823_v33  ;;  %v3218_v54 = vor.u32 %v3740_v42, %v3217_v40 }
 0x126   :  { %v1873_v45 = vpop.f32.mrf.mxu2  ;;  %v1637_v48 = vpop.f32.mrf.mxu0 }
 0x127   :  { %v1992_v46 = vpop.f32.mrf.mxu3  ;;  %v1874_v47 = vadd.f32 %v1873_v45, %v1755_v44  ;;  %v1756_v49 = vpop.f32.mrf.mxu1  ;;  %v1638_v50 = vadd.f32 %v4192_v16, %v1637_v48  ;;  %v3736_v44 = vld [vmem:[%s5465_s0 + $0x48c] sm:$0xf]  ;;  %v3210_v48 = vor.u32 %v3739_v27, %v3209_v26 }
 0x128   :  { %v3219_v45 = vld [vmem:[%s5465_s0 + $0x4a8] sm:$0xf0] }
 0x129   :  { %v4496_v51 = vadd.f32 %v1992_v46, %v1874_v47  ;;  %v1757_v52 = vadd.f32 %v1756_v49, %v1638_v50  ;;  %v3214_v49 = vor.u32 %v3735_v35, %v3211_v37  ;;  %v3222_v55 = vor.u32 %v3736_v44, %v3219_v45 }
 0x12e   :  { %v1875_v0 = vpop.f32.mrf.mxu2  ;;  %v1640_v9 = vpop.f32.mrf.mxu0 }
 0x12f   :  { %v1994_v1 = vpop.f32.mrf.mxu3  ;;  %v1876_v8 = vadd.f32 %v1875_v0, %v1757_v52  ;;  %v1759_v10 = vpop.f32.mrf.mxu1  ;;  %v1641_v13 = vadd.f32 %v4192_v16, %v1640_v9 }
 0x131   :  { %v4523_v14 = vadd.f32 %v1994_v1, %v1876_v8  ;;  %v1760_v17 = vadd.f32 %v1759_v10, %v1641_v13  ;;  %1679 = vmatmul.bf16.gmra.mxu0 %v3178_v3  ;;  %v3241_v10 = vld [vmem:[%s5465_s0 + $0x4c0] sm:$0xf]  ;;  %v3243_v13 = vld [vmem:[%s5465_s0 + $0x4e0] sm:$0xf0] }
 0x132   :  { %1798 = vmatmul.bf16.gmra.mxu1 %v3182_v5 }
 0x133   :  { %1917 = vmatmul.bf16.gmra.mxu2 %v3186_v11  ;;  %v3747_v11 = vld [vmem:[%s5465_s0 + $0x4dc] sm:$0xf0] }
 0x134   :  { %2036 = vmatmul.bf16.gmra.mxu3 %v3190_v12  ;;  %v3743_v12 = vld [vmem:[%s5465_s0 + $0x4c4] sm:$0xf] }
 0x135   :  { %v3246_v26 = vor.u32 %v3743_v12, %v3243_v13 }
 0x136   :  { %v1878_v18 = vpop.f32.mrf.mxu2  ;;  %v1642_v21 = vpop.f32.mrf.mxu0 }
 0x137   :  { %v1997_v19 = vpop.f32.mrf.mxu3  ;;  %v1879_v20 = vadd.f32 %v1878_v18, %v1760_v17  ;;  %v1761_v22 = vpop.f32.mrf.mxu1  ;;  %v1643_v23 = vadd.f32 %v4192_v16, %v1642_v21  ;;  %v3249_v17 = vld [vmem:[%s5465_s0 + $0x4c8] sm:$0xf] }
 0x138   :  { %v3748_v18 = vld [vmem:[%s5465_s0 + $0x4e4] sm:$0xf0] }
 0x139   :  { %v4526_v25 = vadd.f32 %v1997_v19, %v1879_v20  ;;  %v1762_v31 = vadd.f32 %v1761_v22, %v1643_v23  ;;  %v3744_v19 = vld [vmem:[%s5465_s0 + $0x4cc] sm:$0xf]  ;;  %v3242_v23 = vor.u32 %v3747_v11, %v3241_v10  ;;  %v3250_v32 = vor.u32 %v3748_v18, %v3249_v17 }
 0x13a   :  { %v3251_v20 = vld [vmem:[%s5465_s0 + $0x4e8] sm:$0xf0] }
 0x13b   :  { %v3254_v33 = vor.u32 %v3744_v19, %v3251_v20 }
 0x13e   :  { %v1880_v46 = vpop.f32.mrf.mxu2  ;;  %v1645_v52 = vpop.f32.mrf.mxu0 }
 0x13f   :  { %v1999_v47 = vpop.f32.mrf.mxu3  ;;  %v1881_v50 = vadd.f32 %v1880_v46, %v1762_v31  ;;  %v1764_v53 = vpop.f32.mrf.mxu1  ;;  %v1646_v56 = vadd.f32 %v4192_v16, %v1645_v52  ;;  %v3755_v52 = vld [vmem:[%s5465_s0 + $0x51c] sm:$0xf0] }
 0x141   :  { %v4565_v58 = vadd.f32 %v1999_v47, %v1881_v50  ;;  %v1765_v60 = vadd.f32 %v1764_v53, %v1646_v56  ;;  %1684 = vmatmul.bf16.gmra.mxu0 %v3210_v48  ;;  %v3273_v50 = vld [vmem:[%s5465_s0 + $0x500] sm:$0xf]  ;;  %v3751_v53 = vld [vmem:[%s5465_s0 + $0x504] sm:$0xf]  ;;  %v3756_v56 = vld [vmem:[%s5465_s0 + $0x524] sm:$0xf0] }
 0x142   :  { %1803 = vmatmul.bf16.gmra.mxu1 %v3214_v49 }
 0x143   :  { %1922 = vmatmul.bf16.gmra.mxu2 %v3218_v54  ;;  %v3275_v54 = vld [vmem:[%s5465_s0 + $0x520] sm:$0xf0] }
 0x144   :  { %2041 = vmatmul.bf16.gmra.mxu3 %v3222_v55  ;;  %v3281_v55 = vld [vmem:[%s5465_s0 + $0x508] sm:$0xf] }
 0x145   :  { %v3282_v11 = vor.u32 %v3756_v56, %v3281_v55 }
 0x146   :  { %v1883_v62 = vpop.f32.mrf.mxu2  ;;  %v1647_v1 = vpop.f32.mrf.mxu0 }
 0x147   :  { %v2002_v63 = vpop.f32.mrf.mxu3  ;;  %v1884_v0 = vadd.f32 %v1883_v62, %v1765_v60  ;;  %v1766_v3 = vpop.f32.mrf.mxu1  ;;  %v1648_v5 = vadd.f32 %v4192_v16, %v1647_v1  ;;  %v3752_v60 = vld [vmem:[%s5465_s0 + $0x50c] sm:$0xf]  ;;  %v3274_v1 = vor.u32 %v3755_v52, %v3273_v50 }
 0x148   :  { %v3283_v62 = vld [vmem:[%s5465_s0 + $0x528] sm:$0xf0] }
 0x149   :  { %v4568_v8 = vadd.f32 %v2002_v63, %v1884_v0  ;;  %v1767_v9 = vadd.f32 %v1766_v3, %v1648_v5  ;;  %v3278_v3 = vor.u32 %v3751_v53, %v3275_v54  ;;  %v3286_v12 = vor.u32 %v3752_v60, %v3283_v62 }
 0x14e   :  { %v1885_v21 = vpop.f32.mrf.mxu2  ;;  %v1650_v29 = vpop.f32.mrf.mxu0 }
 0x14f   :  { %v2004_v22 = vpop.f32.mrf.mxu3  ;;  %v1886_v27 = vadd.f32 %v1885_v21, %v1767_v9  ;;  %v1769_v31 = vpop.f32.mrf.mxu1  ;;  %v1651_v34 = vadd.f32 %v4192_v16, %v1650_v29 }
 0x151   :  { %v4595_v35 = vadd.f32 %v2004_v22, %v1886_v27  ;;  %v1770_v37 = vadd.f32 %v1769_v31, %v1651_v34  ;;  %1689 = vmatmul.bf16.gmra.mxu0 %v3242_v23  ;;  %v3305_v31 = vld [vmem:[%s5465_s0 + $0x540] sm:$0xf]  ;;  %v3307_v34 = vld [vmem:[%s5465_s0 + $0x560] sm:$0xf0] }
 0x152   :  { %1808 = vmatmul.bf16.gmra.mxu1 %v3246_v26 }
 0x153   :  { %1927 = vmatmul.bf16.gmra.mxu2 %v3250_v32  ;;  %v3763_v32 = vld [vmem:[%s5465_s0 + $0x55c] sm:$0xf0] }
 0x154   :  { %2046 = vmatmul.bf16.gmra.mxu3 %v3254_v33  ;;  %v3759_v33 = vld [vmem:[%s5465_s0 + $0x544] sm:$0xf] }
 0x156   :  { %v1888_v40 = vpop.f32.mrf.mxu2  ;;  %v1652_v45 = vpop.f32.mrf.mxu0 }
 0x157   :  { %v2007_v42 = vpop.f32.mrf.mxu3  ;;  %v1889_v44 = vadd.f32 %v1888_v40, %v1770_v37  ;;  %v1771_v46 = vpop.f32.mrf.mxu1  ;;  %v1653_v47 = vadd.f32 %v4192_v16, %v1652_v45  ;;  %v3313_v37 = vld [vmem:[%s5465_s0 + $0x548] sm:$0xf] }
 0x158   :  { %v3764_v40 = vld [vmem:[%s5465_s0 + $0x564] sm:$0xf0] }
 0x159   :  { %v4598_v48 = vadd.f32 %v2007_v42, %v1889_v44  ;;  %v1772_v49 = vadd.f32 %v1771_v46, %v1653_v47  ;;  %v3760_v42 = vld [vmem:[%s5465_s0 + $0x54c] sm:$0xf]  ;;  %v3306_v47 = vor.u32 %v3763_v32, %v3305_v31  ;;  %v3314_v54 = vor.u32 %v3764_v40, %v3313_v37 }
 0x15a   :  { %v3315_v44 = vld [vmem:[%s5465_s0 + $0x568] sm:$0xf0] }
 0x15b   :  { %v3318_v55 = vor.u32 %v3760_v42, %v3315_v44 }
 0x15e   :  { %v1890_v63 = vpop.f32.mrf.mxu2  ;;  %v1655_v9 = vpop.f32.mrf.mxu0 }
 0x15f   :  { %v2009_v0 = vpop.f32.mrf.mxu3  ;;  %v1891_v5 = vadd.f32 %v1890_v63, %v1772_v49  ;;  %v1774_v10 = vpop.f32.mrf.mxu1  ;;  %v1656_v13 = vadd.f32 %v4192_v16, %v1655_v9  ;;  %v3310_v49 = vor.u32 %v3759_v33, %v3307_v34 }
 0x161   :  { %v4625_v17 = vadd.f32 %v2009_v0, %v1891_v5  ;;  %v1775_v18 = vadd.f32 %v1774_v10, %v1656_v13  ;;  %1694 = vmatmul.bf16.gmra.mxu0 %v3274_v1  ;;  %v3597_v13 = vld [vmem:[%s5465_s0 + $0x2c] sm:$0xf0] }
 0x162   :  { %1813 = vmatmul.bf16.gmra.mxu1 %v3278_v3 }
 0x163   :  { %1932 = vmatmul.bf16.gmra.mxu2 %v3282_v11 }
 0x164   :  { %2051 = vmatmul.bf16.gmra.mxu3 %v3286_v12  ;;  %v2649_v12 = vld [vmem:[%s5465_s0 + $0x10] sm:$0xf] }
 0x165   :  { %v2650_v31 = vor.u32 %v3597_v13, %v2649_v12 }
 0x166   :  { %v1893_v19 = vpop.f32.mrf.mxu2  ;;  %v1657_v22 = vpop.f32.mrf.mxu0 }
 0x167   :  { %v2012_v20 = vpop.f32.mrf.mxu3  ;;  %v1894_v21 = vadd.f32 %v1893_v19, %v1775_v18  ;;  %v1776_v23 = vpop.f32.mrf.mxu1  ;;  %v1658_v26 = vadd.f32 %v4192_v16, %v1657_v22  ;;  %v3593_v18 = vld [vmem:[%s5465_s0 + $0x14] sm:$0xf]  ;;  %v3594_v22 = vld [vmem:[%s5465_s0 + $0x1c] sm:$0xf] }
 0x168   :  { %v2651_v19 = vld [vmem:[%s5465_s0 + $0x30] sm:$0xf0] }
 0x169   :  { %v4628_v27 = vadd.f32 %v2012_v20, %v1894_v21  ;;  %v1777_v29 = vadd.f32 %v1776_v23, %v1658_v26  ;;  %v2657_v20 = vld [vmem:[%s5465_s0 + $0x18] sm:$0xf]  ;;  %v2659_v23 = vld [vmem:[%s5465_s0 + $0x38] sm:$0xf0]  ;;  %v2654_v32 = vor.u32 %v3593_v18, %v2651_v19 }
 0x16a   :  { %v3598_v21 = vld [vmem:[%s5465_s0 + $0x34] sm:$0xf0]  ;;  %v2662_v42 = vor.u32 %v3594_v22, %v2659_v23 }
 0x16b   :  { %v2658_v40 = vor.u32 %v3598_v21, %v2657_v20 }
 0x16e   :  { %v1895_v45 = vpop.f32.mrf.mxu2  ;;  %v1660_v52 = vpop.f32.mrf.mxu0 }
 0x16f   :  { %v2014_v46 = vpop.f32.mrf.mxu3  ;;  %v1896_v50 = vadd.f32 %v1895_v45, %v1777_v29  ;;  %v1779_v53 = vpop.f32.mrf.mxu1  ;;  %v1661_v56 = vadd.f32 %v4192_v16, %v1660_v52 }
 0x171   :  { %v4655_v60 = vadd.f32 %v2014_v46, %v1896_v50  ;;  %v1780_v62 = vadd.f32 %v1779_v53, %v1661_v56  ;;  %1699 = vmatmul.bf16.gmra.mxu0 %v3306_v47 }
 0x172   :  { %1818 = vmatmul.bf16.gmra.mxu1 %v3310_v49 }
 0x173   :  { %1937 = vmatmul.bf16.gmra.mxu2 %v3314_v54 }
 0x174   :  { %2056 = vmatmul.bf16.gmra.mxu3 %v3318_v55 }
 0x176   :  { %v1898_v63 = vpop.f32.mrf.mxu2  ;;  %v1662_v3 = vpop.f32.mrf.mxu0 }
 0x177   :  { %v2017_v0 = vpop.f32.mrf.mxu3  ;;  %v1899_v1 = vadd.f32 %v1898_v63, %v1780_v62  ;;  %v1781_v5 = vpop.f32.mrf.mxu1  ;;  %v1663_v9 = vadd.f32 %v4192_v16, %v1662_v3  ;;  %v2681_v62 = vld [vmem:[%s5465_s0 + $0x50] sm:$0xf]  ;;  %v3606_v3 = vld [vmem:[%s5465_s0 + $0x74] sm:$0xf0] }
 0x178   :  { %v3605_v63 = vld [vmem:[%s5465_s0 + $0x6c] sm:$0xf0] }
 0x179   :  { %v4658_v10 = vadd.f32 %v2017_v0, %v1899_v1  ;;  %v1782_v11 = vadd.f32 %v1781_v5, %v1663_v9  ;;  %v3601_v0 = vld [vmem:[%s5465_s0 + $0x54] sm:$0xf]  ;;  %v3602_v5 = vld [vmem:[%s5465_s0 + $0x5c] sm:$0xf]  ;;  %v2682_v13 = vor.u32 %v3605_v63, %v2681_v62 }
 0x17a   :  { %v2683_v1 = vld [vmem:[%s5465_s0 + $0x70] sm:$0xf0]  ;;  %v2691_v9 = vld [vmem:[%s5465_s0 + $0x78] sm:$0xf0] }
 0x17b   :  { %v2686_v18 = vor.u32 %v3601_v0, %v2683_v1  ;;  %v2694_v23 = vor.u32 %v3602_v5, %v2691_v9  ;;  %v3610_v62 = vld [vmem:[%s5465_s0 + $0x9c] sm:$0xf] }
 0x17c   :  { %v2723_v63 = vld [vmem:[%s5465_s0 + $0xb8] sm:$0xf0] }
 0x17e   :  { %v1900_v26 = vpop.f32.mrf.mxu2  ;;  %v1665_v34 = vpop.f32.mrf.mxu0 }
 0x17f   :  { %v2019_v29 = vpop.f32.mrf.mxu3  ;;  %v1901_v33 = vadd.f32 %v1900_v26, %v1782_v11  ;;  %v1784_v37 = vpop.f32.mrf.mxu1  ;;  %v1666_v44 = vadd.f32 %v4192_v16, %v1665_v34  ;;  %v4717_v26 = vld [vmem:[%s5464_s2] ss:$0 sm:$0xff] }
 0x181   :  { %v4685_v45 = vadd.f32 %v2019_v29, %v1901_v33  ;;  %v1785_v46 = vadd.f32 %v1784_v37, %v1666_v44  ;;  %2070 = vmatmul.bf16.vlgmr.msrb.gmra.mxu0 %v2650_v31 }
 0x182   :  { %2189 = vmatmul.bf16.vlgmr.msrb.gmra.mxu1 %v2654_v32 }
 0x183   :  { %2308 = vmatmul.bf16.vlgmr.msrb.gmra.mxu2 %v2658_v40 }
 0x184   :  { %2427 = vmatmul.bf16.vlgmr.msrb.gmra.mxu3 %v2662_v42 }
 0x186   :  { %v1903_v47 = vpop.f32.mrf.mxu2  ;;  %v1667_v52 = vpop.f32.mrf.mxu0 }
 0x187   :  { %v2022_v49 = vpop.f32.mrf.mxu3  ;;  %v1904_v50 = vadd.f32 %v1903_v47, %v1785_v46  ;;  %v1786_v53 = vpop.f32.mrf.mxu1  ;;  %v1668_v54 = vadd.f32 %v4192_v16, %v1667_v52  ;;  %v2689_v16 = vld [vmem:[%s5465_s0 + $0x58] sm:$0xf]  ;;  %v3609_v52 = vld [vmem:[%s5465_s0 + $0x94] sm:$0xf] }
 0x188   :  { %v2690_v22 = vor.u32 %v3606_v3, %v2689_v16 }
 0x189   :  { %v4688_v55 = vadd.f32 %v2022_v49, %v1904_v50  ;;  %v1787_v56 = vadd.f32 %v1786_v53, %v1668_v54  ;;  %v2713_v49 = vld [vmem:[%s5465_s0 + $0x90] sm:$0xf]  ;;  %v2715_v53 = vld [vmem:[%s5465_s0 + $0xb0] sm:$0xf0]  ;;  %v2721_v54 = vld [vmem:[%s5465_s0 + $0x98] sm:$0xf] }
 0x18a   :  { %v3613_v50 = vld [vmem:[%s5465_s0 + $0xac] sm:$0xf0]  ;;  %v2718_v3 = vor.u32 %v3609_v52, %v2715_v53  ;;  %v3618_v52 = vld [vmem:[%s5465_s0 + $0xdc] sm:$0xf] }
 0x18b   :  { %v2714_v16 = vor.u32 %v3613_v50, %v2713_v49  ;;  %v2753_v49 = vld [vmem:[%s5465_s0 + $0xd8] sm:$0xf]  ;;  %v2755_v53 = vld [vmem:[%s5465_s0 + $0xf8] sm:$0xf0] }
 0x18c   :  { %v3622_v50 = vld [vmem:[%s5465_s0 + $0xf4] sm:$0xf0] }
 0x18e   :  { %v1905_v11 = vpop.f32.mrf.mxu2  ;;  %v1670_v20 = vpop.f32.mrf.mxu0 }
 0x18f   :  { %v2024_v12 = vpop.f32.mrf.mxu3  ;;  %v1906_v19 = vadd.f32 %v1905_v11, %v1787_v56  ;;  %v1789_v21 = vpop.f32.mrf.mxu1  ;;  %v1671_v29 = vadd.f32 %v4717_v26, %v1670_v20  ;;  %v3614_v56 = vld [vmem:[%s5465_s0 + $0xb4] sm:$0xf0] }
 0x191   :  { %v4720_v31 = vadd.f32 %v2024_v12, %v1906_v19  ;;  %v1790_v32 = vadd.f32 %v1789_v21, %v1671_v29  ;;  %2075 = vmatmul.bf16.gmra.mxu0 %v2682_v13  ;;  %v2722_v12 = vor.u32 %v3614_v56, %v2721_v54  ;;  %v2726_v13 = vor.u32 %v3610_v62, %v2723_v63 }
 0x192   :  { %2194 = vmatmul.bf16.gmra.mxu1 %v2686_v18 }
 0x193   :  { %2313 = vmatmul.bf16.gmra.mxu2 %v2690_v22 }
 0x194   :  { %2432 = vmatmul.bf16.gmra.mxu3 %v2694_v23 }
 0x196   :  { %v1908_v33 = vpop.f32.mrf.mxu2  ;;  %v1672_v40 = vpop.f32.mrf.mxu0 }
 0x197   :  { %v2027_v34 = vpop.f32.mrf.mxu3  ;;  %v1909_v37 = vadd.f32 %v1908_v33, %v1790_v32  ;;  %v1791_v42 = vpop.f32.mrf.mxu1  ;;  %v1673_v44 = vadd.f32 %v4717_v26, %v1672_v40  ;;  %v2745_v40 = vld [vmem:[%s5465_s0 + $0xd0] sm:$0xf] }
 0x199   :  { %v4723_v46 = vadd.f32 %v2027_v34, %v1909_v37  ;;  %v1792_v47 = vadd.f32 %v1791_v42, %v1673_v44  ;;  %v3621_v42 = vld [vmem:[%s5465_s0 + $0xec] sm:$0xf0]  ;;  %v3617_v44 = vld [vmem:[%s5465_s0 + $0xd4] sm:$0xf] }
 0x19a   :  { %v2746_v62 = vor.u32 %v3621_v42, %v2745_v40  ;;  %v3625_v40 = vld [vmem:[%s5465_s0 + $0x114] sm:$0xf] }
 0x19b   :  { %v2779_v42 = vld [vmem:[%s5465_s0 + $0x130] sm:$0xf0] }
 0x19e   :  { %v1910_v0 = vpop.f32.mrf.mxu2  ;;  %v1675_v9 = vpop.f32.mrf.mxu0 }
 0x19f   :  { %v2029_v1 = vpop.f32.mrf.mxu3  ;;  %v1911_v5 = vadd.f32 %v1910_v0, %v1792_v47  ;;  %v1794_v11 = vpop.f32.mrf.mxu1  ;;  %v1676_v18 = vadd.f32 %v4717_v26, %v1675_v9  ;;  %v2747_v47 = vld [vmem:[%s5465_s0 + $0xf0] sm:$0xf0] }
 0x1a0   :  { %v2750_v63 = vor.u32 %v3617_v44, %v2747_v47  ;;  %v2785_v44 = vld [vmem:[%s5465_s0 + $0x118] sm:$0xf] }
 0x1a1   :  { %v4750_v19 = vadd.f32 %v2029_v1, %v1911_v5  ;;  %v1795_v20 = vadd.f32 %v1794_v11, %v1676_v18  ;;  %2080 = vmatmul.bf16.gmra.mxu0 %v2714_v16  ;;  %v2758_v5 = vor.u32 %v3618_v52, %v2755_v53  ;;  %v3630_v47 = vld [vmem:[%s5465_s0 + $0x134] sm:$0xf0] }
 0x1a2   :  { %2199 = vmatmul.bf16.gmra.mxu1 %v2718_v3  ;;  %v2754_v3 = vor.u32 %v3622_v50, %v2753_v49  ;;  %v3626_v49 = vld [vmem:[%s5465_s0 + $0x11c] sm:$0xf] }
 0x1a3   :  { %2318 = vmatmul.bf16.gmra.mxu2 %v2722_v12  ;;  %v2787_v50 = vld [vmem:[%s5465_s0 + $0x138] sm:$0xf0] }
 0x1a4   :  { %2437 = vmatmul.bf16.gmra.mxu3 %v2726_v13 }
 0x1a6   :  { %v1913_v21 = vpop.f32.mrf.mxu2  ;;  %v1677_v29 = vpop.f32.mrf.mxu0 }
 0x1a7   :  { %v2032_v22 = vpop.f32.mrf.mxu3  ;;  %v1914_v23 = vadd.f32 %v1913_v21, %v1795_v20  ;;  %v1796_v32 = vpop.f32.mrf.mxu1  ;;  %v1678_v33 = vadd.f32 %v4717_v26, %v1677_v29 }
 0x1a9   :  { %v4753_v34 = vadd.f32 %v2032_v22, %v1914_v23  ;;  %v1797_v37 = vadd.f32 %v1796_v32, %v1678_v33  ;;  %v2777_v33 = vld [vmem:[%s5465_s0 + $0x110] sm:$0xf] }
 0x1ae   :  { %v1915_v54 = vpop.f32.mrf.mxu2  ;;  %v1680_v1 = vpop.f32.mrf.mxu0 }
 0x1af   :  { %v2034_v56 = vpop.f32.mrf.mxu3  ;;  %v1916_v0 = vadd.f32 %v1915_v54, %v1797_v37  ;;  %v1799_v16 = vpop.f32.mrf.mxu1  ;;  %v1681_v9 = vadd.f32 %v4717_v26, %v1680_v1  ;;  %v3629_v37 = vld [vmem:[%s5465_s0 + $0x12c] sm:$0xf0]  ;;  %v2786_v1 = vor.u32 %v3630_v47, %v2785_v44  ;;  %v2817_v44 = vld [vmem:[%s5465_s0 + $0x158] sm:$0xf] }
 0x1b0   :  { %v2778_v54 = vor.u32 %v3629_v37, %v2777_v33  ;;  %v2809_v33 = vld [vmem:[%s5465_s0 + $0x150] sm:$0xf]  ;;  %v3638_v47 = vld [vmem:[%s5465_s0 + $0x174] sm:$0xf0] }
 0x1b1   :  { %v4780_v11 = vadd.f32 %v2034_v56, %v1916_v0  ;;  %v1800_v12 = vadd.f32 %v1799_v16, %v1681_v9  ;;  %2085 = vmatmul.bf16.gmra.mxu0 %v2746_v62  ;;  %v2782_v56 = vor.u32 %v3625_v40, %v2779_v42  ;;  %v2790_v16 = vor.u32 %v3626_v49, %v2787_v50  ;;  %v3637_v37 = vld [vmem:[%s5465_s0 + $0x16c] sm:$0xf0]  ;;  %v3633_v40 = vld [vmem:[%s5465_s0 + $0x154] sm:$0xf]  ;;  %v3634_v49 = vld [vmem:[%s5465_s0 + $0x15c] sm:$0xf] }
 0x1b2   :  { %2204 = vmatmul.bf16.gmra.mxu1 %v2750_v63  ;;  %v2811_v42 = vld [vmem:[%s5465_s0 + $0x170] sm:$0xf0]  ;;  %v2819_v50 = vld [vmem:[%s5465_s0 + $0x178] sm:$0xf0] }
 0x1b3   :  { %2323 = vmatmul.bf16.gmra.mxu2 %v2754_v3 }
 0x1b4   :  { %2442 = vmatmul.bf16.gmra.mxu3 %v2758_v5 }
 0x1b6   :  { %v1918_v13 = vpop.f32.mrf.mxu2  ;;  %v1682_v21 = vpop.f32.mrf.mxu0 }
 0x1b7   :  { %v2037_v18 = vpop.f32.mrf.mxu3  ;;  %v1919_v20 = vadd.f32 %v1918_v13, %v1800_v12  ;;  %v1801_v22 = vpop.f32.mrf.mxu1  ;;  %v1683_v23 = vadd.f32 %v4717_v26, %v1682_v21 }
 0x1b9   :  { %v4783_v29 = vadd.f32 %v2037_v18, %v1919_v20  ;;  %v1802_v32 = vadd.f32 %v1801_v22, %v1683_v23 }
 0x1be   :  { %v1920_v52 = vpop.f32.mrf.mxu2  ;;  %v1685_v63 = vpop.f32.mrf.mxu0 }
 0x1bf   :  { %v2039_v53 = vpop.f32.mrf.mxu3  ;;  %v1921_v62 = vadd.f32 %v1920_v52, %v1802_v32  ;;  %v1804_v0 = vpop.f32.mrf.mxu1  ;;  %v1686_v3 = vadd.f32 %v4717_v26, %v1685_v63 }
 0x1c1   :  { %v4810_v5 = vadd.f32 %v2039_v53, %v1921_v62  ;;  %v1805_v9 = vadd.f32 %v1804_v0, %v1686_v3  ;;  %2090 = vmatmul.bf16.gmra.mxu0 %v2778_v54  ;;  %v2810_v54 = vor.u32 %v3637_v37, %v2809_v33 }
 0x1c2   :  { %2209 = vmatmul.bf16.gmra.mxu1 %v2782_v56  ;;  %v2814_v56 = vor.u32 %v3633_v40, %v2811_v42  ;;  %v2841_v40 = vld [vmem:[%s5465_s0 + $0x190] sm:$0xf] }
 0x1c3   :  { %2328 = vmatmul.bf16.gmra.mxu2 %v2786_v1  ;;  %v2818_v1 = vor.u32 %v3638_v47, %v2817_v44  ;;  %v3645_v42 = vld [vmem:[%s5465_s0 + $0x1ac] sm:$0xf0]  ;;  %v3641_v44 = vld [vmem:[%s5465_s0 + $0x194] sm:$0xf] }
 0x1c4   :  { %2447 = vmatmul.bf16.gmra.mxu3 %v2790_v16  ;;  %v2822_v16 = vor.u32 %v3634_v49, %v2819_v50  ;;  %v2843_v47 = vld [vmem:[%s5465_s0 + $0x1b0] sm:$0xf0]  ;;  %v2849_v49 = vld [vmem:[%s5465_s0 + $0x198] sm:$0xf] }
 0x1c5   :  { %v3646_v50 = vld [vmem:[%s5465_s0 + $0x1b4] sm:$0xf0] }
 0x1c6   :  { %v1923_v12 = vpop.f32.mrf.mxu2  ;;  %v1687_v20 = vpop.f32.mrf.mxu0 }
 0x1c7   :  { %v2042_v13 = vpop.f32.mrf.mxu3  ;;  %v1924_v18 = vadd.f32 %v1923_v12, %v1805_v9  ;;  %v1806_v21 = vpop.f32.mrf.mxu1  ;;  %v1688_v22 = vadd.f32 %v4717_v26, %v1687_v20 }
 0x1c9   :  { %v4813_v23 = vadd.f32 %v2042_v13, %v1924_v18  ;;  %v1807_v32 = vadd.f32 %v1806_v21, %v1688_v22 }
 0x1ce   :  { %v1925_v52 = vpop.f32.mrf.mxu2  ;;  %v1690_v63 = vpop.f32.mrf.mxu0 }
 0x1cf   :  { %v2044_v53 = vpop.f32.mrf.mxu3  ;;  %v1926_v62 = vadd.f32 %v1925_v52, %v1807_v32  ;;  %v1809_v0 = vpop.f32.mrf.mxu1  ;;  %v1691_v3 = vadd.f32 %v4717_v26, %v1690_v63  ;;  %v3642_v52 = vld [vmem:[%s5465_s0 + $0x19c] sm:$0xf]  ;;  %v2846_v63 = vor.u32 %v3641_v44, %v2843_v47  ;;  %v2873_v47 = vld [vmem:[%s5465_s0 + $0x1d0] sm:$0xf] }
 0x1d1   :  { %v4840_v9 = vadd.f32 %v2044_v53, %v1926_v62  ;;  %v1810_v12 = vadd.f32 %v1809_v0, %v1691_v3  ;;  %2095 = vmatmul.bf16.gmra.mxu0 %v2810_v54  ;;  %v2851_v53 = vld [vmem:[%s5465_s0 + $0x1b8] sm:$0xf0]  ;;  %v2842_v62 = vor.u32 %v3645_v42, %v2841_v40  ;;  %v2850_v3 = vor.u32 %v3646_v50, %v2849_v49  ;;  %v3653_v49 = vld [vmem:[%s5465_s0 + $0x1ec] sm:$0xf0]  ;;  %v3649_v50 = vld [vmem:[%s5465_s0 + $0x1d4] sm:$0xf] }
 0x1d2   :  { %2214 = vmatmul.bf16.gmra.mxu1 %v2814_v56 }
 0x1d3   :  { %2333 = vmatmul.bf16.gmra.mxu2 %v2818_v1 }
 0x1d4   :  { %2452 = vmatmul.bf16.gmra.mxu3 %v2822_v16 }
 0x1d6   :  { %v1928_v13 = vpop.f32.mrf.mxu2  ;;  %v1692_v21 = vpop.f32.mrf.mxu0 }
 0x1d7   :  { %v2047_v18 = vpop.f32.mrf.mxu3  ;;  %v1929_v20 = vadd.f32 %v1928_v13, %v1810_v12  ;;  %v1811_v22 = vpop.f32.mrf.mxu1  ;;  %v1693_v32 = vadd.f32 %v4717_v26, %v1692_v21  ;;  %v2854_v12 = vor.u32 %v3642_v52, %v2851_v53  ;;  %v2875_v52 = vld [vmem:[%s5465_s0 + $0x1f0] sm:$0xf0]  ;;  %v3654_v53 = vld [vmem:[%s5465_s0 + $0x1f4] sm:$0xf0] }
 0x1d9   :  { %v4843_v33 = vadd.f32 %v2047_v18, %v1929_v20  ;;  %v1812_v37 = vadd.f32 %v1811_v22, %v1693_v32 }
 0x1db   :  { %5467 = vst [vmem:[#allocation2_spill] sm:$0xff] %v4843_v33 }
 0x1de   :  { %v1930_v54 = vpop.f32.mrf.mxu2  ;;  %v1695_v1 = vpop.f32.mrf.mxu0 }
 0x1df   :  { %v2049_v56 = vpop.f32.mrf.mxu3  ;;  %v1931_v0 = vadd.f32 %v1930_v54, %v1812_v37  ;;  %v1814_v16 = vpop.f32.mrf.mxu1  ;;  %v1696_v13 = vadd.f32 %v4717_v26, %v1695_v1  ;;  %v3650_v54 = vld [vmem:[%s5465_s0 + $0x1dc] sm:$0xf]  ;;  %v2878_v1 = vor.u32 %v3649_v50, %v2875_v52  ;;  %v2905_v52 = vld [vmem:[%s5465_s0 + $0x210] sm:$0xf] }
 0x1e1   :  { %v4870_v18 = vadd.f32 %v2049_v56, %v1931_v0  ;;  %v1815_v20 = vadd.f32 %v1814_v16, %v1696_v13  ;;  %2100 = vmatmul.bf16.gmra.mxu0 %v2842_v62  ;;  %v2883_v56 = vld [vmem:[%s5465_s0 + $0x1f8] sm:$0xf0]  ;;  %v2874_v0 = vor.u32 %v3653_v49, %v2873_v47 }
 0x1e2   :  { %2219 = vmatmul.bf16.gmra.mxu1 %v2846_v63 }
 0x1e3   :  { %5468 = vst [vmem:[#allocation3_spill] sm:$0xff] %v4870_v18  ;;  %2338 = vmatmul.bf16.gmra.mxu2 %v2850_v3 }
 0x1e4   :  { %2457 = vmatmul.bf16.gmra.mxu3 %v2854_v12 }
 0x1e6   :  { %v1933_v21 = vpop.f32.mrf.mxu2  ;;  %v1697_v33 = vpop.f32.mrf.mxu0 }
 0x1e7   :  { %v2052_v22 = vpop.f32.mrf.mxu3  ;;  %v1934_v32 = vadd.f32 %v1933_v21, %v1815_v20  ;;  %v1816_v40 = vpop.f32.mrf.mxu1  ;;  %v1698_v37 = vadd.f32 %v4717_v26, %v1697_v33  ;;  %v2881_v33 = vld [vmem:[%s5465_s0 + $0x1d8] sm:$0xf]  ;;  %v2886_v20 = vor.u32 %v3650_v54, %v2883_v56  ;;  %v2907_v54 = vld [vmem:[%s5465_s0 + $0x230] sm:$0xf0]  ;;  %v2915_v56 = vld [vmem:[%s5465_s0 + $0x238] sm:$0xf0] }
 0x1e8   :  { %v2882_v13 = vor.u32 %v3654_v53, %v2881_v33  ;;  %v3661_v33 = vld [vmem:[%s5465_s0 + $0x22c] sm:$0xf0]  ;;  %v3657_v53 = vld [vmem:[%s5465_s0 + $0x214] sm:$0xf] }
 0x1e9   :  { %v4873_v42 = vadd.f32 %v2052_v22, %v1934_v32  ;;  %v1817_v44 = vadd.f32 %v1816_v40, %v1698_v37 }
 0x1eb   :  { %5469 = vst [vmem:[#allocation4_spill] sm:$0xff] %v4873_v42 }
 0x1ee   :  { %v1935_v62 = vpop.f32.mrf.mxu2  ;;  %v1700_v3 = vpop.f32.mrf.mxu0 }
 0x1ef   :  { %v2054_v63 = vpop.f32.mrf.mxu3  ;;  %v1936_v16 = vadd.f32 %v1935_v62, %v1817_v44  ;;  %v1819_v12 = vpop.f32.mrf.mxu1  ;;  %v1701_v21 = vadd.f32 %v4717_v26, %v1700_v3 }
 0x1f1   :  { %v4900_v22 = vadd.f32 %v2054_v63, %v1936_v16  ;;  %v1820_v32 = vadd.f32 %v1819_v12, %v1701_v21  ;;  %2105 = vmatmul.bf16.gmra.mxu0 %v2874_v0  ;;  %v2906_v0 = vor.u32 %v3661_v33, %v2905_v52 }
 0x1f2   :  { %2224 = vmatmul.bf16.gmra.mxu1 %v2878_v1  ;;  %v2910_v1 = vor.u32 %v3657_v53, %v2907_v54  ;;  %v2937_v53 = vld [vmem:[%s5465_s0 + $0x250] sm:$0xf]  ;;  %v3665_v54 = vld [vmem:[%s5465_s0 + $0x254] sm:$0xf] }
 0x1f3   :  { %2343 = vmatmul.bf16.gmra.mxu2 %v2882_v13 }
 0x1f4   :  { %2462 = vmatmul.bf16.gmra.mxu3 %v2886_v20 }
 0x1f6   :  { %v1938_v40 = vpop.f32.mrf.mxu2  ;;  %v1702_v18 = vpop.f32.mrf.mxu0 }
 0x1f7   :  { %v2057_v37 = vpop.f32.mrf.mxu3  ;;  %v1939_v42 = vadd.f32 %v1938_v40, %v1820_v32  ;;  %v1821_v47 = vpop.f32.mrf.mxu1  ;;  %v1703_v44 = vadd.f32 %v4717_v26, %v1702_v18  ;;  %v2913_v26 = vld [vmem:[%s5465_s0 + $0x218] sm:$0xf] }
 0x1f8   :  { %v3662_v18 = vld [vmem:[%s5465_s0 + $0x234] sm:$0xf0] }
 0x1f9   :  { %v4903_v49 = vadd.f32 %v2057_v37, %v1939_v42  ;;  %v1822_v50 = vadd.f32 %v1821_v47, %v1703_v44  ;;  %v3658_v42 = vld [vmem:[%s5465_s0 + $0x21c] sm:$0xf]  ;;  %v2914_v13 = vor.u32 %v3662_v18, %v2913_v26  ;;  %v2939_v18 = vld [vmem:[%s5465_s0 + $0x270] sm:$0xf0] }
 0x1fa   :  { %v2918_v20 = vor.u32 %v3658_v42, %v2915_v56  ;;  %v3666_v42 = vld [vmem:[%s5465_s0 + $0x25c] sm:$0xf] }
 0x1fb   :  { %5470 = vst [vmem:[#allocation5_spill] sm:$0xff] %v4903_v49  ;;  %v2947_v56 = vld [vmem:[%s5465_s0 + $0x278] sm:$0xf0] }
 0x1fe   :  { %v1940_v62 = vpop.f32.mrf.mxu2  ;;  %v2071_v3 = vpop.f32.mrf.mxu0 }
 0x1ff   :  { %v2059_v63 = vpop.f32.mrf.mxu3  ;;  %v1941_v16 = vadd.f32 %v1940_v62, %v1822_v50  ;;  %v2190_v12 = vpop.f32.mrf.mxu1  ;;  %v2072_v32 = vadd.f32 %v2071_v3, %v4220_v39  ;;  %v3669_v39 = vld [vmem:[%s5465_s0 + $0x26c] sm:$0xf0] }
 0x201   :  { %v4929_v21 = vadd.f32 %v2059_v63, %v1941_v16  ;;  %2110 = vmatmul.bf16.gmra.mxu0 %v2906_v0  ;;  %v2191_v40 = vadd.f32 %v2190_v12, %v2072_v32  ;;  %v2942_v16 = vor.u32 %v3665_v54, %v2939_v18  ;;  %v2950_v32 = vor.u32 %v3666_v42, %v2947_v56  ;;  %v3677_v18 = vld [vmem:[%s5465_s0 + $0x2ac] sm:$0xf0]  ;;  %v2971_v42 = vld [vmem:[%s5465_s0 + $0x2b0] sm:$0xf0]  ;;  %v3678_v56 = vld [vmem:[%s5465_s0 + $0x2b4] sm:$0xf0] }
 0x202   :  { %2229 = vmatmul.bf16.gmra.mxu1 %v2910_v1  ;;  %v2938_v1 = vor.u32 %v3669_v39, %v2937_v53 }
 0x203   :  { %2348 = vmatmul.bf16.gmra.mxu2 %v2914_v13 }
 0x204   :  { %2467 = vmatmul.bf16.gmra.mxu3 %v2918_v20 }
 0x206   :  { %v2309_v37 = vpop.f32.mrf.mxu2  ;;  %v2073_v49 = vpop.f32.mrf.mxu0 }
 0x207   :  { %v2428_v47 = vpop.f32.mrf.mxu3  ;;  %v2310_v44 = vadd.f32 %v2309_v37, %v2191_v40  ;;  %v2192_v52 = vpop.f32.mrf.mxu1  ;;  %v2074_v50 = vadd.f32 %v2073_v49, %v4247_v59  ;;  %v2945_v59 = vld [vmem:[%s5465_s0 + $0x258] sm:$0xf] }
 0x208   :  { %v3670_v49 = vld [vmem:[%s5465_s0 + $0x274] sm:$0xf0] }
 0x209   :  { %v2429_v33 = vadd.f32 %v2428_v47, %v2310_v44  ;;  %v2193_v62 = vadd.f32 %v2192_v52, %v2074_v50  ;;  %v2946_v20 = vor.u32 %v3670_v49, %v2945_v59  ;;  %v3673_v59 = vld [vmem:[%s5465_s0 + $0x294] sm:$0xf] }
 0x20b   :  { %v2538_v26 = vmax.f32 %v2429_v33, 0.0 }
 0x20d   :  { %2583 = vst.msk [vmem:[%s5466_s3] sm:$0xff] %vm2582_vm0, %v2538_v26 }
 0x20e   :  { %v2311_v63 = vpop.f32.mrf.mxu2  ;;  %v2076_v12 = vpop.f32.mrf.mxu0 }
 0x20f   :  { %v2430_v0 = vpop.f32.mrf.mxu3  ;;  %v2312_v3 = vadd.f32 %v2311_v63, %v2193_v62  ;;  %v2195_v13 = vpop.f32.mrf.mxu1  ;;  %v2077_v37 = vadd.f32 %v2076_v12, %v4259_v6  ;;  %v2969_v6 = vld [vmem:[%s5465_s0 + $0x290] sm:$0xf]  ;;  %v3674_v62 = vld [vmem:[%s5465_s0 + $0x29c] sm:$0xf]  ;;  %v2974_v12 = vor.u32 %v3673_v59, %v2971_v42 }
 0x210   :  { %v2979_v63 = vld [vmem:[%s5465_s0 + $0x2b8] sm:$0xf0]  ;;  %v3685_v59 = vld [vmem:[%s5465_s0 + $0x2ec] sm:$0xf0] }
 0x211   :  { %v2431_v40 = vadd.f32 %v2430_v0, %v2312_v3  ;;  %2115 = vmatmul.bf16.gmra.mxu0 %v2938_v1  ;;  %v2196_v44 = vadd.f32 %v2195_v13, %v2077_v37  ;;  %v2970_v3 = vor.u32 %v3677_v18, %v2969_v6  ;;  %v2982_v37 = vor.u32 %v3674_v62, %v2979_v63  ;;  %v3682_v62 = vld [vmem:[%s5465_s0 + $0x2dc] sm:$0xf] }
 0x212   :  { %2234 = vmatmul.bf16.gmra.mxu1 %v2942_v16  ;;  %v3011_v63 = vld [vmem:[%s5465_s0 + $0x2f8] sm:$0xf0] }
 0x213   :  { %v2539_v47 = vmax.f32 %v2431_v40, 0.0  ;;  %2353 = vmatmul.bf16.gmra.mxu2 %v2946_v20 }
 0x214   :  { %2472 = vmatmul.bf16.gmra.mxu3 %v2950_v32 }
 0x215   :  { %2584 = vst.msk [vmem:[%s5466_s3 + $0x8] sm:$0xff] %vm2582_vm0, %v2539_v47 }
 0x216   :  { %v2314_v52 = vpop.f32.mrf.mxu2  ;;  %v2078_v53 = vpop.f32.mrf.mxu0 }
 0x217   :  { %v2433_v33 = vpop.f32.mrf.mxu3  ;;  %v2315_v50 = vadd.f32 %v2314_v52, %v2196_v44  ;;  %v2197_v39 = vpop.f32.mrf.mxu1  ;;  %v2079_v26 = vadd.f32 %v2078_v53, %v4289_v28  ;;  %v2977_v28 = vld [vmem:[%s5465_s0 + $0x298] sm:$0xf] }
 0x218   :  { %v2978_v40 = vor.u32 %v3678_v56, %v2977_v28  ;;  %v3003_v28 = vld [vmem:[%s5465_s0 + $0x2f0] sm:$0xf0]  ;;  %v3686_v56 = vld [vmem:[%s5465_s0 + $0x2f4] sm:$0xf0] }
 0x219   :  { %v2434_v54 = vadd.f32 %v2433_v33, %v2315_v50  ;;  %v2198_v0 = vadd.f32 %v2197_v39, %v2079_v26 }
 0x21b   :  { %v2540_v49 = vmax.f32 %v2434_v54, 0.0 }
 0x21d   :  { %2585 = vst.msk [vmem:[%s5466_s3 + $0x10] sm:$0xff] %vm2582_vm0, %v2540_v49  ;;  %v3681_v49 = vld [vmem:[%s5465_s0 + $0x2d4] sm:$0xf] }
 0x21e   :  { %v2316_v1 = vpop.f32.mrf.mxu2  ;;  %v2081_v20 = vpop.f32.mrf.mxu0 }
 0x21f   :  { %v2435_v16 = vpop.f32.mrf.mxu3  ;;  %v2317_v13 = vadd.f32 %v2316_v1, %v2198_v0  ;;  %v2200_v32 = vpop.f32.mrf.mxu1  ;;  %v2082_v44 = vadd.f32 %v2081_v20, %v4292_v36  ;;  %v3001_v36 = vld [vmem:[%s5465_s0 + $0x2d0] sm:$0xf] }
 0x221   :  { %v2436_v47 = vadd.f32 %v2435_v16, %v2317_v13  ;;  %2120 = vmatmul.bf16.gmra.mxu0 %v2970_v3  ;;  %v2201_v33 = vadd.f32 %v2200_v32, %v2082_v44  ;;  %v3002_v3 = vor.u32 %v3685_v59, %v3001_v36  ;;  %v3693_v36 = vld [vmem:[%s5465_s0 + $0x32c] sm:$0xf0]  ;;  %v3689_v59 = vld [vmem:[%s5465_s0 + $0x314] sm:$0xf] }
 0x222   :  { %2239 = vmatmul.bf16.gmra.mxu1 %v2974_v12  ;;  %v3006_v12 = vor.u32 %v3681_v49, %v3003_v28  ;;  %v3694_v28 = vld [vmem:[%s5465_s0 + $0x334] sm:$0xf0] }
 0x223   :  { %v2541_v52 = vmax.f32 %v2436_v47, 0.0  ;;  %2358 = vmatmul.bf16.gmra.mxu2 %v2978_v40 }
 0x224   :  { %2477 = vmatmul.bf16.gmra.mxu3 %v2982_v37  ;;  %v3014_v37 = vor.u32 %v3682_v62, %v3011_v63 }
 0x225   :  { %2586 = vst.msk [vmem:[%s5466_s3 + $0x18] sm:$0xff] %vm2582_vm0, %v2541_v52 }
 0x226   :  { %v2319_v50 = vpop.f32.mrf.mxu2  ;;  %v2083_v54 = vpop.f32.mrf.mxu0 }
 0x227   :  { %v2438_v53 = vpop.f32.mrf.mxu3  ;;  %v2320_v39 = vadd.f32 %v2319_v50, %v2201_v33  ;;  %v2202_v26 = vpop.f32.mrf.mxu1  ;;  %v2084_v18 = vadd.f32 %v2083_v54, %v4319_v57  ;;  %v3009_v57 = vld [vmem:[%s5465_s0 + $0x2d8] sm:$0xf] }
 0x228   :  { %v3010_v40 = vor.u32 %v3686_v56, %v3009_v57  ;;  %v3690_v57 = vld [vmem:[%s5465_s0 + $0x31c] sm:$0xf] }
 0x229   :  { %v2439_v6 = vadd.f32 %v2438_v53, %v2320_v39  ;;  %v2203_v0 = vadd.f32 %v2202_v26, %v2084_v18  ;;  %v3043_v56 = vld [vmem:[%s5465_s0 + $0x338] sm:$0xf0] }
 0x22b   :  { %v2542_v42 = vmax.f32 %v2439_v6, 0.0 }
 0x22d   :  { %2587 = vst.msk [vmem:[%s5466_s3 + $0x20] sm:$0xff] %vm2582_vm0, %v2542_v42  ;;  %v3035_v42 = vld [vmem:[%s5465_s0 + $0x330] sm:$0xf0] }
 0x22e   :  { %v2321_v1 = vpop.f32.mrf.mxu2  ;;  %v2086_v20 = vpop.f32.mrf.mxu0 }
 0x22f   :  { %v2440_v16 = vpop.f32.mrf.mxu3  ;;  %v2322_v13 = vadd.f32 %v2321_v1, %v2203_v0  ;;  %v2205_v32 = vpop.f32.mrf.mxu1  ;;  %v2087_v44 = vadd.f32 %v2086_v20, %v4322_v2  ;;  %v3033_v2 = vld [vmem:[%s5465_s0 + $0x310] sm:$0xf] }
 0x230   :  { %v3034_v1 = vor.u32 %v3693_v36, %v3033_v2  ;;  %v3067_v36 = vld [vmem:[%s5465_s0 + $0x370] sm:$0xf0] }
 0x231   :  { %v2441_v47 = vadd.f32 %v2440_v16, %v2322_v13  ;;  %2125 = vmatmul.bf16.gmra.mxu0 %v3002_v3  ;;  %v2206_v33 = vadd.f32 %v2205_v32, %v2087_v44  ;;  %v3038_v16 = vor.u32 %v3689_v59, %v3035_v42  ;;  %v3046_v32 = vor.u32 %v3690_v57, %v3043_v56  ;;  %v3702_v59 = vld [vmem:[%s5465_s0 + $0x374] sm:$0xf0]  ;;  %v3075_v42 = vld [vmem:[%s5465_s0 + $0x378] sm:$0xf0] }
 0x232   :  { %2244 = vmatmul.bf16.gmra.mxu1 %v3006_v12 }
 0x233   :  { %v2543_v52 = vmax.f32 %v2441_v47, 0.0  ;;  %2363 = vmatmul.bf16.gmra.mxu2 %v3010_v40 }
 0x234   :  { %2482 = vmatmul.bf16.gmra.mxu3 %v3014_v37 }
 0x235   :  { %2588 = vst.msk [vmem:[%s5466_s3 + $0x28] sm:$0xff] %vm2582_vm0, %v2543_v52 }
 0x236   :  { %v2324_v50 = vpop.f32.mrf.mxu2  ;;  %v2088_v54 = vpop.f32.mrf.mxu0 }
 0x237   :  { %v2443_v53 = vpop.f32.mrf.mxu3  ;;  %v2325_v39 = vadd.f32 %v2324_v50, %v2206_v33  ;;  %v2207_v26 = vpop.f32.mrf.mxu1  ;;  %v2089_v18 = vadd.f32 %v2088_v54, %v4349_v24  ;;  %v3041_v24 = vld [vmem:[%s5465_s0 + $0x318] sm:$0xf] }
 0x238   :  { %v3042_v20 = vor.u32 %v3694_v28, %v3041_v24 }
 0x239   :  { %v2444_v6 = vadd.f32 %v2443_v53, %v2325_v39  ;;  %v2208_v62 = vadd.f32 %v2207_v26, %v2089_v18  ;;  %v3697_v18 = vld [vmem:[%s5465_s0 + $0x354] sm:$0xf] }
 0x23b   :  { %v2544_v49 = vmax.f32 %v2444_v6, 0.0  ;;  %v3701_v6 = vld [vmem:[%s5465_s0 + $0x36c] sm:$0xf0] }
 0x23d   :  { %2589 = vst.msk [vmem:[%s5466_s3 + $0x30] sm:$0xff] %vm2582_vm0, %v2544_v49  ;;  %v3698_v49 = vld [vmem:[%s5465_s0 + $0x35c] sm:$0xf] }
 0x23e   :  { %v2326_v63 = vpop.f32.mrf.mxu2  ;;  %v2091_v12 = vpop.f32.mrf.mxu0 }
 0x23f   :  { %v2445_v0 = vpop.f32.mrf.mxu3  ;;  %v2327_v3 = vadd.f32 %v2326_v63, %v2208_v62  ;;  %v2210_v13 = vpop.f32.mrf.mxu1  ;;  %v2092_v37 = vadd.f32 %v2091_v12, %v4364_v38  ;;  %v3065_v38 = vld [vmem:[%s5465_s0 + $0x350] sm:$0xf]  ;;  %v3070_v62 = vor.u32 %v3697_v18, %v3067_v36  ;;  %v3107_v18 = vld [vmem:[%s5465_s0 + $0x3b8] sm:$0xf0] }
 0x240   :  { %v3066_v56 = vor.u32 %v3701_v6, %v3065_v38  ;;  %v3710_v38 = vld [vmem:[%s5465_s0 + $0x3b4] sm:$0xf0]  ;;  %v3706_v6 = vld [vmem:[%s5465_s0 + $0x39c] sm:$0xf] }
 0x241   :  { %v2446_v40 = vadd.f32 %v2445_v0, %v2327_v3  ;;  %2130 = vmatmul.bf16.gmra.mxu0 %v3034_v1  ;;  %v2211_v44 = vadd.f32 %v2210_v13, %v2092_v37  ;;  %v3078_v3 = vor.u32 %v3698_v49, %v3075_v42 }
 0x242   :  { %2249 = vmatmul.bf16.gmra.mxu1 %v3038_v16 }
 0x243   :  { %v2545_v47 = vmax.f32 %v2446_v40, 0.0  ;;  %2368 = vmatmul.bf16.gmra.mxu2 %v3042_v20 }
 0x244   :  { %2487 = vmatmul.bf16.gmra.mxu3 %v3046_v32 }
 0x245   :  { %2590 = vst.msk [vmem:[%s5466_s3 + $0x38] sm:$0xff] %vm2582_vm0, %v2545_v47 }
 0x246   :  { %v2329_v52 = vpop.f32.mrf.mxu2  ;;  %v2093_v53 = vpop.f32.mrf.mxu0 }
 0x247   :  { %v2448_v33 = vpop.f32.mrf.mxu3  ;;  %v2330_v50 = vadd.f32 %v2329_v52, %v2211_v44  ;;  %v2212_v39 = vpop.f32.mrf.mxu1  ;;  %v2094_v26 = vadd.f32 %v2093_v53, %v4391_v61  ;;  %v3073_v61 = vld [vmem:[%s5465_s0 + $0x358] sm:$0xf]  ;;  %v3709_v53 = vld [vmem:[%s5465_s0 + $0x3ac] sm:$0xf0] }
 0x248   :  { %v3074_v16 = vor.u32 %v3702_v59, %v3073_v61 }
 0x249   :  { %v2449_v54 = vadd.f32 %v2448_v33, %v2330_v50  ;;  %v2213_v24 = vadd.f32 %v2212_v39, %v2094_v26  ;;  %v3705_v39 = vld [vmem:[%s5465_s0 + $0x394] sm:$0xf] }
 0x24a   :  { %v3099_v26 = vld [vmem:[%s5465_s0 + $0x3b0] sm:$0xf0] }
 0x24b   :  { %v2546_v2 = vmax.f32 %v2449_v54, 0.0  ;;  %v3102_v49 = vor.u32 %v3705_v39, %v3099_v26 }
 0x24d   :  { %2591 = vst.msk [vmem:[%s5466_s3 + $0x40] sm:$0xff] %vm2582_vm0, %v2546_v2 }
 0x24e   :  { %v2331_v28 = vpop.f32.mrf.mxu2  ;;  %v2096_v0 = vpop.f32.mrf.mxu0 }
 0x24f   :  { %v2450_v57 = vpop.f32.mrf.mxu3  ;;  %v2332_v63 = vadd.f32 %v2331_v28, %v2213_v24  ;;  %v2215_v1 = vpop.f32.mrf.mxu1  ;;  %v2097_v13 = vadd.f32 %v2096_v0, %v4394_v7  ;;  %v3097_v7 = vld [vmem:[%s5465_s0 + $0x390] sm:$0xf] }
 0x250   :  { %v3098_v59 = vor.u32 %v3709_v53, %v3097_v7  ;;  %v3139_v7 = vld [vmem:[%s5465_s0 + $0x3f8] sm:$0xf0] }
 0x251   :  { %v2451_v12 = vadd.f32 %v2450_v57, %v2332_v63  ;;  %2135 = vmatmul.bf16.gmra.mxu0 %v3066_v56  ;;  %v2216_v32 = vadd.f32 %v2215_v1, %v2097_v13  ;;  %v3110_v56 = vor.u32 %v3706_v6, %v3107_v18 }
 0x252   :  { %2254 = vmatmul.bf16.gmra.mxu1 %v3070_v62 }
 0x253   :  { %v2547_v20 = vmax.f32 %v2451_v12, 0.0  ;;  %2373 = vmatmul.bf16.gmra.mxu2 %v3074_v16 }
 0x254   :  { %2492 = vmatmul.bf16.gmra.mxu3 %v3078_v3 }
 0x255   :  { %2592 = vst.msk [vmem:[%s5466_s3 + $0x48] sm:$0xff] %vm2582_vm0, %v2547_v20 }
 0x256   :  { %v2334_v40 = vpop.f32.mrf.mxu2  ;;  %v2098_v44 = vpop.f32.mrf.mxu0 }
 0x257   :  { %v2453_v37 = vpop.f32.mrf.mxu3  ;;  %v2335_v47 = vadd.f32 %v2334_v40, %v2216_v32  ;;  %v2217_v52 = vpop.f32.mrf.mxu1  ;;  %v2099_v50 = vadd.f32 %v2098_v44, %v4421_v30  ;;  %v3105_v30 = vld [vmem:[%s5465_s0 + $0x398] sm:$0xf] }
 0x258   :  { %v3106_v57 = vor.u32 %v3710_v38, %v3105_v30 }
 0x259   :  { %v2454_v33 = vadd.f32 %v2453_v37, %v2335_v47  ;;  %v2218_v2 = vadd.f32 %v2217_v52, %v2099_v50  ;;  %v3717_v37 = vld [vmem:[%s5465_s0 + $0x3ec] sm:$0xf0]  ;;  %v3713_v47 = vld [vmem:[%s5465_s0 + $0x3d4] sm:$0xf]  ;;  %v3714_v50 = vld [vmem:[%s5465_s0 + $0x3dc] sm:$0xf] }
 0x25a   :  { %v3131_v52 = vld [vmem:[%s5465_s0 + $0x3f0] sm:$0xf0] }
 0x25b   :  { %v2548_v54 = vmax.f32 %v2454_v33, 0.0  ;;  %v3718_v33 = vld [vmem:[%s5465_s0 + $0x3f4] sm:$0xf0]  ;;  %v3134_v30 = vor.u32 %v3713_v47, %v3131_v52 }
 0x25d   :  { %2593 = vst.msk [vmem:[%s5466_s3 + $0x50] sm:$0xff] %vm2582_vm0, %v2548_v54 }
 0x25e   :  { %v2336_v36 = vpop.f32.mrf.mxu2  ;;  %v2101_v24 = vpop.f32.mrf.mxu0 }
 0x25f   :  { %v2455_v61 = vpop.f32.mrf.mxu3  ;;  %v2337_v42 = vadd.f32 %v2336_v36, %v2218_v2  ;;  %v2220_v28 = vpop.f32.mrf.mxu1  ;;  %v2102_v63 = vadd.f32 %v2101_v24, %v4424_v41  ;;  %v3129_v41 = vld [vmem:[%s5465_s0 + $0x3d0] sm:$0xf]  ;;  %v3142_v36 = vor.u32 %v3714_v50, %v3139_v7 }
 0x260   :  { %v3130_v26 = vor.u32 %v3717_v37, %v3129_v41 }
 0x261   :  { %v2456_v62 = vadd.f32 %v2455_v61, %v2337_v42  ;;  %2140 = vmatmul.bf16.gmra.mxu0 %v3098_v59  ;;  %v2221_v1 = vadd.f32 %v2220_v28, %v2102_v63 }
 0x262   :  { %2259 = vmatmul.bf16.gmra.mxu1 %v3102_v49 }
 0x263   :  { %v2549_v0 = vmax.f32 %v2456_v62, 0.0  ;;  %2378 = vmatmul.bf16.gmra.mxu2 %v3106_v57 }
 0x264   :  { %2497 = vmatmul.bf16.gmra.mxu3 %v3110_v56 }
 0x265   :  { %2594 = vst.msk [vmem:[%s5466_s3 + $0x58] sm:$0xff] %vm2582_vm0, %v2549_v0 }
 0x266   :  { %v2339_v16 = vpop.f32.mrf.mxu2  ;;  %v2103_v13 = vpop.f32.mrf.mxu0 }
 0x267   :  { %v2458_v3 = vpop.f32.mrf.mxu3  ;;  %v2340_v12 = vadd.f32 %v2339_v16, %v2221_v1  ;;  %v2222_v20 = vpop.f32.mrf.mxu1  ;;  %v2104_v40 = vadd.f32 %v2103_v13, %v4460_v4  ;;  %v3137_v4 = vld [vmem:[%s5465_s0 + $0x3d8] sm:$0xf]  ;;  %v3725_v1 = vld [vmem:[%s5465_s0 + $0x42c] sm:$0xf0]  ;;  %v3721_v16 = vld [vmem:[%s5465_s0 + $0x414] sm:$0xf] }
 0x268   :  { %v3138_v2 = vor.u32 %v3718_v33, %v3137_v4  ;;  %v3726_v13 = vld [vmem:[%s5465_s0 + $0x434] sm:$0xf0] }
 0x269   :  { %v2459_v32 = vadd.f32 %v2458_v3, %v2340_v12  ;;  %v2223_v53 = vadd.f32 %v2222_v20, %v2104_v40  ;;  %v3163_v12 = vld [vmem:[%s5465_s0 + $0x430] sm:$0xf0]  ;;  %v3722_v20 = vld [vmem:[%s5465_s0 + $0x41c] sm:$0xf] }
 0x26b   :  { %v2550_v44 = vmax.f32 %v2459_v32, 0.0  ;;  %v3171_v32 = vld [vmem:[%s5465_s0 + $0x438] sm:$0xf0] }
 0x26c   :  { %v3174_v7 = vor.u32 %v3722_v20, %v3171_v32 }
 0x26d   :  { %2595 = vst.msk [vmem:[%s5466_s3 + $0x60] sm:$0xff] %vm2582_vm0, %v2550_v44  ;;  %v3166_v44 = vor.u32 %v3721_v16, %v3163_v12 }
 0x26e   :  { %v2341_v39 = vpop.f32.mrf.mxu2  ;;  %v2106_v6 = vpop.f32.mrf.mxu0 }
 0x26f   :  { %v2460_v54 = vpop.f32.mrf.mxu3  ;;  %v2342_v38 = vadd.f32 %v2341_v39, %v2223_v53  ;;  %v2225_v18 = vpop.f32.mrf.mxu1  ;;  %v2107_v59 = vadd.f32 %v2106_v6, %v4466_v15  ;;  %v3161_v15 = vld [vmem:[%s5465_s0 + $0x410] sm:$0xf] }
 0x270   :  { %v3162_v47 = vor.u32 %v3725_v1, %v3161_v15 }
 0x271   :  { %v2461_v61 = vadd.f32 %v2460_v54, %v2342_v38  ;;  %2145 = vmatmul.bf16.gmra.mxu0 %v3130_v26  ;;  %v2226_v42 = vadd.f32 %v2225_v18, %v2107_v59  ;;  %v3733_v59 = vld [vmem:[%s5465_s0 + $0x46c] sm:$0xf0] }
 0x272   :  { %2264 = vmatmul.bf16.gmra.mxu1 %v3134_v30 }
 0x273   :  { %v2551_v49 = vmax.f32 %v2461_v61, 0.0  ;;  %2383 = vmatmul.bf16.gmra.mxu2 %v3138_v2 }
 0x274   :  { %2502 = vmatmul.bf16.gmra.mxu3 %v3142_v36 }
 0x275   :  { %2596 = vst.msk [vmem:[%s5466_s3 + $0x68] sm:$0xff] %vm2582_vm0, %v2551_v49  ;;  %v3729_v49 = vld [vmem:[%s5465_s0 + $0x454] sm:$0xf] }
 0x276   :  { %v2344_v24 = vpop.f32.mrf.mxu2  ;;  %v2108_v56 = vpop.f32.mrf.mxu0 }
 0x277   :  { %v2463_v28 = vpop.f32.mrf.mxu3  ;;  %v2345_v57 = vadd.f32 %v2344_v24, %v2226_v42  ;;  %v2227_v62 = vpop.f32.mrf.mxu1  ;;  %v2109_v0 = vadd.f32 %v2108_v56, %v4493_v43  ;;  %v3169_v43 = vld [vmem:[%s5465_s0 + $0x418] sm:$0xf]  ;;  %v3195_v24 = vld [vmem:[%s5465_s0 + $0x470] sm:$0xf0]  ;;  %v3203_v56 = vld [vmem:[%s5465_s0 + $0x478] sm:$0xf0] }
 0x278   :  { %v3170_v50 = vor.u32 %v3726_v13, %v3169_v43  ;;  %v3198_v1 = vor.u32 %v3729_v49, %v3195_v24 }
 0x279   :  { %v2464_v63 = vadd.f32 %v2463_v28, %v2345_v57  ;;  %v2228_v40 = vadd.f32 %v2227_v62, %v2109_v0  ;;  %v3734_v28 = vld [vmem:[%s5465_s0 + $0x474] sm:$0xf0]  ;;  %v3730_v57 = vld [vmem:[%s5465_s0 + $0x45c] sm:$0xf] }
 0x27a   :  { %v3206_v13 = vor.u32 %v3730_v57, %v3203_v56 }
 0x27b   :  { %v2552_v3 = vmax.f32 %v2464_v63, 0.0 }
 0x27d   :  { %2597 = vst.msk [vmem:[%s5466_s3 + $0x70] sm:$0xff] %vm2582_vm0, %v2552_v3 }
 0x27e   :  { %v2346_v41 = vpop.f32.mrf.mxu2  ;;  %v2111_v4 = vpop.f32.mrf.mxu0 }
 0x27f   :  { %v2465_v37 = vpop.f32.mrf.mxu3  ;;  %v2347_v52 = vadd.f32 %v2346_v41, %v2228_v40  ;;  %v2230_v33 = vpop.f32.mrf.mxu1  ;;  %v2112_v39 = vadd.f32 %v2111_v4, %v4496_v51  ;;  %v3193_v51 = vld [vmem:[%s5465_s0 + $0x450] sm:$0xf] }
 0x280   :  { %v3194_v15 = vor.u32 %v3733_v59, %v3193_v51 }
 0x281   :  { %v2466_v53 = vadd.f32 %v2465_v37, %v2347_v52  ;;  %2150 = vmatmul.bf16.gmra.mxu0 %v3162_v47  ;;  %v2231_v26 = vadd.f32 %v2230_v33, %v2112_v39 }
 0x282   :  { %2269 = vmatmul.bf16.gmra.mxu1 %v3166_v44 }
 0x283   :  { %v2553_v54 = vmax.f32 %v2466_v53, 0.0  ;;  %2388 = vmatmul.bf16.gmra.mxu2 %v3170_v50  ;;  %v3737_v53 = vld [vmem:[%s5465_s0 + $0x494] sm:$0xf] }
 0x284   :  { %2507 = vmatmul.bf16.gmra.mxu3 %v3174_v7  ;;  %v3741_v7 = vld [vmem:[%s5465_s0 + $0x4ac] sm:$0xf0] }
 0x285   :  { %2598 = vst.msk [vmem:[%s5466_s3 + $0x78] sm:$0xff] %vm2582_vm0, %v2553_v54  ;;  %v3227_v54 = vld [vmem:[%s5465_s0 + $0x4b0] sm:$0xf0] }
 0x286   :  { %v2349_v30 = vpop.f32.mrf.mxu2  ;;  %v2113_v18 = vpop.f32.mrf.mxu0 }
 0x287   :  { %v2468_v38 = vpop.f32.mrf.mxu3  ;;  %v2350_v6 = vadd.f32 %v2349_v30, %v2231_v26  ;;  %v2232_v2 = vpop.f32.mrf.mxu1  ;;  %v2114_v61 = vadd.f32 %v2113_v18, %v4523_v14  ;;  %v3201_v14 = vld [vmem:[%s5465_s0 + $0x458] sm:$0xf]  ;;  %v3738_v30 = vld [vmem:[%s5465_s0 + $0x49c] sm:$0xf] }
 0x288   :  { %v3202_v43 = vor.u32 %v3734_v28, %v3201_v14  ;;  %v3742_v26 = vld [vmem:[%s5465_s0 + $0x4b4] sm:$0xf0] }
 0x289   :  { %v2469_v36 = vadd.f32 %v2468_v38, %v2350_v6  ;;  %v2233_v62 = vadd.f32 %v2232_v2, %v2114_v61  ;;  %v3235_v38 = vld [vmem:[%s5465_s0 + $0x4b8] sm:$0xf0]  ;;  %v3230_v61 = vor.u32 %v3737_v53, %v3227_v54 }
 0x28a   :  { %v3238_v24 = vor.u32 %v3738_v30, %v3235_v38 }
 0x28b   :  { %v2554_v42 = vmax.f32 %v2469_v36, 0.0 }
 0x28d   :  { %2599 = vst.msk [vmem:[%s5466_s3 + $0x80] sm:$0xff] %vm2582_vm0, %v2554_v42 }
 0x28e   :  { %v2351_v63 = vpop.f32.mrf.mxu2  ;;  %v2116_v3 = vpop.f32.mrf.mxu0 }
 0x28f   :  { %v2470_v0 = vpop.f32.mrf.mxu3  ;;  %v2352_v16 = vadd.f32 %v2351_v63, %v2233_v62  ;;  %v2235_v12 = vpop.f32.mrf.mxu1  ;;  %v2117_v32 = vadd.f32 %v2116_v3, %v4526_v25  ;;  %v3225_v25 = vld [vmem:[%s5465_s0 + $0x490] sm:$0xf] }
 0x290   :  { %v3226_v36 = vor.u32 %v3741_v7, %v3225_v25 }
 0x291   :  { %v2471_v20 = vadd.f32 %v2470_v0, %v2352_v16  ;;  %2155 = vmatmul.bf16.gmra.mxu0 %v3194_v15  ;;  %v2236_v41 = vadd.f32 %v2235_v12, %v2117_v32  ;;  %v3749_v12 = vld [vmem:[%s5465_s0 + $0x4ec] sm:$0xf0]  ;;  %v3750_v32 = vld [vmem:[%s5465_s0 + $0x4f4] sm:$0xf0] }
 0x292   :  { %2274 = vmatmul.bf16.gmra.mxu1 %v3198_v1 }
 0x293   :  { %v2555_v40 = vmax.f32 %v2471_v20, 0.0  ;;  %2393 = vmatmul.bf16.gmra.mxu2 %v3202_v43  ;;  %v3745_v43 = vld [vmem:[%s5465_s0 + $0x4d4] sm:$0xf] }
 0x294   :  { %2512 = vmatmul.bf16.gmra.mxu3 %v3206_v13  ;;  %v3259_v20 = vld [vmem:[%s5465_s0 + $0x4f0] sm:$0xf0] }
 0x295   :  { %2600 = vst.msk [vmem:[%s5466_s3 + $0x88] sm:$0xff] %vm2582_vm0, %v2555_v40  ;;  %v3746_v40 = vld [vmem:[%s5465_s0 + $0x4dc] sm:$0xf] }
 0x296   :  { %v2354_v37 = vpop.f32.mrf.mxu2  ;;  %v2118_v52 = vpop.f32.mrf.mxu0 }
 0x297   :  { %v2473_v47 = vpop.f32.mrf.mxu3  ;;  %v2355_v44 = vadd.f32 %v2354_v37, %v2236_v41  ;;  %v2237_v4 = vpop.f32.mrf.mxu1  ;;  %v2119_v50 = vadd.f32 %v2118_v52, %v4565_v58  ;;  %v3233_v58 = vld [vmem:[%s5465_s0 + $0x498] sm:$0xf]  ;;  %v3267_v41 = vld [vmem:[%s5465_s0 + $0x4f8] sm:$0xf0] }
 0x298   :  { %v3234_v42 = vor.u32 %v3742_v26, %v3233_v58  ;;  %v3270_v53 = vor.u32 %v3746_v40, %v3267_v41 }
 0x299   :  { %v2474_v33 = vadd.f32 %v2473_v47, %v2355_v44  ;;  %v2238_v6 = vadd.f32 %v2237_v4, %v2119_v50  ;;  %v3262_v4 = vor.u32 %v3745_v43, %v3259_v20 }
 0x29b   :  { %v2556_v39 = vmax.f32 %v2474_v33, 0.0 }
 0x29d   :  { %2601 = vst.msk [vmem:[%s5466_s3 + $0x90] sm:$0xff] %vm2582_vm0, %v2556_v39 }
 0x29e   :  { %v2356_v18 = vpop.f32.mrf.mxu2  ;;  %v2121_v59 = vpop.f32.mrf.mxu0 }
 0x29f   :  { %v2475_v2 = vpop.f32.mrf.mxu3  ;;  %v2357_v51 = vadd.f32 %v2356_v18, %v2238_v6  ;;  %v2240_v49 = vpop.f32.mrf.mxu1  ;;  %v2122_v28 = vadd.f32 %v2121_v59, %v4568_v8  ;;  %v3257_v8 = vld [vmem:[%s5465_s0 + $0x4d0] sm:$0xf]  ;;  %v3753_v59 = vld [vmem:[%s5465_s0 + $0x514] sm:$0xf] }
 0x2a0   :  { %v3258_v52 = vor.u32 %v3749_v12, %v3257_v8 }
 0x2a1   :  { %v2476_v14 = vadd.f32 %v2475_v2, %v2357_v51  ;;  %2160 = vmatmul.bf16.gmra.mxu0 %v3226_v36  ;;  %v2241_v56 = vadd.f32 %v2240_v49, %v2122_v28  ;;  %v3757_v51 = vld [vmem:[%s5465_s0 + $0x52c] sm:$0xf0]  ;;  %v3299_v28 = vld [vmem:[%s5465_s0 + $0x538] sm:$0xf0] }
 0x2a2   :  { %2279 = vmatmul.bf16.gmra.mxu1 %v3230_v61 }
 0x2a3   :  { %v2557_v57 = vmax.f32 %v2476_v14, 0.0  ;;  %2398 = vmatmul.bf16.gmra.mxu2 %v3234_v42  ;;  %v3291_v42 = vld [vmem:[%s5465_s0 + $0x530] sm:$0xf0]  ;;  %v3754_v14 = vld [vmem:[%s5465_s0 + $0x51c] sm:$0xf] }
 0x2a4   :  { %2517 = vmatmul.bf16.gmra.mxu3 %v3238_v24  ;;  %v3758_v24 = vld [vmem:[%s5465_s0 + $0x534] sm:$0xf0]  ;;  %v3302_v8 = vor.u32 %v3754_v14, %v3299_v28 }
 0x2a5   :  { %2602 = vst.msk [vmem:[%s5466_s3 + $0x98] sm:$0xff] %vm2582_vm0, %v2557_v57 }
 0x2a6   :  { %v2359_v62 = vpop.f32.mrf.mxu2  ;;  %v2123_v15 = vpop.f32.mrf.mxu0 }
 0x2a7   :  { %v2478_v63 = vpop.f32.mrf.mxu3  ;;  %v2360_v0 = vadd.f32 %v2359_v62, %v2241_v56  ;;  %v2242_v1 = vpop.f32.mrf.mxu1  ;;  %v2124_v3 = vadd.f32 %v2123_v15, %v4595_v35  ;;  %v3265_v35 = vld [vmem:[%s5465_s0 + $0x4d8] sm:$0xf] }
 0x2a8   :  { %v3266_v7 = vor.u32 %v3750_v32, %v3265_v35 }
 0x2a9   :  { %v2479_v16 = vadd.f32 %v2478_v63, %v2360_v0  ;;  %v2243_v37 = vadd.f32 %v2242_v1, %v2124_v3  ;;  %v3294_v0 = vor.u32 %v3753_v59, %v3291_v42 }
 0x2ab   :  { %v2558_v13 = vmax.f32 %v2479_v16, 0.0 }
 0x2ad   :  { %2603 = vst.msk [vmem:[%s5466_s3 + $0xa0] sm:$0xff] %vm2582_vm0, %v2558_v13 }
 0x2ae   :  { %v2361_v47 = vpop.f32.mrf.mxu2  ;;  %v2126_v50 = vpop.f32.mrf.mxu0 }
 0x2af   :  { %v2480_v44 = vpop.f32.mrf.mxu3  ;;  %v2362_v33 = vadd.f32 %v2361_v47, %v2243_v37  ;;  %v2245_v25 = vpop.f32.mrf.mxu1  ;;  %v2127_v54 = vadd.f32 %v2126_v50, %v4598_v48  ;;  %v3289_v48 = vld [vmem:[%s5465_s0 + $0x510] sm:$0xf]  ;;  %v3323_v50 = vld [vmem:[%s5465_s0 + $0x570] sm:$0xf0] }
 0x2b0   :  { %v3290_v63 = vor.u32 %v3757_v51, %v3289_v48 }
 0x2b1   :  { %v2481_v39 = vadd.f32 %v2480_v44, %v2362_v33  ;;  %2165 = vmatmul.bf16.gmra.mxu0 %v3258_v52  ;;  %v2246_v26 = vadd.f32 %v2245_v25, %v2127_v54  ;;  %v3765_v52 = vld [vmem:[%s5465_s0 + $0x56c] sm:$0xf0]  ;;  %v3766_v25 = vld [vmem:[%s5465_s0 + $0x574] sm:$0xf0] }
 0x2b2   :  { %2284 = vmatmul.bf16.gmra.mxu1 %v3262_v4  ;;  %v3761_v4 = vld [vmem:[%s5465_s0 + $0x554] sm:$0xf] }
 0x2b3   :  { %v2559_v58 = vmax.f32 %v2481_v39, 0.0  ;;  %2403 = vmatmul.bf16.gmra.mxu2 %v3266_v7  ;;  %v3762_v7 = vld [vmem:[%s5465_s0 + $0x55c] sm:$0xf] }
 0x2b4   :  { %2522 = vmatmul.bf16.gmra.mxu3 %v3270_v53  ;;  %v3331_v53 = vld [vmem:[%s5465_s0 + $0x578] sm:$0xf0] }
 0x2b5   :  { %2604 = vst.msk [vmem:[%s5466_s3 + $0xa8] sm:$0xff] %vm2582_vm0, %v2559_v58 }
 0x2b6   :  { %v2364_v30 = vpop.f32.mrf.mxu2  ;;  %v2128_v18 = vpop.f32.mrf.mxu0 }
 0x2b7   :  { %v2483_v38 = vpop.f32.mrf.mxu3  ;;  %v2365_v6 = vadd.f32 %v2364_v30, %v2246_v26  ;;  %v2247_v2 = vpop.f32.mrf.mxu1  ;;  %v2129_v61 = vadd.f32 %v2128_v18, %v4625_v17  ;;  %v3297_v17 = vld [vmem:[%s5465_s0 + $0x518] sm:$0xf]  ;;  %v3326_v30 = vor.u32 %v3761_v4, %v3323_v50 }
 0x2b8   :  { %v3298_v3 = vor.u32 %v3758_v24, %v3297_v17 }
 0x2b9   :  { %v2484_v36 = vadd.f32 %v2483_v38, %v2365_v6  ;;  %v2248_v57 = vadd.f32 %v2247_v2, %v2129_v61 }
 0x2bb   :  { %v2560_v49 = vmax.f32 %v2484_v36, 0.0  ;;  %v3334_v36 = vor.u32 %v3762_v7, %v3331_v53 }
 0x2bd   :  { %2605 = vst.msk [vmem:[%s5466_s3 + $0xb0] sm:$0xff] %vm2582_vm0, %v2560_v49 }
 0x2be   :  { %v2366_v56 = vpop.f32.mrf.mxu2  ;;  %v2131_v1 = vpop.f32.mrf.mxu0 }
 0x2bf   :  { %v2485_v62 = vpop.f32.mrf.mxu3  ;;  %v2367_v15 = vadd.f32 %v2366_v56, %v2248_v57  ;;  %v2250_v16 = vpop.f32.mrf.mxu1  ;;  %v2132_v43 = vadd.f32 %v2131_v1, %v4628_v27  ;;  %v3321_v27 = vld [vmem:[%s5465_s0 + $0x550] sm:$0xf] }
 0x2c0   :  { %v3322_v26 = vor.u32 %v3765_v52, %v3321_v27 }
 0x2c1   :  { %v2486_v12 = vadd.f32 %v2485_v62, %v2367_v15  ;;  %2170 = vmatmul.bf16.gmra.mxu0 %v3290_v63  ;;  %v2251_v20 = vadd.f32 %v2250_v16, %v2132_v43 }
 0x2c2   :  { %2289 = vmatmul.bf16.gmra.mxu1 %v3294_v0 }
 0x2c3   :  { %v2561_v13 = vmax.f32 %v2486_v12, 0.0  ;;  %2408 = vmatmul.bf16.gmra.mxu2 %v3298_v3 }
 0x2c4   :  { %2527 = vmatmul.bf16.gmra.mxu3 %v3302_v8 }
 0x2c5   :  { %2606 = vst.msk [vmem:[%s5466_s3 + $0xb8] sm:$0xff] %vm2582_vm0, %v2561_v13 }
 0x2c6   :  { %v2369_v35 = vpop.f32.mrf.mxu2  ;;  %v2133_v41 = vpop.f32.mrf.mxu0 }
 0x2c7   :  { %v2488_v32 = vpop.f32.mrf.mxu3  ;;  %v2370_v40 = vadd.f32 %v2369_v35, %v2251_v20  ;;  %v2252_v37 = vpop.f32.mrf.mxu1  ;;  %v2134_v44 = vadd.f32 %v2133_v41, %v4655_v60  ;;  %v3329_v60 = vld [vmem:[%s5465_s0 + $0x558] sm:$0xf] }
 0x2c8   :  { %v3330_v2 = vor.u32 %v3766_v25, %v3329_v60 }
 0x2c9   :  { %v2489_v47 = vadd.f32 %v2488_v32, %v2370_v40  ;;  %v2253_v39 = vadd.f32 %v2252_v37, %v2134_v44 }
 0x2cb   :  { %v2562_v33 = vmax.f32 %v2489_v47, 0.0 }
 0x2cd   :  { %2607 = vst.msk [vmem:[%s5466_s3 + $0xc0] sm:$0xff] %vm2582_vm0, %v2562_v33 }
 0x2ce   :  { %v2371_v54 = vpop.f32.mrf.mxu2  ;;  %v2136_v6 = vpop.f32.mrf.mxu0 }
 0x2cf   :  { %v2490_v58 = vpop.f32.mrf.mxu3  ;;  %v2372_v38 = vadd.f32 %v2371_v54, %v2253_v39  ;;  %v2255_v18 = vpop.f32.mrf.mxu1  ;;  %v2137_v48 = vadd.f32 %v2136_v6, %v4658_v10 }
 0x2d1   :  { %v2491_v61 = vadd.f32 %v2490_v58, %v2372_v38  ;;  %2175 = vmatmul.bf16.gmra.mxu0 %v3322_v26  ;;  %v2256_v59 = vadd.f32 %v2255_v18, %v2137_v48 }
 0x2d2   :  { %2294 = vmatmul.bf16.gmra.mxu1 %v3326_v30 }
 0x2d3   :  { %v2563_v51 = vmax.f32 %v2491_v61, 0.0  ;;  %2413 = vmatmul.bf16.gmra.mxu2 %v3330_v2 }
 0x2d4   :  { %2532 = vmatmul.bf16.gmra.mxu3 %v3334_v36 }
 0x2d5   :  { %2608 = vst.msk [vmem:[%s5466_s3 + $0xc8] sm:$0xff] %vm2582_vm0, %v2563_v51 }
 0x2d6   :  { %v2374_v49 = vpop.f32.mrf.mxu2  ;;  %v2138_v24 = vpop.f32.mrf.mxu0 }
 0x2d7   :  { %v2493_v42 = vpop.f32.mrf.mxu3  ;;  %v2375_v17 = vadd.f32 %v2374_v49, %v2256_v59  ;;  %v2257_v14 = vpop.f32.mrf.mxu1  ;;  %v2139_v57 = vadd.f32 %v2138_v24, %v4685_v45 }
 0x2d9   :  { %v2494_v28 = vadd.f32 %v2493_v42, %v2375_v17  ;;  %v2258_v56 = vadd.f32 %v2257_v14, %v2139_v57 }
 0x2db   :  { %v2564_v10 = vmax.f32 %v2494_v28, 0.0 }
 0x2dd   :  { %2609 = vst.msk [vmem:[%s5466_s3 + $0xd0] sm:$0xff] %vm2582_vm0, %v2564_v10 }
 0x2de   :  { %v2376_v62 = vpop.f32.mrf.mxu2  ;;  %v2141_v15 = vpop.f32.mrf.mxu0 }
 0x2df   :  { %v2495_v63 = vpop.f32.mrf.mxu3  ;;  %v2377_v0 = vadd.f32 %v2376_v62, %v2258_v56  ;;  %v2260_v1 = vpop.f32.mrf.mxu1  ;;  %v2142_v3 = vadd.f32 %v2141_v15, %v4688_v55 }
 0x2e1   :  { %v2496_v16 = vadd.f32 %v2495_v63, %v2377_v0  ;;  %v2261_v45 = vadd.f32 %v2260_v1, %v2142_v3 }
 0x2e3   :  { %v2565_v8 = vmax.f32 %v2496_v16, 0.0 }
 0x2e5   :  { %2610 = vst.msk [vmem:[%s5466_s3 + $0xd8] sm:$0xff] %vm2582_vm0, %v2565_v8 }
 0x2e6   :  { %v2379_v12 = vpop.f32.mrf.mxu2  ;;  %v2143_v20 = vpop.f32.mrf.mxu0 }
 0x2e7   :  { %v2498_v43 = vpop.f32.mrf.mxu3  ;;  %v2380_v13 = vadd.f32 %v2379_v12, %v2261_v45  ;;  %v2262_v35 = vpop.f32.mrf.mxu1  ;;  %v2144_v40 = vadd.f32 %v2143_v20, %v4720_v31 }
 0x2e9   :  { %v2499_v32 = vadd.f32 %v2498_v43, %v2380_v13  ;;  %v2263_v55 = vadd.f32 %v2262_v35, %v2144_v40 }
 0x2eb   :  { %v2566_v41 = vmax.f32 %v2499_v32, 0.0 }
 0x2ed   :  { %2611 = vst.msk [vmem:[%s5466_s3 + $0xe0] sm:$0xff] %vm2582_vm0, %v2566_v41 }
 0x2ee   :  { %v2381_v37 = vpop.f32.mrf.mxu2  ;;  %v2146_v27 = vpop.f32.mrf.mxu0 }
 0x2ef   :  { %v2500_v47 = vpop.f32.mrf.mxu3  ;;  %v2382_v44 = vadd.f32 %v2381_v37, %v2263_v55  ;;  %v2265_v52 = vpop.f32.mrf.mxu1  ;;  %v2147_v33 = vadd.f32 %v2146_v27, %v4723_v46 }
 0x2f1   :  { %v2501_v4 = vadd.f32 %v2500_v47, %v2382_v44  ;;  %v2266_v31 = vadd.f32 %v2265_v52, %v2147_v33 }
 0x2f3   :  { %v2567_v50 = vmax.f32 %v2501_v4, 0.0 }
 0x2f5   :  { %2612 = vst.msk [vmem:[%s5466_s3 + $0xe8] sm:$0xff] %vm2582_vm0, %v2567_v50 }
 0x2f6   :  { %v2384_v60 = vpop.f32.mrf.mxu2  ;;  %v2148_v53 = vpop.f32.mrf.mxu0 }
 0x2f7   :  { %v2503_v25 = vpop.f32.mrf.mxu3  ;;  %v2385_v7 = vadd.f32 %v2384_v60, %v2266_v31  ;;  %v2267_v39 = vpop.f32.mrf.mxu1  ;;  %v2149_v58 = vadd.f32 %v2148_v53, %v4750_v19 }
 0x2f9   :  { %v2504_v54 = vadd.f32 %v2503_v25, %v2385_v7  ;;  %v2268_v46 = vadd.f32 %v2267_v39, %v2149_v58 }
 0x2fb   :  { %v2568_v26 = vmax.f32 %v2504_v54, 0.0 }
 0x2fd   :  { %2613 = vst.msk [vmem:[%s5466_s3 + $0xf0] sm:$0xff] %vm2582_vm0, %v2568_v26 }
 0x2fe   :  { %v2386_v30 = vpop.f32.mrf.mxu2  ;;  %v2151_v18 = vpop.f32.mrf.mxu0 }
 0x2ff   :  { %v2505_v38 = vpop.f32.mrf.mxu3  ;;  %v2387_v6 = vadd.f32 %v2386_v30, %v2268_v46  ;;  %v2270_v2 = vpop.f32.mrf.mxu1  ;;  %v2152_v61 = vadd.f32 %v2151_v18, %v4753_v34  ;;  %v5471_v46 = vld [vmem:[#allocation2_spill] sm:$0xff] }
 0x301   :  { %v2506_v36 = vadd.f32 %v2505_v38, %v2387_v6  ;;  %v2271_v19 = vadd.f32 %v2270_v2, %v2152_v61 }
 0x303   :  { %v2569_v48 = vmax.f32 %v2506_v36, 0.0 }
 0x305   :  { %2614 = vst.msk [vmem:[%s5466_s3 + $0xf8] sm:$0xff] %vm2582_vm0, %v2569_v48 }
 0x306   :  { %v2389_v51 = vpop.f32.mrf.mxu2  ;;  %v2153_v42 = vpop.f32.mrf.mxu0 }
 0x307   :  { %v2508_v59 = vpop.f32.mrf.mxu3  ;;  %v2390_v49 = vadd.f32 %v2389_v51, %v2271_v19  ;;  %v2272_v17 = vpop.f32.mrf.mxu1  ;;  %v2154_v14 = vadd.f32 %v2153_v42, %v4780_v11  ;;  %v5472_v19 = vld [vmem:[#allocation3_spill] sm:$0xff] }
 0x309   :  { %v2509_v24 = vadd.f32 %v2508_v59, %v2390_v49  ;;  %v2273_v34 = vadd.f32 %v2272_v17, %v2154_v14 }
 0x30b   :  { %v2570_v28 = vmax.f32 %v2509_v24, 0.0 }
 0x30d   :  { %2615 = vst.msk [vmem:[%s5466_s3 + $0x100] sm:$0xff] %vm2582_vm0, %v2570_v28 }
 0x30e   :  { %v2391_v57 = vpop.f32.mrf.mxu2  ;;  %v2156_v62 = vpop.f32.mrf.mxu0 }
 0x30f   :  { %v2510_v10 = vpop.f32.mrf.mxu3  ;;  %v2392_v56 = vadd.f32 %v2391_v57, %v2273_v34  ;;  %v2275_v63 = vpop.f32.mrf.mxu1  ;;  %v2157_v15 = vadd.f32 %v2156_v62, %v4783_v29  ;;  %v5473_v57 = vld [vmem:[#allocation4_spill] sm:$0xff] }
 0x311   :  { %v2511_v0 = vadd.f32 %v2510_v10, %v2392_v56  ;;  %v2276_v11 = vadd.f32 %v2275_v63, %v2157_v15 }
 0x313   :  { %v2571_v1 = vmax.f32 %v2511_v0, 0.0 }
 0x315   :  { %2616 = vst.msk [vmem:[%s5466_s3 + $0x108] sm:$0xff] %vm2582_vm0, %v2571_v1 }
 0x316   :  { %v2394_v16 = vpop.f32.mrf.mxu2  ;;  %v2158_v45 = vpop.f32.mrf.mxu0 }
 0x317   :  { %v2513_v3 = vpop.f32.mrf.mxu3  ;;  %v2395_v8 = vadd.f32 %v2394_v16, %v2276_v11  ;;  %v2277_v12 = vpop.f32.mrf.mxu1  ;;  %v2159_v13 = vadd.f32 %v2158_v45, %v4810_v5 }
 0x319   :  { %v2514_v43 = vadd.f32 %v2513_v3, %v2395_v8  ;;  %v2278_v29 = vadd.f32 %v2277_v12, %v2159_v13 }
 0x31b   :  { %v2572_v20 = vmax.f32 %v2514_v43, 0.0 }
 0x31d   :  { %2617 = vst.msk [vmem:[%s5466_s3 + $0x110] sm:$0xff] %vm2582_vm0, %v2572_v20 }
 0x31e   :  { %v2396_v35 = vpop.f32.mrf.mxu2  ;;  %v2161_v41 = vpop.f32.mrf.mxu0 }
 0x31f   :  { %v2515_v32 = vpop.f32.mrf.mxu3  ;;  %v2397_v40 = vadd.f32 %v2396_v35, %v2278_v29  ;;  %v2280_v55 = vpop.f32.mrf.mxu1  ;;  %v2162_v47 = vadd.f32 %v2161_v41, %v4813_v23  ;;  %v5474_v35 = vld [vmem:[#allocation5_spill] sm:$0xff] }
 0x321   :  { %v2516_v37 = vadd.f32 %v2515_v32, %v2397_v40  ;;  %v2281_v5 = vadd.f32 %v2280_v55, %v2162_v47 }
 0x323   :  { %v2573_v44 = vmax.f32 %v2516_v37, 0.0 }
 0x325   :  { %2618 = vst.msk [vmem:[%s5466_s3 + $0x118] sm:$0xff] %vm2582_vm0, %v2573_v44 }
 0x326   :  { %v2399_v27 = vpop.f32.mrf.mxu2  ;;  %v2163_v33 = vpop.f32.mrf.mxu0 }
 0x327   :  { %v2518_v52 = vpop.f32.mrf.mxu3  ;;  %v2400_v4 = vadd.f32 %v2399_v27, %v2281_v5  ;;  %v2282_v50 = vpop.f32.mrf.mxu1  ;;  %v2164_v60 = vadd.f32 %v2163_v33, %v4840_v9 }
 0x329   :  { %v2519_v31 = vadd.f32 %v2518_v52, %v2400_v4  ;;  %v2283_v23 = vadd.f32 %v2282_v50, %v2164_v60 }
 0x32b   :  { %v2574_v25 = vmax.f32 %v2519_v31, 0.0 }
 0x32d   :  { %2619 = vst.msk [vmem:[%s5466_s3 + $0x120] sm:$0xff] %vm2582_vm0, %v2574_v25 }
 0x32e   :  { %v2401_v7 = vpop.f32.mrf.mxu2  ;;  %v2166_v54 = vpop.f32.mrf.mxu0 }
 0x32f   :  { %v2520_v53 = vpop.f32.mrf.mxu3  ;;  %v2402_v39 = vadd.f32 %v2401_v7, %v2283_v23  ;;  %v2285_v58 = vpop.f32.mrf.mxu1  ;;  %v2167_v30 = vadd.f32 %v2166_v54, %v5471_v46 }
 0x331   :  { %v2521_v26 = vadd.f32 %v2520_v53, %v2402_v39  ;;  %v2286_v9 = vadd.f32 %v2285_v58, %v2167_v30 }
 0x333   :  { %v2575_v38 = vmax.f32 %v2521_v26, 0.0 }
 0x335   :  { %2620 = vst.msk [vmem:[%s5466_s3 + $0x128] sm:$0xff] %vm2582_vm0, %v2575_v38 }
 0x336   :  { %v2404_v6 = vpop.f32.mrf.mxu2  ;;  %v2168_v36 = vpop.f32.mrf.mxu0 }
 0x337   :  { %v2523_v18 = vpop.f32.mrf.mxu3  ;;  %v2405_v2 = vadd.f32 %v2404_v6, %v2286_v9  ;;  %v2287_v61 = vpop.f32.mrf.mxu1  ;;  %v2169_v51 = vadd.f32 %v2168_v36, %v5472_v19 }
 0x339   :  { %v2524_v48 = vadd.f32 %v2523_v18, %v2405_v2  ;;  %v2288_v49 = vadd.f32 %v2287_v61, %v2169_v51 }
 0x33b   :  { %v2576_v59 = vmax.f32 %v2524_v48, 0.0 }
 0x33d   :  { %2621 = vst.msk [vmem:[%s5466_s3 + $0x130] sm:$0xff] %vm2582_vm0, %v2576_v59 }
 0x33e   :  { %v2406_v42 = vpop.f32.mrf.mxu2  ;;  %v2171_v14 = vpop.f32.mrf.mxu0 }
 0x33f   :  { %v2525_v17 = vpop.f32.mrf.mxu3  ;;  %v2407_v24 = vadd.f32 %v2406_v42, %v2288_v49  ;;  %v2290_v28 = vpop.f32.mrf.mxu1  ;;  %v2172_v10 = vadd.f32 %v2171_v14, %v5473_v57 }
 0x341   :  { %v2526_v34 = vadd.f32 %v2525_v17, %v2407_v24  ;;  %v2291_v62 = vadd.f32 %v2290_v28, %v2172_v10 }
 0x343   :  { %v2577_v56 = vmax.f32 %v2526_v34, 0.0 }
 0x345   :  { %2622 = vst.msk [vmem:[%s5466_s3 + $0x138] sm:$0xff] %vm2582_vm0, %v2577_v56 }
 0x346   :  { %v2409_v63 = vpop.f32.mrf.mxu2  ;;  %v2173_v1 = vpop.f32.mrf.mxu0 }
 0x347   :  { %v2528_v0 = vpop.f32.mrf.mxu3  ;;  %v2410_v15 = vadd.f32 %v2409_v63, %v2291_v62  ;;  %v2292_v11 = vpop.f32.mrf.mxu1  ;;  %v2174_v3 = vadd.f32 %v2173_v1, %v4900_v22 }
 0x349   :  { %v2529_v16 = vadd.f32 %v2528_v0, %v2410_v15  ;;  %v2293_v45 = vadd.f32 %v2292_v11, %v2174_v3 }
 0x34b   :  { %v2578_v8 = vmax.f32 %v2529_v16, 0.0 }
 0x34d   :  { %2623 = vst.msk [vmem:[%s5466_s3 + $0x140] sm:$0xff] %vm2582_vm0, %v2578_v8 }
 0x34e   :  { %v2411_v12 = vpop.f32.mrf.mxu2  ;;  %v2176_v20 = vpop.f32.mrf.mxu0 }
 0x34f   :  { %v2530_v43 = vpop.f32.mrf.mxu3  ;;  %v2412_v13 = vadd.f32 %v2411_v12, %v2293_v45  ;;  %v2177_v32 = vadd.f32 %v2176_v20, %v5474_v35  ;;  %v2295_v40 = vpop.f32.mrf.mxu1 }
 0x351   :  { %v2531_v29 = vadd.f32 %v2530_v43, %v2412_v13  ;;  %v2296_v22 = vadd.f32 %v2295_v40, %v2177_v32 }
 0x353   :  { %v2579_v41 = vmax.f32 %v2531_v29, 0.0 }
 0x355   :  { %2624 = vst.msk [vmem:[%s5466_s3 + $0x148] sm:$0xff] %vm2582_vm0, %v2579_v41 }
 0x356   :  { %v2414_v55 = vpop.f32.mrf.mxu2  ;;  %v2178_v44 = vpop.f32.mrf.mxu0 }
 0x357   :  { %v2533_v37 = vpop.f32.mrf.mxu3  ;;  %v2415_v47 = vadd.f32 %v2414_v55, %v2296_v22  ;;  %v2179_v27 = vadd.f32 %v2178_v44, %v4929_v21  ;;  %v2297_v4 = vpop.f32.mrf.mxu1 }
 0x359   :  { %v2534_v5 = vadd.f32 %v2533_v37, %v2415_v47  ;;  %v2298_v33 = vadd.f32 %v2297_v4, %v2179_v27 }
 0x35b   :  { %v2580_v52 = vmax.f32 %v2534_v5, 0.0 }
 0x35d   :  { %2625 = vst.msk [vmem:[%s5466_s3 + $0x150] sm:$0xff] %vm2582_vm0, %v2580_v52 }
 0x35e   :  { %v2416_v50 = vpop.f32.mrf.mxu2 }
 0x35f   :  { %v2417_v31 = vadd.f32 %v2416_v50, %v2298_v33  ;;  %v2535_v60 = vpop.f32.mrf.mxu3 }
 0x361   :  { %v2536_v25 = vadd.f32 %v2535_v60, %v2417_v31 }
 0x363   :  { %v2581_v23 = vmax.f32 %v2536_v25, 0.0 }
 0x365   :  { %2626 = vst.msk [vmem:[%s5466_s3 + $0x158] sm:$0xff] %vm2582_vm0, %v2581_v23 }

// kernel: bigcnn_forward.6
= control target key start
LH: loop header
LB: loop body
LE: loop exit
PB: predicated region body
PF: predicated region fallthrough
CT: control target
= control target key end

     0   :  { %s1938_s1 = inlined_call_operand.vmem [shape: bf16[1024,128], index: 1, kind: input, shape index: {}]   ;;  %s1939_s2 = inlined_call_operand.vmem [shape: f32[1,128], index: 2, kind: input, shape index: {}]   ;;  %s1940_s0 = inlined_call_operand.vmem [shape: bf16[64,1024], index: 0, kind: input, shape index: {}]   ;;  %s1941_s3 = inlined_call_operand.vmem [shape: f32[64,128], index: 3, kind: output, shape index: {}]  }
   0x1   :  { %v1397_v0 = vld [vmem:[%s1938_s1 + $0x38] sm:$0xff]  ;;  %v1396_v4 = vld [vmem:[%s1938_s1 + $0x30] sm:$0xff]  ;;  %v1395_v8 = vld [vmem:[%s1938_s1 + $0x28] sm:$0xff] }
   0x2   :  { %v1405_v1 = vld [vmem:[%s1938_s1 + $0x78] sm:$0xff]  ;;  %722 = vmatpush.bf16.msra.mxu0 %v1397_v0  ;;  %v1404_v5 = vld [vmem:[%s1938_s1 + $0x70] sm:$0xff]  ;;  %v1403_v9 = vld [vmem:[%s1938_s1 + $0x68] sm:$0xff] }
   0x3   :  { %v1413_v2 = vld [vmem:[%s1938_s1 + $0xb8] sm:$0xff]  ;;  %751 = vmatpush.bf16.msra.mxu1 %v1405_v1  ;;  %v1412_v6 = vld [vmem:[%s1938_s1 + $0xb0] sm:$0xff]  ;;  %v1411_v10 = vld [vmem:[%s1938_s1 + $0xa8] sm:$0xff] }
   0x4   :  { %v1421_v3 = vld [vmem:[%s1938_s1 + $0xf8] sm:$0xff]  ;;  %780 = vmatpush.bf16.msra.mxu2 %v1413_v2  ;;  %v1420_v7 = vld [vmem:[%s1938_s1 + $0xf0] sm:$0xff]  ;;  %v1419_v11 = vld [vmem:[%s1938_s1 + $0xe8] sm:$0xff] }
   0x5   :  { %809 = vmatpush.bf16.msra.mxu3 %v1421_v3  ;;  %v1394_v12 = vld [vmem:[%s1938_s1 + $0x20] sm:$0xff]  ;;  %v1393_v16 = vld [vmem:[%s1938_s1 + $0x18] sm:$0xff]  ;;  %v1392_v20 = vld [vmem:[%s1938_s1 + $0x10] sm:$0xff] }
   0x6   :  { %723 = vmatpush.bf16.msra.mxu0 %v1396_v4  ;;  %v1402_v13 = vld [vmem:[%s1938_s1 + $0x60] sm:$0xff]  ;;  %v1401_v17 = vld [vmem:[%s1938_s1 + $0x58] sm:$0xff]  ;;  %v1400_v21 = vld [vmem:[%s1938_s1 + $0x50] sm:$0xff] }
   0x7   :  { %752 = vmatpush.bf16.msra.mxu1 %v1404_v5  ;;  %v1410_v14 = vld [vmem:[%s1938_s1 + $0xa0] sm:$0xff]  ;;  %v1409_v18 = vld [vmem:[%s1938_s1 + $0x98] sm:$0xff]  ;;  %v1408_v22 = vld [vmem:[%s1938_s1 + $0x90] sm:$0xff] }
   0x8   :  { %781 = vmatpush.bf16.msra.mxu2 %v1412_v6  ;;  %v1418_v15 = vld [vmem:[%s1938_s1 + $0xe0] sm:$0xff]  ;;  %v1417_v19 = vld [vmem:[%s1938_s1 + $0xd8] sm:$0xff]  ;;  %v1416_v23 = vld [vmem:[%s1938_s1 + $0xd0] sm:$0xff] }
   0x9   :  { %810 = vmatpush.bf16.msra.mxu3 %v1420_v7  ;;  %v1391_v24 = vld [vmem:[%s1938_s1 + $0x8] sm:$0xff]  ;;  %v1390_v28 = vld [vmem:[%s1938_s1] sm:$0xff]  ;;  %v1445_v40 = vld [vmem:[%s1938_s1 + $0x1b8] sm:$0xff] }
   0xa   :  { %724 = vmatpush.bf16.msra.mxu0 %v1395_v8  ;;  %v1399_v25 = vld [vmem:[%s1938_s1 + $0x48] sm:$0xff]  ;;  %v1398_v29 = vld [vmem:[%s1938_s1 + $0x40] sm:$0xff]  ;;  %v1429_v41 = vld [vmem:[%s1938_s1 + $0x138] sm:$0xff] }
   0xb   :  { %753 = vmatpush.bf16.msra.mxu1 %v1403_v9  ;;  %v1407_v26 = vld [vmem:[%s1938_s1 + $0x88] sm:$0xff]  ;;  %v1406_v30 = vld [vmem:[%s1938_s1 + $0x80] sm:$0xff]  ;;  %v1453_v46 = vld [vmem:[%s1938_s1 + $0x1f8] sm:$0xff] }
   0xc   :  { %782 = vmatpush.bf16.msra.mxu2 %v1411_v10  ;;  %v1415_v27 = vld [vmem:[%s1938_s1 + $0xc8] sm:$0xff]  ;;  %v1414_v31 = vld [vmem:[%s1938_s1 + $0xc0] sm:$0xff]  ;;  %v1437_v47 = vld [vmem:[%s1938_s1 + $0x178] sm:$0xff] }
   0xd   :  { %811 = vmatpush.bf16.msra.mxu3 %v1419_v11  ;;  %v976_v32 = vld [vmem:[%s1940_s0] sm:$0xf]  ;;  %v1358_v34 = vld [vmem:[%s1940_s0 + $0x4] sm:$0xf]  ;;  %v984_v36 = vld [vmem:[%s1940_s0 + $0x8] sm:$0xf] }
   0xe   :  { %725 = vmatpush.bf16.msra.mxu0 %v1394_v12  ;;  %v1362_v33 = vld [vmem:[%s1940_s0 + $0x1c] sm:$0xf0]  ;;  %v978_v35 = vld [vmem:[%s1940_s0 + $0x20] sm:$0xf0]  ;;  %v1363_v37 = vld [vmem:[%s1940_s0 + $0x24] sm:$0xf0] }
   0xf   :  { %754 = vmatpush.bf16.msra.mxu1 %v1402_v13  ;;  %v1359_v38 = vld [vmem:[%s1940_s0 + $0xc] sm:$0xf]  ;;  %v977_v42 = vor.u32 %v1362_v33, %v976_v32  ;;  %v981_v43 = vor.u32 %v1358_v34, %v978_v35  ;;  %v985_v44 = vor.u32 %v1363_v37, %v984_v36  ;;  %v1444_v48 = vld [vmem:[%s1938_s1 + $0x1b0] sm:$0xff]  ;;  %v1008_v56 = vld [vmem:[%s1940_s0 + $0x40] sm:$0xf] }
  0x10   :  { %783 = vmatpush.bf16.msra.mxu2 %v1410_v14  ;;  %v986_v39 = vld [vmem:[%s1940_s0 + $0x28] sm:$0xf0]  ;;  %v1428_v49 = vld [vmem:[%s1938_s1 + $0x130] sm:$0xff]  ;;  %v1442_v57 = vld [vmem:[%s1938_s1 + $0x1a0] sm:$0xff] }
  0x11   :  { %812 = vmatpush.bf16.msra.mxu3 %v1418_v15  ;;  %v989_v45 = vor.u32 %v1359_v38, %v986_v39  ;;  %v1452_v50 = vld [vmem:[%s1938_s1 + $0x1f0] sm:$0xff]  ;;  %v1443_v52 = vld [vmem:[%s1938_s1 + $0x1a8] sm:$0xff]  ;;  %v1426_v58 = vld [vmem:[%s1938_s1 + $0x120] sm:$0xff] }
  0x12   :  { %726 = vmatpush.bf16.msra.mxu0 %v1393_v16  ;;  %v1436_v51 = vld [vmem:[%s1938_s1 + $0x170] sm:$0xff]  ;;  %v1427_v53 = vld [vmem:[%s1938_s1 + $0x128] sm:$0xff]  ;;  %v1370_v59 = vld [vmem:[%s1940_s0 + $0x5c] sm:$0xf0] }
  0x13   :  { %755 = vmatpush.bf16.msra.mxu1 %v1401_v17  ;;  %v1451_v54 = vld [vmem:[%s1938_s1 + $0x1e8] sm:$0xff]  ;;  %v1366_v60 = vld [vmem:[%s1940_s0 + $0x44] sm:$0xf]  ;;  %v1441_v4 = vld [vmem:[%s1938_s1 + $0x198] sm:$0xff]  ;;  %v1009_v6 = vor.u32 %v1370_v59, %v1008_v56 }
  0x14   :  { %784 = vmatpush.bf16.msra.mxu2 %v1409_v18  ;;  %v1435_v55 = vld [vmem:[%s1938_s1 + $0x168] sm:$0xff]  ;;  %v1010_v61 = vld [vmem:[%s1940_s0 + $0x60] sm:$0xf0]  ;;  %v1425_v5 = vld [vmem:[%s1938_s1 + $0x118] sm:$0xff] }
  0x15   :  { %813 = vmatpush.bf16.msra.mxu3 %v1417_v19  ;;  %v1016_v62 = vld [vmem:[%s1940_s0 + $0x48] sm:$0xf]  ;;  %v1367_v0 = vld [vmem:[%s1940_s0 + $0x4c] sm:$0xf]  ;;  %v1450_v2 = vld [vmem:[%s1938_s1 + $0x1e0] sm:$0xff]  ;;  %v1013_v7 = vor.u32 %v1366_v60, %v1010_v61 }
  0x16   :  { %727 = vmatpush.bf16.msra.mxu0 %v1392_v20  ;;  %v1371_v63 = vld [vmem:[%s1940_s0 + $0x64] sm:$0xf0]  ;;  %v1018_v1 = vld [vmem:[%s1940_s0 + $0x68] sm:$0xf0]  ;;  %v1434_v3 = vld [vmem:[%s1938_s1 + $0x160] sm:$0xff] }
  0x17   :  { %756 = vmatpush.bf16.msra.mxu1 %v1400_v21  ;;  %v1017_v8 = vor.u32 %v1371_v63, %v1016_v62  ;;  %v1021_v9 = vor.u32 %v1367_v0, %v1018_v1  ;;  %v1449_v10 = vld [vmem:[%s1938_s1 + $0x1d8] sm:$0xff]  ;;  %v1440_v12 = vld [vmem:[%s1938_s1 + $0x190] sm:$0xff]  ;;  %v1439_v16 = vld [vmem:[%s1938_s1 + $0x188] sm:$0xff] }
  0x18   :  { %785 = vmatpush.bf16.msra.mxu2 %v1408_v22  ;;  %v1433_v11 = vld [vmem:[%s1938_s1 + $0x158] sm:$0xff]  ;;  %v1424_v13 = vld [vmem:[%s1938_s1 + $0x110] sm:$0xff]  ;;  %v1423_v17 = vld [vmem:[%s1938_s1 + $0x108] sm:$0xff] }
  0x19   :  { %814 = vmatpush.bf16.msra.mxu3 %v1416_v23  ;;  %v1448_v14 = vld [vmem:[%s1938_s1 + $0x1d0] sm:$0xff]  ;;  %v1447_v18 = vld [vmem:[%s1938_s1 + $0x1c8] sm:$0xff]  ;;  %v1040_v20 = vld [vmem:[%s1940_s0 + $0x80] sm:$0xf] }
  0x1a   :  { %728 = vmatpush.bf16.msra.mxu0 %v1391_v24  ;;  %v1432_v15 = vld [vmem:[%s1938_s1 + $0x150] sm:$0xff]  ;;  %v1431_v19 = vld [vmem:[%s1938_s1 + $0x148] sm:$0xff]  ;;  %v1438_v21 = vld [vmem:[%s1938_s1 + $0x180] sm:$0xff] }
  0x1b   :  { %757 = vmatpush.bf16.msra.mxu1 %v1399_v25  ;;  %v1422_v22 = vld [vmem:[%s1938_s1 + $0x100] sm:$0xff]  ;;  %v1024_v60 = vld [vmem:[%s1940_s0 + $0x50] sm:$0xf]  ;;  %v1368_v62 = vld [vmem:[%s1940_s0 + $0x54] sm:$0xf] }
  0x1c   :  { %786 = vmatpush.bf16.msra.mxu2 %v1407_v26  ;;  %v1378_v23 = vld [vmem:[%s1940_s0 + $0x9c] sm:$0xf0]  ;;  %v1374_v24 = vld [vmem:[%s1940_s0 + $0x84] sm:$0xf]  ;;  %v1048_v26 = vld [vmem:[%s1940_s0 + $0x88] sm:$0xf] }
  0x1d   :  { %815 = vmatpush.bf16.msra.mxu3 %v1415_v27  ;;  %v1042_v25 = vld [vmem:[%s1940_s0 + $0xa0] sm:$0xf0]  ;;  %v1379_v27 = vld [vmem:[%s1940_s0 + $0xa4] sm:$0xf0]  ;;  %v1041_v32 = vor.u32 %v1378_v23, %v1040_v20  ;;  %v1072_v36 = vld [vmem:[%s1940_s0 + $0xc0] sm:$0xf] }
  0x1e   :  { %729 = vmatpush.bf16.msra.mxu0 %v1390_v28  ;;  %v1375_v28 = vld [vmem:[%s1940_s0 + $0x8c] sm:$0xf]  ;;  %v1045_v33 = vor.u32 %v1374_v24, %v1042_v25  ;;  %v1049_v34 = vor.u32 %v1379_v27, %v1048_v26  ;;  %v1386_v37 = vld [vmem:[%s1940_s0 + $0xdc] sm:$0xf0]  ;;  %v1382_v38 = vld [vmem:[%s1940_s0 + $0xc4] sm:$0xf] }
  0x1f   :  { %758 = vmatpush.bf16.msra.mxu1 %v1398_v29  ;;  %v1050_v29 = vld [vmem:[%s1940_s0 + $0xa8] sm:$0xf0]  ;;  %v1074_v39 = vld [vmem:[%s1940_s0 + $0xe0] sm:$0xf0]  ;;  %v1372_v61 = vld [vmem:[%s1940_s0 + $0x6c] sm:$0xf0] }
  0x20   :  { %787 = vmatpush.bf16.msra.mxu2 %v1406_v30  ;;  %v1446_v30 = vld [vmem:[%s1938_s1 + $0x1c0] sm:$0xff]  ;;  %v1053_v35 = vor.u32 %v1375_v28, %v1050_v29  ;;  %v1026_v63 = vld [vmem:[%s1940_s0 + $0x70] sm:$0xf0]  ;;  %v1032_v0 = vld [vmem:[%s1940_s0 + $0x58] sm:$0xf] }
  0x21   :  { %816 = vmatpush.bf16.msra.mxu3 %v1414_v31  ;;  %730 = vmatmul.bf16.vlgmr.msra.gmra.mxu0 %v977_v42  ;;  %v1430_v31 = vld [vmem:[%s1938_s1 + $0x140] sm:$0xff]  ;;  %v1383_v42 = vld [vmem:[%s1940_s0 + $0xcc] sm:$0xf]  ;;  %v1373_v1 = vld [vmem:[%s1940_s0 + $0x74] sm:$0xf0] }
  0x22   :  { %838 = vmatpush.bf16.msrb.mxu0 %v1429_v41  ;;  %759 = vmatmul.bf16.vlgmr.msra.gmra.mxu1 %v981_v43  ;;  %v1387_v41 = vld [vmem:[%s1940_s0 + $0xe4] sm:$0xf0]  ;;  %v1082_v43 = vld [vmem:[%s1940_s0 + $0xe8] sm:$0xf0]  ;;  %v1088_v20 = vld [vmem:[%s1940_s0 + $0xd0] sm:$0xf] }
  0x23   :  { %788 = vmatmul.bf16.vlgmr.msra.gmra.mxu2 %v985_v44  ;;  %867 = vmatpush.bf16.msrb.mxu1 %v1437_v47  ;;  %v1073_v44 = vor.u32 %v1386_v37, %v1072_v36  ;;  %v1085_v47 = vor.u32 %v1383_v42, %v1082_v43  ;;  %v1090_v23 = vld [vmem:[%s1940_s0 + $0xf0] sm:$0xf0]  ;;  %v1096_v24 = vld [vmem:[%s1940_s0 + $0xd8] sm:$0xf]  ;;  %v1385_v26 = vld [vmem:[%s1940_s0 + $0xdc] sm:$0xf] }
  0x24   :  { %896 = vmatpush.bf16.msrb.mxu2 %v1445_v40  ;;  %817 = vmatmul.bf16.vlgmr.msra.gmra.mxu3 %v989_v45  ;;  %v1080_v40 = vld [vmem:[%s1940_s0 + $0xc8] sm:$0xf]  ;;  %v1077_v45 = vor.u32 %v1382_v38, %v1074_v39  ;;  %v1389_v25 = vld [vmem:[%s1940_s0 + $0xf4] sm:$0xf0]  ;;  %v1098_v27 = vld [vmem:[%s1940_s0 + $0xf8] sm:$0xf0] }
  0x25   :  { %925 = vmatpush.bf16.msrb.mxu3 %v1453_v46  ;;  %v1081_v46 = vor.u32 %v1387_v41, %v1080_v40 }
  0x26   :  { %839 = vmatpush.bf16.msrb.mxu0 %v1428_v49  ;;  %v1364_v49 = vld [vmem:[%s1940_s0 + $0x2c] sm:$0xf0] }
  0x27   :  { %868 = vmatpush.bf16.msrb.mxu1 %v1436_v51  ;;  %v994_v51 = vld [vmem:[%s1940_s0 + $0x30] sm:$0xf0] }
  0x28   :  { %897 = vmatpush.bf16.msrb.mxu2 %v1444_v48  ;;  %v992_v48 = vld [vmem:[%s1940_s0 + $0x10] sm:$0xf] }
  0x29   :  { %926 = vmatpush.bf16.msrb.mxu3 %v1452_v50  ;;  %v1360_v50 = vld [vmem:[%s1940_s0 + $0x14] sm:$0xf]  ;;  %v993_v56 = vor.u32 %v1364_v49, %v992_v48 }
  0x2a   :  { %840 = vmatpush.bf16.msrb.mxu0 %v1427_v53  ;;  %v1365_v53 = vld [vmem:[%s1940_s0 + $0x34] sm:$0xf0] }
  0x2b   :  { %869 = vmatpush.bf16.msrb.mxu1 %v1435_v55  ;;  %v1002_v55 = vld [vmem:[%s1940_s0 + $0x38] sm:$0xf0] }
  0x2c   :  { %898 = vmatpush.bf16.msrb.mxu2 %v1443_v52  ;;  %v1000_v52 = vld [vmem:[%s1940_s0 + $0x18] sm:$0xf] }
  0x2d   :  { %927 = vmatpush.bf16.msrb.mxu3 %v1451_v54  ;;  %v1361_v54 = vld [vmem:[%s1940_s0 + $0x1c] sm:$0xf] }
  0x2e   :  { %841 = vmatpush.bf16.msrb.mxu0 %v1426_v58  ;;  %v1001_v58 = vor.u32 %v1365_v53, %v1000_v52  ;;  %v1005_v59 = vor.u32 %v1361_v54, %v1002_v55 }
  0x2f   :  { %870 = vmatpush.bf16.msrb.mxu1 %v1434_v3  ;;  %v1034_v3 = vld [vmem:[%s1940_s0 + $0x78] sm:$0xf0] }
  0x30   :  { %899 = vmatpush.bf16.msrb.mxu2 %v1442_v57  ;;  %v997_v57 = vor.u32 %v1360_v50, %v994_v51 }
  0x31   :  { %928 = vmatpush.bf16.msrb.mxu3 %v1450_v2  ;;  %735 = vmatmul.bf16.gmra.mxu0 %v1009_v6  ;;  %v1369_v2 = vld [vmem:[%s1940_s0 + $0x5c] sm:$0xf]  ;;  %v1033_v6 = vor.u32 %v1373_v1, %v1032_v0 }
  0x32   :  { %842 = vmatpush.bf16.msrb.mxu0 %v1425_v5  ;;  %764 = vmatmul.bf16.gmra.mxu1 %v1013_v7  ;;  %v1029_v5 = vor.u32 %v1368_v62, %v1026_v63  ;;  %v1037_v7 = vor.u32 %v1369_v2, %v1034_v3 }
  0x33   :  { %793 = vmatmul.bf16.gmra.mxu2 %v1017_v8  ;;  %871 = vmatpush.bf16.msrb.mxu1 %v1433_v11  ;;  %v1056_v8 = vld [vmem:[%s1940_s0 + $0x90] sm:$0xf]  ;;  %v1058_v11 = vld [vmem:[%s1940_s0 + $0xb0] sm:$0xf0] }
  0x34   :  { %900 = vmatpush.bf16.msrb.mxu2 %v1441_v4  ;;  %822 = vmatmul.bf16.gmra.mxu3 %v1021_v9  ;;  %v1025_v4 = vor.u32 %v1372_v61, %v1024_v60  ;;  %v1380_v9 = vld [vmem:[%s1940_s0 + $0xac] sm:$0xf0] }
  0x35   :  { %929 = vmatpush.bf16.msrb.mxu3 %v1449_v10  ;;  %v1376_v10 = vld [vmem:[%s1940_s0 + $0x94] sm:$0xf] }
  0x36   :  { %843 = vmatpush.bf16.msrb.mxu0 %v1424_v13  ;;  %v1381_v13 = vld [vmem:[%s1940_s0 + $0xb4] sm:$0xf0] }
  0x37   :  { %872 = vmatpush.bf16.msrb.mxu1 %v1432_v15  ;;  %v1066_v15 = vld [vmem:[%s1940_s0 + $0xb8] sm:$0xf0] }
  0x38   :  { %901 = vmatpush.bf16.msrb.mxu2 %v1440_v12  ;;  %v1064_v12 = vld [vmem:[%s1940_s0 + $0x98] sm:$0xf] }
  0x39   :  { %930 = vmatpush.bf16.msrb.mxu3 %v1448_v14  ;;  %v1377_v14 = vld [vmem:[%s1940_s0 + $0x9c] sm:$0xf] }
  0x3a   :  { %844 = vmatpush.bf16.msrb.mxu0 %v1423_v17  ;;  %v1061_v17 = vor.u32 %v1376_v10, %v1058_v11 }
  0x3b   :  { %873 = vmatpush.bf16.msrb.mxu1 %v1431_v19  ;;  %v1069_v19 = vor.u32 %v1377_v14, %v1066_v15 }
  0x3c   :  { %902 = vmatpush.bf16.msrb.mxu2 %v1439_v16  ;;  %v1057_v16 = vor.u32 %v1380_v9, %v1056_v8 }
  0x3d   :  { %931 = vmatpush.bf16.msrb.mxu3 %v1447_v18  ;;  %v1065_v18 = vor.u32 %v1381_v13, %v1064_v12 }
  0x3e   :  { %845 = vmatpush.bf16.msrb.mxu0 %v1422_v22  ;;  %v1384_v22 = vld [vmem:[%s1940_s0 + $0xd4] sm:$0xf] }
  0x3f   :  { %874 = vmatpush.bf16.msrb.mxu1 %v1430_v31  ;;  %v1093_v29 = vor.u32 %v1384_v22, %v1090_v23  ;;  %v1101_v31 = vor.u32 %v1385_v26, %v1098_v27 }
  0x40   :  { %903 = vmatpush.bf16.msrb.mxu2 %v1438_v21  ;;  %v1388_v21 = vld [vmem:[%s1940_s0 + $0xec] sm:$0xf0] }
  0x41   :  { %932 = vmatpush.bf16.msrb.mxu3 %v1446_v30  ;;  %740 = vmatmul.bf16.gmra.mxu0 %v1041_v32  ;;  %v1089_v28 = vor.u32 %v1388_v21, %v1088_v20  ;;  %v1097_v30 = vor.u32 %v1389_v25, %v1096_v24 }
  0x42   :  { %769 = vmatmul.bf16.gmra.mxu1 %v1045_v33 }
  0x43   :  { %798 = vmatmul.bf16.gmra.mxu2 %v1049_v34 }
  0x44   :  { %827 = vmatmul.bf16.gmra.mxu3 %v1053_v35 }
  0x51   :  { %745 = vmatmul.bf16.gmra.mxu0 %v1073_v44 }
  0x52   :  { %774 = vmatmul.bf16.gmra.mxu1 %v1077_v45 }
  0x53   :  { %803 = vmatmul.bf16.gmra.mxu2 %v1081_v46 }
  0x54   :  { %832 = vmatmul.bf16.gmra.mxu3 %v1085_v47 }
  0x61   :  { %846 = vmatmul.bf16.vlgmr.msrb.gmra.mxu0 %v993_v56  ;;  %v1874_v56 = vld [vmem:[%s1939_s2] ss:$0 sm:$0xff] }
  0x62   :  { %875 = vmatmul.bf16.vlgmr.msrb.gmra.mxu1 %v997_v57 }
  0x63   :  { %904 = vmatmul.bf16.vlgmr.msrb.gmra.mxu2 %v1001_v58 }
  0x64   :  { %933 = vmatmul.bf16.vlgmr.msrb.gmra.mxu3 %v1005_v59 }
  0x71   :  { %851 = vmatmul.bf16.gmra.mxu0 %v1025_v4 }
  0x72   :  { %880 = vmatmul.bf16.gmra.mxu1 %v1029_v5 }
  0x73   :  { %909 = vmatmul.bf16.gmra.mxu2 %v1033_v6 }
  0x74   :  { %938 = vmatmul.bf16.gmra.mxu3 %v1037_v7 }
  0x81   :  { %856 = vmatmul.bf16.gmra.mxu0 %v1057_v16 }
  0x82   :  { %885 = vmatmul.bf16.gmra.mxu1 %v1061_v17 }
  0x83   :  { %914 = vmatmul.bf16.gmra.mxu2 %v1065_v18 }
  0x84   :  { %943 = vmatmul.bf16.gmra.mxu3 %v1069_v19 }
  0x91   :  { %861 = vmatmul.bf16.gmra.mxu0 %v1089_v28 }
  0x92   :  { %890 = vmatmul.bf16.gmra.mxu1 %v1093_v29 }
  0x93   :  { %919 = vmatmul.bf16.gmra.mxu2 %v1097_v30 }
  0x94   :  { %948 = vmatmul.bf16.gmra.mxu3 %v1101_v31 }
  0x9e   :  { %v731_v32 = vpop.f32.mrf.mxu0 }
  0x9f   :  { %v760_v33 = vpop.f32.mrf.mxu1  ;;  %v732_v59 = vadd.f32 %v1874_v56, %v731_v32 }
  0xa1   :  { %v761_v62 = vadd.f32 %v760_v33, %v732_v59 }
  0xa6   :  { %v789_v34 = vpop.f32.mrf.mxu2  ;;  %v733_v36 = vpop.f32.mrf.mxu0 }
  0xa7   :  { %v818_v35 = vpop.f32.mrf.mxu3  ;;  %v762_v37 = vpop.f32.mrf.mxu1  ;;  %v790_v1 = vadd.f32 %v789_v34, %v761_v62  ;;  %v734_v2 = vadd.f32 %v1874_v56, %v733_v36 }
  0xa9   :  { %v819_v5 = vadd.f32 %v818_v35, %v790_v1  ;;  %v763_v8 = vadd.f32 %v762_v37, %v734_v2 }
  0xae   :  { %v791_v38 = vpop.f32.mrf.mxu2  ;;  %v736_v40 = vpop.f32.mrf.mxu0 }
  0xaf   :  { %v820_v39 = vpop.f32.mrf.mxu3  ;;  %v765_v41 = vpop.f32.mrf.mxu1  ;;  %v792_v10 = vadd.f32 %v791_v38, %v763_v8  ;;  %v737_v11 = vadd.f32 %v1874_v56, %v736_v40 }
  0xb1   :  { %v821_v15 = vadd.f32 %v820_v39, %v792_v10  ;;  %v766_v16 = vadd.f32 %v765_v41, %v737_v11 }
  0xb6   :  { %v794_v42 = vpop.f32.mrf.mxu2  ;;  %v738_v44 = vpop.f32.mrf.mxu0 }
  0xb7   :  { %v823_v43 = vpop.f32.mrf.mxu3  ;;  %v767_v45 = vpop.f32.mrf.mxu1  ;;  %v795_v22 = vadd.f32 %v794_v42, %v766_v16  ;;  %v739_v24 = vadd.f32 %v1874_v56, %v738_v44 }
  0xb9   :  { %v824_v28 = vadd.f32 %v823_v43, %v795_v22  ;;  %v768_v32 = vadd.f32 %v767_v45, %v739_v24 }
  0xbe   :  { %v796_v46 = vpop.f32.mrf.mxu2  ;;  %v741_v48 = vpop.f32.mrf.mxu0 }
  0xbf   :  { %v825_v47 = vpop.f32.mrf.mxu3  ;;  %v770_v49 = vpop.f32.mrf.mxu1  ;;  %v797_v35 = vadd.f32 %v796_v46, %v768_v32  ;;  %v742_v36 = vadd.f32 %v1874_v56, %v741_v48 }
  0xc1   :  { %v826_v41 = vadd.f32 %v825_v47, %v797_v35  ;;  %v771_v42 = vadd.f32 %v770_v49, %v742_v36 }
  0xc6   :  { %v1859_v50 = vpop.f32.mrf.mxu2  ;;  %v1863_v52 = vpop.f32.mrf.mxu0 }
  0xc7   :  { %v1861_v51 = vpop.f32.mrf.mxu3  ;;  %v1865_v53 = vpop.f32.mrf.mxu1  ;;  %v800_v1 = vadd.f32 %v1859_v50, %v771_v42  ;;  %v744_v48 = vadd.f32 %v1874_v56, %v1863_v52 }
  0xc9   :  { %v829_v47 = vadd.f32 %v1861_v51, %v800_v1 }
  0xce   :  { %v1867_v54 = vpop.f32.mrf.mxu2  ;;  %v1876_v57 = vpop.f32.mrf.mxu0 }
  0xcf   :  { %v1869_v55 = vpop.f32.mrf.mxu3  ;;  %v1878_v58 = vpop.f32.mrf.mxu1  ;;  %v747_v52 = vadd.f32 %v1874_v56, %v1876_v57 }
  0xd1   :  { %v776_v16 = vadd.f32 %v1878_v58, %v747_v52 }
  0xd6   :  { %v1881_v60 = vpop.f32.mrf.mxu2  ;;  %v1885_v63 = vpop.f32.mrf.mxu0 }
  0xd7   :  { %v1883_v61 = vpop.f32.mrf.mxu3  ;;  %v1887_v0 = vpop.f32.mrf.mxu1 }
  0xde   :  { %v1890_v3 = vpop.f32.mrf.mxu2  ;;  %v847_v6 = vpop.f32.mrf.mxu0 }
  0xdf   :  { %v1892_v4 = vpop.f32.mrf.mxu3  ;;  %v876_v7 = vpop.f32.mrf.mxu1  ;;  %v848_v9 = vadd.f32 %v847_v6, %v819_v5 }
  0xe1   :  { %v877_v12 = vadd.f32 %v876_v7, %v848_v9  ;;  %v773_v9 = vadd.f32 %v1865_v53, %v744_v48 }
  0xe3   :  { %v802_v11 = vadd.f32 %v1867_v54, %v773_v9 }
  0xe6   :  { %v905_v13 = vpop.f32.mrf.mxu2  ;;  %v849_v18 = vpop.f32.mrf.mxu0 }
  0xe7   :  { %v934_v14 = vpop.f32.mrf.mxu3  ;;  %v906_v17 = vadd.f32 %v905_v13, %v877_v12  ;;  %v878_v19 = vpop.f32.mrf.mxu1  ;;  %v850_v21 = vadd.f32 %v849_v18, %v821_v15  ;;  %v831_v15 = vadd.f32 %v1869_v55, %v802_v11 }
  0xe9   :  { %v935_v20 = vadd.f32 %v934_v14, %v906_v17  ;;  %v879_v25 = vadd.f32 %v878_v19, %v850_v21  ;;  %v749_v21 = vadd.f32 %v1874_v56, %v1885_v63 }
  0xeb   :  { %v954_v23 = vmax.f32 %v935_v20, 0.0  ;;  %v805_v20 = vadd.f32 %v1881_v60, %v776_v16 }
  0xed   :  { %962 = vst [vmem:[%s1941_s3] sm:$0xff] %v954_v23  ;;  %v834_v58 = vadd.f32 %v1883_v61, %v805_v20 }
  0xee   :  { %v907_v26 = vpop.f32.mrf.mxu2  ;;  %v852_v30 = vpop.f32.mrf.mxu0 }
  0xef   :  { %v936_v27 = vpop.f32.mrf.mxu3  ;;  %v908_v29 = vadd.f32 %v907_v26, %v879_v25  ;;  %v881_v31 = vpop.f32.mrf.mxu1  ;;  %v853_v34 = vadd.f32 %v852_v30, %v824_v28  ;;  %v778_v26 = vadd.f32 %v1887_v0, %v749_v21 }
  0xf1   :  { %v937_v33 = vadd.f32 %v936_v27, %v908_v29  ;;  %v882_v38 = vadd.f32 %v881_v31, %v853_v34  ;;  %v807_v29 = vadd.f32 %v1890_v3, %v778_v26 }
  0xf3   :  { %v955_v37 = vmax.f32 %v937_v33, 0.0  ;;  %v836_v32 = vadd.f32 %v1892_v4, %v807_v29 }
  0xf5   :  { %963 = vst [vmem:[%s1941_s3 + $0x8] sm:$0xff] %v955_v37 }
  0xf6   :  { %v910_v39 = vpop.f32.mrf.mxu2  ;;  %v854_v44 = vpop.f32.mrf.mxu0 }
  0xf7   :  { %v939_v40 = vpop.f32.mrf.mxu3  ;;  %v911_v43 = vadd.f32 %v910_v39, %v882_v38  ;;  %v883_v59 = vpop.f32.mrf.mxu1  ;;  %v855_v45 = vadd.f32 %v854_v44, %v826_v41 }
  0xf9   :  { %v940_v62 = vadd.f32 %v939_v40, %v911_v43  ;;  %v884_v2 = vadd.f32 %v883_v59, %v855_v45 }
  0xfb   :  { %v956_v46 = vmax.f32 %v940_v62, 0.0 }
  0xfd   :  { %964 = vst [vmem:[%s1941_s3 + $0x10] sm:$0xff] %v956_v46 }
  0xfe   :  { %v912_v5 = vpop.f32.mrf.mxu2  ;;  %v857_v7 = vpop.f32.mrf.mxu0 }
  0xff   :  { %v941_v6 = vpop.f32.mrf.mxu3  ;;  %v913_v49 = vadd.f32 %v912_v5, %v884_v2  ;;  %v886_v8 = vpop.f32.mrf.mxu1  ;;  %v858_v50 = vadd.f32 %v857_v7, %v829_v47 }
 0x101   :  { %v942_v10 = vadd.f32 %v941_v6, %v913_v49  ;;  %v887_v13 = vadd.f32 %v886_v8, %v858_v50 }
 0x103   :  { %v957_v12 = vmax.f32 %v942_v10, 0.0 }
 0x105   :  { %965 = vst [vmem:[%s1941_s3 + $0x18] sm:$0xff] %v957_v12 }
 0x106   :  { %v915_v14 = vpop.f32.mrf.mxu2  ;;  %v859_v17 = vpop.f32.mrf.mxu0 }
 0x107   :  { %v944_v51 = vpop.f32.mrf.mxu3  ;;  %v916_v53 = vadd.f32 %v915_v14, %v887_v13  ;;  %v888_v18 = vpop.f32.mrf.mxu1  ;;  %v860_v54 = vadd.f32 %v859_v17, %v831_v15 }
 0x109   :  { %v945_v19 = vadd.f32 %v944_v51, %v916_v53  ;;  %v889_v22 = vadd.f32 %v888_v18, %v860_v54 }
 0x10b   :  { %v958_v57 = vmax.f32 %v945_v19, 0.0 }
 0x10d   :  { %966 = vst [vmem:[%s1941_s3 + $0x20] sm:$0xff] %v958_v57 }
 0x10e   :  { %v917_v23 = vpop.f32.mrf.mxu2  ;;  %v862_v25 = vpop.f32.mrf.mxu0 }
 0x10f   :  { %v946_v55 = vpop.f32.mrf.mxu3  ;;  %v918_v24 = vadd.f32 %v917_v23, %v889_v22  ;;  %v863_v28 = vadd.f32 %v862_v25, %v834_v58  ;;  %v891_v60 = vpop.f32.mrf.mxu1 }
 0x111   :  { %v947_v27 = vadd.f32 %v946_v55, %v918_v24  ;;  %v892_v56 = vadd.f32 %v891_v60, %v863_v28 }
 0x113   :  { %v959_v30 = vmax.f32 %v947_v27, 0.0 }
 0x115   :  { %967 = vst [vmem:[%s1941_s3 + $0x28] sm:$0xff] %v959_v30 }
 0x116   :  { %v920_v63 = vpop.f32.mrf.mxu2  ;;  %v864_v33 = vpop.f32.mrf.mxu0 }
 0x117   :  { %v949_v31 = vpop.f32.mrf.mxu3  ;;  %v921_v61 = vadd.f32 %v920_v63, %v892_v56  ;;  %v865_v35 = vadd.f32 %v864_v33, %v836_v32  ;;  %v893_v36 = vpop.f32.mrf.mxu1 }
 0x119   :  { %v950_v34 = vadd.f32 %v949_v31, %v921_v61  ;;  %v894_v3 = vadd.f32 %v893_v36, %v865_v35 }
 0x11b   :  { %v960_v0 = vmax.f32 %v950_v34, 0.0 }
 0x11d   :  { %968 = vst [vmem:[%s1941_s3 + $0x30] sm:$0xff] %v960_v0 }
 0x11e   :  { %v922_v37 = vpop.f32.mrf.mxu2 }
 0x11f   :  { %v923_v38 = vadd.f32 %v922_v37, %v894_v3  ;;  %v951_v39 = vpop.f32.mrf.mxu3 }
 0x121   :  { %v952_v40 = vadd.f32 %v951_v39, %v923_v38 }
 0x123   :  { %v961_v41 = vmax.f32 %v952_v40, 0.0 }
 0x125   :  { %969 = vst [vmem:[%s1941_s3 + $0x38] sm:$0xff] %v961_v41 }

// kernel: bigcnn_forward.7
= control target key start
LH: loop header
LB: loop body
LE: loop exit
PB: predicated region body
PF: predicated region fallthrough
CT: control target
= control target key end

     0   :  { %s2600_s1 = inlined_call_operand.vmem [shape: bf16[2048,128], index: 1, kind: input, shape index: {}]   ;;  %s2601_s2 = inlined_call_operand.vmem [shape: f32[1,128], index: 2, kind: input, shape index: {}]   ;;  %s2602_s0 = inlined_call_operand.vmem [shape: bf16[16,2048], index: 0, kind: input, shape index: {}]   ;;  %s2603_s3 = inlined_call_operand.vmem [shape: f32[16,128], index: 3, kind: output, shape index: {}]  }
   0x1   :  { %v1969_v0 = vld [vmem:[%s2600_s1 + $0x38] sm:$0xff]  ;;  %v1968_v4 = vld [vmem:[%s2600_s1 + $0x30] sm:$0xff]  ;;  %v1967_v8 = vld [vmem:[%s2600_s1 + $0x28] sm:$0xff] }
   0x2   :  { %v1977_v1 = vld [vmem:[%s2600_s1 + $0x78] sm:$0xff]  ;;  %1138 = vmatpush.bf16.msra.mxu0 %v1969_v0  ;;  %v1976_v5 = vld [vmem:[%s2600_s1 + $0x70] sm:$0xff]  ;;  %v1975_v9 = vld [vmem:[%s2600_s1 + $0x68] sm:$0xff] }
   0x3   :  { %v1985_v2 = vld [vmem:[%s2600_s1 + $0xb8] sm:$0xff]  ;;  %1152 = vmatpush.bf16.msra.mxu1 %v1977_v1  ;;  %v1984_v6 = vld [vmem:[%s2600_s1 + $0xb0] sm:$0xff]  ;;  %v1983_v10 = vld [vmem:[%s2600_s1 + $0xa8] sm:$0xff] }
   0x4   :  { %v1993_v3 = vld [vmem:[%s2600_s1 + $0xf8] sm:$0xff]  ;;  %1166 = vmatpush.bf16.msra.mxu2 %v1985_v2  ;;  %v1992_v7 = vld [vmem:[%s2600_s1 + $0xf0] sm:$0xff]  ;;  %v1991_v11 = vld [vmem:[%s2600_s1 + $0xe8] sm:$0xff] }
   0x5   :  { %1180 = vmatpush.bf16.msra.mxu3 %v1993_v3  ;;  %v1966_v12 = vld [vmem:[%s2600_s1 + $0x20] sm:$0xff]  ;;  %v1965_v16 = vld [vmem:[%s2600_s1 + $0x18] sm:$0xff]  ;;  %v1964_v20 = vld [vmem:[%s2600_s1 + $0x10] sm:$0xff] }
   0x6   :  { %1139 = vmatpush.bf16.msra.mxu0 %v1968_v4  ;;  %v1974_v13 = vld [vmem:[%s2600_s1 + $0x60] sm:$0xff]  ;;  %v1973_v17 = vld [vmem:[%s2600_s1 + $0x58] sm:$0xff]  ;;  %v1972_v21 = vld [vmem:[%s2600_s1 + $0x50] sm:$0xff] }
   0x7   :  { %1153 = vmatpush.bf16.msra.mxu1 %v1976_v5  ;;  %v1982_v14 = vld [vmem:[%s2600_s1 + $0xa0] sm:$0xff]  ;;  %v1981_v18 = vld [vmem:[%s2600_s1 + $0x98] sm:$0xff]  ;;  %v1980_v22 = vld [vmem:[%s2600_s1 + $0x90] sm:$0xff] }
   0x8   :  { %1167 = vmatpush.bf16.msra.mxu2 %v1984_v6  ;;  %v1990_v15 = vld [vmem:[%s2600_s1 + $0xe0] sm:$0xff]  ;;  %v1989_v19 = vld [vmem:[%s2600_s1 + $0xd8] sm:$0xff]  ;;  %v1988_v23 = vld [vmem:[%s2600_s1 + $0xd0] sm:$0xff] }
   0x9   :  { %1181 = vmatpush.bf16.msra.mxu3 %v1992_v7  ;;  %v1963_v24 = vld [vmem:[%s2600_s1 + $0x8] sm:$0xff]  ;;  %v1962_v28 = vld [vmem:[%s2600_s1] sm:$0xff]  ;;  %v2001_v32 = vld [vmem:[%s2600_s1 + $0x138] sm:$0xff] }
   0xa   :  { %1140 = vmatpush.bf16.msra.mxu0 %v1967_v8  ;;  %v1971_v25 = vld [vmem:[%s2600_s1 + $0x48] sm:$0xff]  ;;  %v1970_v29 = vld [vmem:[%s2600_s1 + $0x40] sm:$0xff]  ;;  %v2009_v33 = vld [vmem:[%s2600_s1 + $0x178] sm:$0xff] }
   0xb   :  { %1154 = vmatpush.bf16.msra.mxu1 %v1975_v9  ;;  %v1979_v26 = vld [vmem:[%s2600_s1 + $0x88] sm:$0xff]  ;;  %v1978_v30 = vld [vmem:[%s2600_s1 + $0x80] sm:$0xff]  ;;  %v2017_v42 = vld [vmem:[%s2600_s1 + $0x1b8] sm:$0xff] }
   0xc   :  { %1168 = vmatpush.bf16.msra.mxu2 %v1983_v10  ;;  %v1987_v27 = vld [vmem:[%s2600_s1 + $0xc8] sm:$0xff]  ;;  %v1986_v31 = vld [vmem:[%s2600_s1 + $0xc0] sm:$0xff]  ;;  %v2025_v43 = vld [vmem:[%s2600_s1 + $0x1f8] sm:$0xff] }
   0xd   :  { %1182 = vmatpush.bf16.msra.mxu3 %v1991_v11  ;;  %v1372_v34 = vld [vmem:[%s2602_s0] sm:$0xf]  ;;  %v1380_v36 = vld [vmem:[%s2602_s0 + $0x8] sm:$0xf]  ;;  %v1946_v38 = vld [vmem:[%s2602_s0 + $0x4] sm:$0xf] }
   0xe   :  { %1141 = vmatpush.bf16.msra.mxu0 %v1966_v12  ;;  %v1954_v35 = vld [vmem:[%s2602_s0 + $0x3c] sm:$0xf0]  ;;  %v1955_v37 = vld [vmem:[%s2602_s0 + $0x44] sm:$0xf0]  ;;  %v1374_v39 = vld [vmem:[%s2602_s0 + $0x40] sm:$0xf0] }
   0xf   :  { %1155 = vmatpush.bf16.msra.mxu1 %v1974_v13  ;;  %v1947_v40 = vld [vmem:[%s2602_s0 + $0xc] sm:$0xf]  ;;  %v1373_v44 = vor.u32 %v1954_v35, %v1372_v34  ;;  %v1381_v45 = vor.u32 %v1955_v37, %v1380_v36  ;;  %v1377_v46 = vor.u32 %v1946_v38, %v1374_v39  ;;  %v2000_v48 = vld [vmem:[%s2600_s1 + $0x130] sm:$0xff]  ;;  %v1998_v56 = vld [vmem:[%s2600_s1 + $0x120] sm:$0xff] }
  0x10   :  { %1169 = vmatpush.bf16.msra.mxu2 %v1982_v14  ;;  %v1382_v41 = vld [vmem:[%s2602_s0 + $0x48] sm:$0xf0]  ;;  %v2008_v49 = vld [vmem:[%s2600_s1 + $0x170] sm:$0xff]  ;;  %v2006_v57 = vld [vmem:[%s2600_s1 + $0x160] sm:$0xff] }
  0x11   :  { %1183 = vmatpush.bf16.msra.mxu3 %v1990_v15  ;;  %v1385_v47 = vor.u32 %v1947_v40, %v1382_v41  ;;  %v2016_v50 = vld [vmem:[%s2600_s1 + $0x1b0] sm:$0xff]  ;;  %v1999_v52 = vld [vmem:[%s2600_s1 + $0x128] sm:$0xff]  ;;  %v2014_v58 = vld [vmem:[%s2600_s1 + $0x1a0] sm:$0xff] }
  0x12   :  { %1142 = vmatpush.bf16.msra.mxu0 %v1965_v16  ;;  %v2024_v51 = vld [vmem:[%s2600_s1 + $0x1f0] sm:$0xff]  ;;  %v2007_v53 = vld [vmem:[%s2600_s1 + $0x168] sm:$0xff]  ;;  %v2022_v59 = vld [vmem:[%s2600_s1 + $0x1e0] sm:$0xff] }
  0x13   :  { %1156 = vmatpush.bf16.msra.mxu1 %v1973_v17  ;;  %v2015_v54 = vld [vmem:[%s2600_s1 + $0x1a8] sm:$0xff]  ;;  %v1997_v60 = vld [vmem:[%s2600_s1 + $0x118] sm:$0xff]  ;;  %v1996_v0 = vld [vmem:[%s2600_s1 + $0x110] sm:$0xff] }
  0x14   :  { %1170 = vmatpush.bf16.msra.mxu2 %v1981_v18  ;;  %v2023_v55 = vld [vmem:[%s2600_s1 + $0x1e8] sm:$0xff]  ;;  %v2005_v61 = vld [vmem:[%s2600_s1 + $0x158] sm:$0xff]  ;;  %v2004_v1 = vld [vmem:[%s2600_s1 + $0x150] sm:$0xff] }
  0x15   :  { %1184 = vmatpush.bf16.msra.mxu3 %v1989_v19  ;;  %v2013_v62 = vld [vmem:[%s2600_s1 + $0x198] sm:$0xff]  ;;  %v2012_v2 = vld [vmem:[%s2600_s1 + $0x190] sm:$0xff]  ;;  %v1995_v4 = vld [vmem:[%s2600_s1 + $0x108] sm:$0xff] }
  0x16   :  { %1143 = vmatpush.bf16.msra.mxu0 %v1964_v20  ;;  %v2021_v63 = vld [vmem:[%s2600_s1 + $0x1d8] sm:$0xff]  ;;  %v2020_v3 = vld [vmem:[%s2600_s1 + $0x1d0] sm:$0xff]  ;;  %v2003_v5 = vld [vmem:[%s2600_s1 + $0x148] sm:$0xff] }
  0x17   :  { %1157 = vmatpush.bf16.msra.mxu1 %v1972_v21  ;;  %v2011_v6 = vld [vmem:[%s2600_s1 + $0x188] sm:$0xff]  ;;  %v1994_v8 = vld [vmem:[%s2600_s1 + $0x100] sm:$0xff]  ;;  %v2033_v12 = vld [vmem:[%s2600_s1 + $0x238] sm:$0xff] }
  0x18   :  { %1171 = vmatpush.bf16.msra.mxu2 %v1980_v22  ;;  %v2019_v7 = vld [vmem:[%s2600_s1 + $0x1c8] sm:$0xff]  ;;  %v2002_v9 = vld [vmem:[%s2600_s1 + $0x140] sm:$0xff]  ;;  %v2041_v13 = vld [vmem:[%s2600_s1 + $0x278] sm:$0xff] }
  0x19   :  { %1185 = vmatpush.bf16.msra.mxu3 %v1988_v23  ;;  %v2010_v10 = vld [vmem:[%s2600_s1 + $0x180] sm:$0xff]  ;;  %v1388_v14 = vld [vmem:[%s2602_s0 + $0x10] sm:$0xf]  ;;  %v1396_v16 = vld [vmem:[%s2602_s0 + $0x18] sm:$0xf] }
  0x1a   :  { %1144 = vmatpush.bf16.msra.mxu0 %v1963_v24  ;;  %v2018_v11 = vld [vmem:[%s2600_s1 + $0x1c0] sm:$0xff]  ;;  %v1956_v15 = vld [vmem:[%s2602_s0 + $0x4c] sm:$0xf0]  ;;  %v1957_v17 = vld [vmem:[%s2602_s0 + $0x54] sm:$0xf0] }
  0x1b   :  { %1158 = vmatpush.bf16.msra.mxu1 %v1971_v25  ;;  %v1948_v18 = vld [vmem:[%s2602_s0 + $0x14] sm:$0xf]  ;;  %v1949_v20 = vld [vmem:[%s2602_s0 + $0x1c] sm:$0xf]  ;;  %v1389_v24 = vor.u32 %v1956_v15, %v1388_v14  ;;  %v1397_v25 = vor.u32 %v1957_v17, %v1396_v16  ;;  %v2047_v34 = vld [vmem:[%s2600_s1 + $0x2a8] sm:$0xff] }
  0x1c   :  { %1172 = vmatpush.bf16.msra.mxu2 %v1979_v26  ;;  %v1390_v19 = vld [vmem:[%s2602_s0 + $0x50] sm:$0xf0]  ;;  %v1398_v21 = vld [vmem:[%s2602_s0 + $0x58] sm:$0xf0]  ;;  %v2055_v35 = vld [vmem:[%s2600_s1 + $0x2e8] sm:$0xff] }
  0x1d   :  { %1186 = vmatpush.bf16.msra.mxu3 %v1987_v27  ;;  %v2049_v22 = vld [vmem:[%s2600_s1 + $0x2b8] sm:$0xff]  ;;  %v1393_v26 = vor.u32 %v1948_v18, %v1390_v19  ;;  %v1401_v27 = vor.u32 %v1949_v20, %v1398_v21  ;;  %v2030_v36 = vld [vmem:[%s2600_s1 + $0x220] sm:$0xff]  ;;  %v2079_v14 = vld [vmem:[%s2600_s1 + $0x3a8] sm:$0xff] }
  0x1e   :  { %1145 = vmatpush.bf16.msra.mxu0 %v1962_v28  ;;  %v2057_v23 = vld [vmem:[%s2600_s1 + $0x2f8] sm:$0xff]  ;;  %v2032_v28 = vld [vmem:[%s2600_s1 + $0x230] sm:$0xff]  ;;  %v2038_v37 = vld [vmem:[%s2600_s1 + $0x260] sm:$0xff] }
  0x1f   :  { %1159 = vmatpush.bf16.msra.mxu1 %v1970_v29  ;;  %v2040_v29 = vld [vmem:[%s2600_s1 + $0x270] sm:$0xff]  ;;  %v2046_v38 = vld [vmem:[%s2600_s1 + $0x2a0] sm:$0xff]  ;;  %v2029_v40 = vld [vmem:[%s2600_s1 + $0x218] sm:$0xff] }
  0x20   :  { %1173 = vmatpush.bf16.msra.mxu2 %v1978_v30  ;;  %v2048_v30 = vld [vmem:[%s2600_s1 + $0x2b0] sm:$0xff]  ;;  %v2054_v39 = vld [vmem:[%s2600_s1 + $0x2e0] sm:$0xff]  ;;  %v2037_v41 = vld [vmem:[%s2600_s1 + $0x258] sm:$0xff] }
  0x21   :  { %1187 = vmatpush.bf16.msra.mxu3 %v1986_v31  ;;  %1146 = vmatmul.bf16.vlgmr.msra.gmra.mxu0 %v1373_v44  ;;  %v2056_v31 = vld [vmem:[%s2600_s1 + $0x2f0] sm:$0xff]  ;;  %v2087_v15 = vld [vmem:[%s2600_s1 + $0x3e8] sm:$0xff]  ;;  %v2062_v16 = vld [vmem:[%s2600_s1 + $0x320] sm:$0xff] }
  0x22   :  { %1194 = vmatpush.bf16.msrb.mxu0 %v2001_v32  ;;  %1160 = vmatmul.bf16.vlgmr.msra.gmra.mxu1 %v1377_v46  ;;  %v2031_v32 = vld [vmem:[%s2600_s1 + $0x228] sm:$0xff]  ;;  %v2028_v44 = vld [vmem:[%s2600_s1 + $0x210] sm:$0xff]  ;;  %v2070_v17 = vld [vmem:[%s2600_s1 + $0x360] sm:$0xff] }
  0x23   :  { %1208 = vmatpush.bf16.msrb.mxu1 %v2009_v33  ;;  %1174 = vmatmul.bf16.vlgmr.msra.gmra.mxu2 %v1381_v45  ;;  %v2039_v33 = vld [vmem:[%s2600_s1 + $0x268] sm:$0xff]  ;;  %v2036_v45 = vld [vmem:[%s2600_s1 + $0x250] sm:$0xff]  ;;  %v2078_v18 = vld [vmem:[%s2600_s1 + $0x3a0] sm:$0xff] }
  0x24   :  { %1222 = vmatpush.bf16.msrb.mxu2 %v2017_v42  ;;  %1188 = vmatmul.bf16.vlgmr.msra.gmra.mxu3 %v1385_v47  ;;  %v2045_v42 = vld [vmem:[%s2600_s1 + $0x298] sm:$0xff]  ;;  %v2044_v46 = vld [vmem:[%s2600_s1 + $0x290] sm:$0xff]  ;;  %v2086_v19 = vld [vmem:[%s2600_s1 + $0x3e0] sm:$0xff] }
  0x25   :  { %1236 = vmatpush.bf16.msrb.mxu3 %v2025_v43  ;;  %v2053_v43 = vld [vmem:[%s2600_s1 + $0x2d8] sm:$0xff]  ;;  %v2052_v47 = vld [vmem:[%s2600_s1 + $0x2d0] sm:$0xff] }
  0x26   :  { %1195 = vmatpush.bf16.msrb.mxu0 %v2000_v48  ;;  %v2027_v48 = vld [vmem:[%s2600_s1 + $0x208] sm:$0xff]  ;;  %v2061_v20 = vld [vmem:[%s2600_s1 + $0x318] sm:$0xff] }
  0x27   :  { %1209 = vmatpush.bf16.msrb.mxu1 %v2008_v49  ;;  %v2035_v49 = vld [vmem:[%s2600_s1 + $0x248] sm:$0xff]  ;;  %v2069_v21 = vld [vmem:[%s2600_s1 + $0x358] sm:$0xff] }
  0x28   :  { %1223 = vmatpush.bf16.msrb.mxu2 %v2016_v50  ;;  %v2043_v50 = vld [vmem:[%s2600_s1 + $0x288] sm:$0xff] }
  0x29   :  { %1237 = vmatpush.bf16.msrb.mxu3 %v2024_v51  ;;  %v2051_v51 = vld [vmem:[%s2600_s1 + $0x2c8] sm:$0xff] }
  0x2a   :  { %1196 = vmatpush.bf16.msrb.mxu0 %v1999_v52  ;;  %v2026_v52 = vld [vmem:[%s2600_s1 + $0x200] sm:$0xff] }
  0x2b   :  { %1210 = vmatpush.bf16.msrb.mxu1 %v2007_v53  ;;  %v2034_v53 = vld [vmem:[%s2600_s1 + $0x240] sm:$0xff] }
  0x2c   :  { %1224 = vmatpush.bf16.msrb.mxu2 %v2015_v54  ;;  %v2042_v54 = vld [vmem:[%s2600_s1 + $0x280] sm:$0xff] }
  0x2d   :  { %1238 = vmatpush.bf16.msrb.mxu3 %v2023_v55  ;;  %v2050_v55 = vld [vmem:[%s2600_s1 + $0x2c0] sm:$0xff] }
  0x2e   :  { %1197 = vmatpush.bf16.msrb.mxu0 %v1998_v56  ;;  %v2065_v56 = vld [vmem:[%s2600_s1 + $0x338] sm:$0xff] }
  0x2f   :  { %1211 = vmatpush.bf16.msrb.mxu1 %v2006_v57  ;;  %v2073_v57 = vld [vmem:[%s2600_s1 + $0x378] sm:$0xff] }
  0x30   :  { %1225 = vmatpush.bf16.msrb.mxu2 %v2014_v58  ;;  %v1404_v58 = vld [vmem:[%s2602_s0 + $0x20] sm:$0xf] }
  0x31   :  { %1239 = vmatpush.bf16.msrb.mxu3 %v2022_v59  ;;  %v1958_v59 = vld [vmem:[%s2602_s0 + $0x5c] sm:$0xf0] }
  0x32   :  { %1198 = vmatpush.bf16.msrb.mxu0 %v1997_v60  ;;  %v1412_v60 = vld [vmem:[%s2602_s0 + $0x28] sm:$0xf] }
  0x33   :  { %1212 = vmatpush.bf16.msrb.mxu1 %v2005_v61  ;;  %v1959_v61 = vld [vmem:[%s2602_s0 + $0x64] sm:$0xf0] }
  0x34   :  { %1226 = vmatpush.bf16.msrb.mxu2 %v2013_v62  ;;  %v1950_v62 = vld [vmem:[%s2602_s0 + $0x24] sm:$0xf] }
  0x35   :  { %1240 = vmatpush.bf16.msrb.mxu3 %v2021_v63  ;;  %v1406_v63 = vld [vmem:[%s2602_s0 + $0x60] sm:$0xf0] }
  0x36   :  { %1199 = vmatpush.bf16.msrb.mxu0 %v1996_v0  ;;  %v1951_v0 = vld [vmem:[%s2602_s0 + $0x2c] sm:$0xf] }
  0x37   :  { %1213 = vmatpush.bf16.msrb.mxu1 %v2004_v1  ;;  %v1414_v1 = vld [vmem:[%s2602_s0 + $0x68] sm:$0xf0] }
  0x38   :  { %1227 = vmatpush.bf16.msrb.mxu2 %v2012_v2  ;;  %v2081_v2 = vld [vmem:[%s2600_s1 + $0x3b8] sm:$0xff] }
  0x39   :  { %1241 = vmatpush.bf16.msrb.mxu3 %v2020_v3  ;;  %v2089_v3 = vld [vmem:[%s2600_s1 + $0x3f8] sm:$0xff] }
  0x3a   :  { %1200 = vmatpush.bf16.msrb.mxu0 %v1995_v4  ;;  %v1405_v4 = vor.u32 %v1958_v59, %v1404_v58 }
  0x3b   :  { %1214 = vmatpush.bf16.msrb.mxu1 %v2003_v5  ;;  %v1413_v5 = vor.u32 %v1959_v61, %v1412_v60 }
  0x3c   :  { %1228 = vmatpush.bf16.msrb.mxu2 %v2011_v6  ;;  %v1409_v6 = vor.u32 %v1950_v62, %v1406_v63 }
  0x3d   :  { %1242 = vmatpush.bf16.msrb.mxu3 %v2019_v7  ;;  %v1417_v7 = vor.u32 %v1951_v0, %v1414_v1 }
  0x3e   :  { %1201 = vmatpush.bf16.msrb.mxu0 %v1994_v8  ;;  %v2064_v8 = vld [vmem:[%s2600_s1 + $0x330] sm:$0xff] }
  0x3f   :  { %1215 = vmatpush.bf16.msrb.mxu1 %v2002_v9  ;;  %v2072_v9 = vld [vmem:[%s2600_s1 + $0x370] sm:$0xff] }
  0x40   :  { %1229 = vmatpush.bf16.msrb.mxu2 %v2010_v10  ;;  %v2080_v10 = vld [vmem:[%s2600_s1 + $0x3b0] sm:$0xff] }
  0x41   :  { %1243 = vmatpush.bf16.msrb.mxu3 %v2018_v11  ;;  %1202 = vmatmul.bf16.vlgmr.msrb.gmra.mxu0 %v1389_v24  ;;  %v2088_v11 = vld [vmem:[%s2600_s1 + $0x3f0] sm:$0xff] }
  0x42   :  { %1250 = vmatpush.bf16.msra.mxu0 %v2033_v12  ;;  %1216 = vmatmul.bf16.vlgmr.msrb.gmra.mxu1 %v1393_v26  ;;  %v2063_v12 = vld [vmem:[%s2600_s1 + $0x328] sm:$0xff]  ;;  %v2060_v24 = vld [vmem:[%s2600_s1 + $0x310] sm:$0xff] }
  0x43   :  { %1264 = vmatpush.bf16.msra.mxu1 %v2041_v13  ;;  %1230 = vmatmul.bf16.vlgmr.msrb.gmra.mxu2 %v1397_v25  ;;  %v2071_v13 = vld [vmem:[%s2600_s1 + $0x368] sm:$0xff]  ;;  %v2068_v25 = vld [vmem:[%s2600_s1 + $0x350] sm:$0xff] }
  0x44   :  { %1278 = vmatpush.bf16.msra.mxu2 %v2049_v22  ;;  %1244 = vmatmul.bf16.vlgmr.msrb.gmra.mxu3 %v1401_v27  ;;  %v2077_v22 = vld [vmem:[%s2600_s1 + $0x398] sm:$0xff]  ;;  %v2076_v26 = vld [vmem:[%s2600_s1 + $0x390] sm:$0xff] }
  0x45   :  { %1292 = vmatpush.bf16.msra.mxu3 %v2057_v23  ;;  %v2085_v23 = vld [vmem:[%s2600_s1 + $0x3d8] sm:$0xff]  ;;  %v2084_v27 = vld [vmem:[%s2600_s1 + $0x3d0] sm:$0xff] }
  0x46   :  { %1251 = vmatpush.bf16.msra.mxu0 %v2032_v28  ;;  %v2059_v28 = vld [vmem:[%s2600_s1 + $0x308] sm:$0xff] }
  0x47   :  { %1265 = vmatpush.bf16.msra.mxu1 %v2040_v29  ;;  %v2067_v29 = vld [vmem:[%s2600_s1 + $0x348] sm:$0xff] }
  0x48   :  { %1279 = vmatpush.bf16.msra.mxu2 %v2048_v30  ;;  %v2075_v30 = vld [vmem:[%s2600_s1 + $0x388] sm:$0xff] }
  0x49   :  { %1293 = vmatpush.bf16.msra.mxu3 %v2056_v31  ;;  %v2083_v31 = vld [vmem:[%s2600_s1 + $0x3c8] sm:$0xff] }
  0x4a   :  { %1252 = vmatpush.bf16.msra.mxu0 %v2031_v32  ;;  %v2058_v32 = vld [vmem:[%s2600_s1 + $0x300] sm:$0xff] }
  0x4b   :  { %1266 = vmatpush.bf16.msra.mxu1 %v2039_v33  ;;  %v2066_v33 = vld [vmem:[%s2600_s1 + $0x340] sm:$0xff] }
  0x4c   :  { %1280 = vmatpush.bf16.msra.mxu2 %v2047_v34  ;;  %v2074_v34 = vld [vmem:[%s2600_s1 + $0x380] sm:$0xff] }
  0x4d   :  { %1294 = vmatpush.bf16.msra.mxu3 %v2055_v35  ;;  %v2082_v35 = vld [vmem:[%s2600_s1 + $0x3c0] sm:$0xff] }
  0x4e   :  { %1253 = vmatpush.bf16.msra.mxu0 %v2030_v36  ;;  %v1420_v36 = vld [vmem:[%s2602_s0 + $0x30] sm:$0xf] }
  0x4f   :  { %1267 = vmatpush.bf16.msra.mxu1 %v2038_v37  ;;  %v1960_v37 = vld [vmem:[%s2602_s0 + $0x6c] sm:$0xf0] }
  0x50   :  { %1281 = vmatpush.bf16.msra.mxu2 %v2046_v38  ;;  %v1952_v38 = vld [vmem:[%s2602_s0 + $0x34] sm:$0xf] }
  0x51   :  { %1295 = vmatpush.bf16.msra.mxu3 %v2054_v39  ;;  %v1422_v39 = vld [vmem:[%s2602_s0 + $0x70] sm:$0xf0] }
  0x52   :  { %1254 = vmatpush.bf16.msra.mxu0 %v2029_v40  ;;  %v1428_v40 = vld [vmem:[%s2602_s0 + $0x38] sm:$0xf] }
  0x53   :  { %1268 = vmatpush.bf16.msra.mxu1 %v2037_v41  ;;  %v1961_v41 = vld [vmem:[%s2602_s0 + $0x74] sm:$0xf0] }
  0x54   :  { %1282 = vmatpush.bf16.msra.mxu2 %v2045_v42  ;;  %v1953_v42 = vld [vmem:[%s2602_s0 + $0x3c] sm:$0xf] }
  0x55   :  { %1296 = vmatpush.bf16.msra.mxu3 %v2053_v43  ;;  %v1430_v43 = vld [vmem:[%s2602_s0 + $0x78] sm:$0xf0] }
  0x56   :  { %1255 = vmatpush.bf16.msra.mxu0 %v2028_v44  ;;  %v1421_v44 = vor.u32 %v1960_v37, %v1420_v36 }
  0x57   :  { %1269 = vmatpush.bf16.msra.mxu1 %v2036_v45  ;;  %v1425_v45 = vor.u32 %v1952_v38, %v1422_v39 }
  0x58   :  { %1283 = vmatpush.bf16.msra.mxu2 %v2044_v46  ;;  %v1429_v46 = vor.u32 %v1961_v41, %v1428_v40 }
  0x59   :  { %1297 = vmatpush.bf16.msra.mxu3 %v2052_v47  ;;  %v1433_v47 = vor.u32 %v1953_v42, %v1430_v43 }
  0x5a   :  { %1256 = vmatpush.bf16.msra.mxu0 %v2027_v48 }
  0x5b   :  { %1270 = vmatpush.bf16.msra.mxu1 %v2035_v49 }
  0x5c   :  { %1284 = vmatpush.bf16.msra.mxu2 %v2043_v50 }
  0x5d   :  { %1298 = vmatpush.bf16.msra.mxu3 %v2051_v51 }
  0x5e   :  { %1257 = vmatpush.bf16.msra.mxu0 %v2026_v52 }
  0x5f   :  { %1271 = vmatpush.bf16.msra.mxu1 %v2034_v53  ;;  %v2090_v53 = vld [vmem:[%s2601_s2] ss:$0 sm:$0xff] }
  0x60   :  { %1285 = vmatpush.bf16.msra.mxu2 %v2042_v54 }
  0x61   :  { %1299 = vmatpush.bf16.msra.mxu3 %v2050_v55  ;;  %1258 = vmatmul.bf16.vlgmr.msra.gmra.mxu0 %v1405_v4 }
  0x62   :  { %1306 = vmatpush.bf16.msrb.mxu0 %v2065_v56  ;;  %1272 = vmatmul.bf16.vlgmr.msra.gmra.mxu1 %v1409_v6 }
  0x63   :  { %1320 = vmatpush.bf16.msrb.mxu1 %v2073_v57  ;;  %1286 = vmatmul.bf16.vlgmr.msra.gmra.mxu2 %v1413_v5 }
  0x64   :  { %1334 = vmatpush.bf16.msrb.mxu2 %v2081_v2  ;;  %1300 = vmatmul.bf16.vlgmr.msra.gmra.mxu3 %v1417_v7 }
  0x65   :  { %1348 = vmatpush.bf16.msrb.mxu3 %v2089_v3 }
  0x66   :  { %1307 = vmatpush.bf16.msrb.mxu0 %v2064_v8 }
  0x67   :  { %1321 = vmatpush.bf16.msrb.mxu1 %v2072_v9 }
  0x68   :  { %1335 = vmatpush.bf16.msrb.mxu2 %v2080_v10 }
  0x69   :  { %1349 = vmatpush.bf16.msrb.mxu3 %v2088_v11 }
  0x6a   :  { %1308 = vmatpush.bf16.msrb.mxu0 %v2063_v12 }
  0x6b   :  { %1322 = vmatpush.bf16.msrb.mxu1 %v2071_v13 }
  0x6c   :  { %1336 = vmatpush.bf16.msrb.mxu2 %v2079_v14 }
  0x6d   :  { %1350 = vmatpush.bf16.msrb.mxu3 %v2087_v15 }
  0x6e   :  { %1309 = vmatpush.bf16.msrb.mxu0 %v2062_v16 }
  0x6f   :  { %1323 = vmatpush.bf16.msrb.mxu1 %v2070_v17 }
  0x70   :  { %1337 = vmatpush.bf16.msrb.mxu2 %v2078_v18 }
  0x71   :  { %1351 = vmatpush.bf16.msrb.mxu3 %v2086_v19 }
  0x72   :  { %1310 = vmatpush.bf16.msrb.mxu0 %v2061_v20 }
  0x73   :  { %1324 = vmatpush.bf16.msrb.mxu1 %v2069_v21 }
  0x74   :  { %1338 = vmatpush.bf16.msrb.mxu2 %v2077_v22 }
  0x75   :  { %1352 = vmatpush.bf16.msrb.mxu3 %v2085_v23 }
  0x76   :  { %1311 = vmatpush.bf16.msrb.mxu0 %v2060_v24 }
  0x77   :  { %1325 = vmatpush.bf16.msrb.mxu1 %v2068_v25 }
  0x78   :  { %1339 = vmatpush.bf16.msrb.mxu2 %v2076_v26 }
  0x79   :  { %1353 = vmatpush.bf16.msrb.mxu3 %v2084_v27 }
  0x7a   :  { %1312 = vmatpush.bf16.msrb.mxu0 %v2059_v28 }
  0x7b   :  { %1326 = vmatpush.bf16.msrb.mxu1 %v2067_v29 }
  0x7c   :  { %1340 = vmatpush.bf16.msrb.mxu2 %v2075_v30 }
  0x7d   :  { %1354 = vmatpush.bf16.msrb.mxu3 %v2083_v31 }
  0x7e   :  { %1313 = vmatpush.bf16.msrb.mxu0 %v2058_v32 }
  0x7f   :  { %1327 = vmatpush.bf16.msrb.mxu1 %v2066_v33 }
  0x80   :  { %1341 = vmatpush.bf16.msrb.mxu2 %v2074_v34 }
  0x81   :  { %1355 = vmatpush.bf16.msrb.mxu3 %v2082_v35  ;;  %1314 = vmatmul.bf16.vlgmr.msrb.gmra.mxu0 %v1421_v44 }
  0x82   :  { %1328 = vmatmul.bf16.vlgmr.msrb.gmra.mxu1 %v1425_v45 }
  0x83   :  { %1342 = vmatmul.bf16.vlgmr.msrb.gmra.mxu2 %v1429_v46 }
  0x84   :  { %1356 = vmatmul.bf16.vlgmr.msrb.gmra.mxu3 %v1433_v47 }
  0x9e   :  { %v1147_v48 = vpop.f32.mrf.mxu0 }
  0x9f   :  { %v1161_v49 = vpop.f32.mrf.mxu1  ;;  %v1148_v55 = vadd.f32 %v2090_v53, %v1147_v48 }
  0xa1   :  { %v1162_v58 = vadd.f32 %v1161_v49, %v1148_v55 }
  0xa6   :  { %v1175_v50 = vpop.f32.mrf.mxu2  ;;  %v1149_v52 = vpop.f32.mrf.mxu0 }
  0xa7   :  { %v1189_v51 = vpop.f32.mrf.mxu3  ;;  %v1163_v54 = vpop.f32.mrf.mxu1  ;;  %v1176_v61 = vadd.f32 %v1175_v50, %v1162_v58  ;;  %v1150_v62 = vadd.f32 %v2090_v53, %v1149_v52 }
  0xa9   :  { %v1190_v1 = vadd.f32 %v1189_v51, %v1176_v61  ;;  %v1164_v2 = vadd.f32 %v1163_v54, %v1150_v62 }
  0xae   :  { %v1177_v56 = vpop.f32.mrf.mxu2 }
  0xaf   :  { %v1191_v57 = vpop.f32.mrf.mxu3  ;;  %v1178_v6 = vadd.f32 %v1177_v56, %v1164_v2 }
  0xb1   :  { %v1192_v10 = vadd.f32 %v1191_v57, %v1178_v6 }
  0xbe   :  { %v1203_v59 = vpop.f32.mrf.mxu0 }
  0xbf   :  { %v1217_v60 = vpop.f32.mrf.mxu1  ;;  %v1204_v4 = vadd.f32 %v1203_v59, %v1190_v1 }
  0xc1   :  { %v1218_v7 = vadd.f32 %v1217_v60, %v1204_v4 }
  0xc6   :  { %v1231_v63 = vpop.f32.mrf.mxu2  ;;  %v1205_v3 = vpop.f32.mrf.mxu0 }
  0xc7   :  { %v1245_v0 = vpop.f32.mrf.mxu3  ;;  %v1219_v5 = vpop.f32.mrf.mxu1  ;;  %v1232_v12 = vadd.f32 %v1231_v63, %v1218_v7  ;;  %v1206_v14 = vadd.f32 %v1205_v3, %v1192_v10 }
  0xc9   :  { %v1246_v15 = vadd.f32 %v1245_v0, %v1232_v12  ;;  %v1220_v18 = vadd.f32 %v1219_v5, %v1206_v14 }
  0xce   :  { %v1233_v8 = vpop.f32.mrf.mxu2 }
  0xcf   :  { %v1247_v9 = vpop.f32.mrf.mxu3  ;;  %v1234_v20 = vadd.f32 %v1233_v8, %v1220_v18 }
  0xd1   :  { %v1248_v24 = vadd.f32 %v1247_v9, %v1234_v20 }
  0xde   :  { %v1259_v11 = vpop.f32.mrf.mxu0 }
  0xdf   :  { %v1273_v13 = vpop.f32.mrf.mxu1  ;;  %v1260_v19 = vadd.f32 %v1259_v11, %v1246_v15 }
  0xe1   :  { %v1274_v22 = vadd.f32 %v1273_v13, %v1260_v19 }
  0xe6   :  { %v1287_v16 = vpop.f32.mrf.mxu2  ;;  %v1261_v21 = vpop.f32.mrf.mxu0 }
  0xe7   :  { %v1301_v17 = vpop.f32.mrf.mxu3  ;;  %v1275_v23 = vpop.f32.mrf.mxu1  ;;  %v1288_v25 = vadd.f32 %v1287_v16, %v1274_v22  ;;  %v1262_v26 = vadd.f32 %v1261_v21, %v1248_v24 }
  0xe9   :  { %v1302_v29 = vadd.f32 %v1301_v17, %v1288_v25  ;;  %v1276_v31 = vadd.f32 %v1275_v23, %v1262_v26 }
  0xee   :  { %v1289_v27 = vpop.f32.mrf.mxu2 }
  0xef   :  { %v1303_v28 = vpop.f32.mrf.mxu3  ;;  %v1290_v34 = vadd.f32 %v1289_v27, %v1276_v31 }
  0xf1   :  { %v1304_v38 = vadd.f32 %v1303_v28, %v1290_v34 }
  0xfe   :  { %v1315_v30 = vpop.f32.mrf.mxu0 }
  0xff   :  { %v1316_v32 = vadd.f32 %v1315_v30, %v1302_v29  ;;  %v1329_v33 = vpop.f32.mrf.mxu1 }
 0x101   :  { %v1330_v35 = vadd.f32 %v1329_v33, %v1316_v32 }
 0x106   :  { %v1343_v36 = vpop.f32.mrf.mxu2  ;;  %v1317_v40 = vpop.f32.mrf.mxu0 }
 0x107   :  { %v1357_v37 = vpop.f32.mrf.mxu3  ;;  %v1344_v39 = vadd.f32 %v1343_v36, %v1330_v35  ;;  %v1318_v42 = vadd.f32 %v1317_v40, %v1304_v38  ;;  %v1331_v44 = vpop.f32.mrf.mxu1 }
 0x109   :  { %v1358_v41 = vadd.f32 %v1357_v37, %v1344_v39  ;;  %v1332_v45 = vadd.f32 %v1331_v44, %v1318_v42 }
 0x10b   :  { %v1362_v43 = vmax.f32 %v1358_v41, 0.0 }
 0x10d   :  { %1364 = vst [vmem:[%s2603_s3] sm:$0xff] %v1362_v43 }
 0x10e   :  { %v1345_v46 = vpop.f32.mrf.mxu2 }
 0x10f   :  { %v1346_v47 = vadd.f32 %v1345_v46, %v1332_v45  ;;  %v1359_v48 = vpop.f32.mrf.mxu3 }
 0x111   :  { %v1360_v49 = vadd.f32 %v1359_v48, %v1346_v47 }
 0x113   :  { %v1363_v50 = vmax.f32 %v1360_v49, 0.0 }
 0x115   :  { %1365 = vst [vmem:[%s2603_s3 + $0x8] sm:$0xff] %v1363_v50 }

</bundles_post_ra>
